<compile_context>
chip_gen: v7x
topology: tpu7x:2x2x1
jax: 0.10.0
libtpu: 0.0.40
codegen_flags: <defaults>
</compile_context>

<pallas_src>
import functools

import jax
import jax.numpy as jnp
from jax.experimental import pallas as pl
from jax.experimental.pallas import tpu as pltpu


# MXU operand dtype; accumulation is always f32 via preferred_element_type.
MXU_DTYPE = jnp.bfloat16


# ----------------------------------------------------------------------------
# Fused kernel: cell MLP + batched drug GCN branch (both drugs) + final MLP
# ----------------------------------------------------------------------------
def _deepdds_fused_kernel(ctx_ref, adj_ref, x_ref, w_ref, b_ref, o_ref, *,
                          bb, nodes, d_out, w_slots, b_slots):
    f32 = jnp.float32

    def wmat(name):
        r0, rows, cols = w_slots[name]
        return w_ref[r0:r0 + rows, 0:cols]                 # bf16, static slice

    def bias(name):
        r0, cols = b_slots[name]
        return b_ref[r0:r0 + 1, 0:cols]                    # f32 (1, cols)

    def dense(h, name, relu):
        y = jnp.dot(h.astype(MXU_DTYPE), wmat(name),
                    preferred_element_type=f32) + bias(name)
        return jnp.maximum(y, 0.0) if relu else y

    # ---- cell-line branch: F.normalize(p=2, dim=1) + 3-layer MLP -----------
    c = ctx_ref[...].astype(f32)
    nrm = jnp.sqrt(jnp.sum(c * c, axis=1, keepdims=True))
    c = c / jnp.maximum(nrm, 1e-12)
    h = dense(c, "cell1", True)
    h = dense(h, "cell2", True)
    cell_out = dense(h, "cell3", False)                    # (bb, D)

    # ---- drug branch: 2*bb graphs, batched GCN, folded normalization -------
    g = 2 * bb
    a = adj_ref[...].reshape(g, nodes, nodes)              # bf16 0/1 (exact)
    deg = jnp.sum(a.astype(f32), axis=2, keepdims=True) + 1.0   # + self loop
    dsc = jax.lax.rsqrt(deg)                               # (g, N, 1)
    inv_deg = dsc * dsc                                    # 1/deg

    def propagate(h):
        # D^-1/2 (A + I) D^-1/2 @ h  ==  d*(A @ (d*h)) + deg^-1 * h
        hd = (dsc * h).astype(MXU_DTYPE)
        p = jnp.einsum('gij,gjf->gif', a, hd, preferred_element_type=f32)
        return dsc * p + inv_deg * h

    def feat_matmul(h, name):
        r0, rows, cols = w_slots[name]
        flat = h.reshape(g * nodes, rows).astype(MXU_DTYPE)
        return jnp.dot(flat, wmat(name),
                       preferred_element_type=f32).reshape(g, nodes, cols)

    hx = x_ref[...].reshape(g, nodes, -1).astype(f32)
    for name in ("gcn1", "gcn2", "gcn3"):
        fan_in = hx.shape[-1]
        fan_out = w_slots[name][2]
        if fan_out <= fan_in:        # shrinking layer: project, then propagate
            hx = propagate(feat_matmul(hx, name))
        else:                        # expanding layer: propagate narrow feats
            hx = feat_matmul(propagate(hx), name)
        hx = jnp.maximum(hx + bias(name), 0.0)

    # MaxReadout per graph, then 2-layer drug MLP (shared for both drugs).
    # TODO(synk): real padded molecules need a node-validity mask (padded rows
    # set to -inf before the max); the synthetic test uses all N rows as real.
    gfeat = jnp.max(hx, axis=1)                            # (g, F3)
    gfeat = dense(gfeat, "dmlp1", True)
    # dropout(p=0.2) is identity in eval mode and skipped.
    gfeat = dense(gfeat, "dmlp2", False)                   # (g, D)
    g_left, g_right = gfeat[:bb], gfeat[bb:]

    # ---- final head: lane-concat avoided via row-blocks of fw1 -------------
    r0, _, cols = w_slots["final1"]
    fw_c = w_ref[r0:r0 + d_out, 0:cols]
    fw_l = w_ref[r0 + d_out:r0 + 2 * d_out, 0:cols]
    fw_r = w_ref[r0 + 2 * d_out:r0 + 3 * d_out, 0:cols]
    h = (jnp.dot(cell_out.astype(MXU_DTYPE), fw_c, preferred_element_type=f32)
         + jnp.dot(g_left.astype(MXU_DTYPE), fw_l, preferred_element_type=f32)
         + jnp.dot(g_right.astype(MXU_DTYPE), fw_r, preferred_element_type=f32)
         + bias("final1"))
    h = jnp.maximum(h, 0.0)
    h = dense(h, "final2", True)
    o_ref[...] = dense(h, "final3", False)                 # (bb, 1)


# ----------------------------------------------------------------------------
# Host-side parameter packing: one bf16 weight buffer + one f32 bias buffer
# ----------------------------------------------------------------------------
def _pack_params(params):
    groups = [("cell", params["cell"]), ("gcn", params["gcn"]),
              ("dmlp", params["dmlp"]), ("final", params["final"])]
    wcols = max(8, max(w.shape[1] for _, layers in groups for w, _ in layers))

    w_blocks, b_blocks = [], []
    w_slots, b_slots = {}, {}
    r0 = 0
    b0 = 0
    for grp, layers in groups:
        for i, (w, b) in enumerate(layers):
            name = f"{grp}{i + 1}"
            fi, fo = w.shape
            rows_p = ((fi + 7) // 8) * 8                   # keep offsets 8-aligned
            blk = jnp.zeros((rows_p, wcols), jnp.float32).at[:fi, :fo].set(w)
            w_blocks.append(blk)
            w_slots[name] = (r0, fi, fo)
            r0 += rows_p
            bblk = jnp.zeros((8, wcols), jnp.float32).at[0, :fo].set(b.reshape(-1))
            b_blocks.append(bblk)
            b_slots[name] = (b0, fo)
            b0 += 8
    wbuf = jnp.concatenate(w_blocks, axis=0).astype(MXU_DTYPE)
    bbuf = jnp.concatenate(b_blocks, axis=0)               # f32
    return wbuf, bbuf, w_slots, b_slots


# ----------------------------------------------------------------------------
# Wrapper
# ----------------------------------------------------------------------------
def deepdds_forward(ctx, adj_l, x_l, adj_r, x_r, params, *, batch_block=8):
    B, C = ctx.shape
    _, N, F0 = x_l.shape
    D = params["cell"][-1][0].shape[1]

    bb = min(batch_block, B)
    if B % bb != 0 or not (bb % 8 == 0 or bb == B):
        raise ValueError("batch_block must divide B and be a multiple of 8")

    # Stack drugs on a leading side-axis (no block-diagonal materialization).
    adj_all = jnp.stack([adj_l, adj_r], axis=0).astype(MXU_DTYPE)   # (2, B, N, N)
    x_all = jnp.stack([x_l, x_r], axis=0).astype(MXU_DTYPE)         # (2, B, N, F0)

    wbuf, bbuf, w_slots, b_slots = _pack_params(params)

    out = pl.pallas_call(
        functools.partial(_deepdds_fused_kernel, bb=bb, nodes=N, d_out=D,
                          w_slots=w_slots, b_slots=b_slots),
        out_shape=jax.ShapeDtypeStruct((B, 1), jnp.float32),
        grid_spec=pltpu.PrefetchScalarGridSpec(
            num_scalar_prefetch=0,
            grid=(B // bb,),
            in_specs=[
                pl.BlockSpec((bb, C), lambda i: (i, 0)),             # ctx chunk
                pl.BlockSpec((2, bb, N, N), lambda i: (0, i, 0, 0)),  # adjacency chunk
                pl.BlockSpec((2, bb, N, F0), lambda i: (0, i, 0, 0)),  # node feats chunk
                pl.BlockSpec(wbuf.shape, lambda i: (0, 0)),           # weights (resident)
                pl.BlockSpec(bbuf.shape, lambda i: (0, 0)),           # biases  (resident)
            ],
            out_specs=pl.BlockSpec((bb, 1), lambda i: (i, 0)),
        ),
        compiler_params=pltpu.CompilerParams(
            dimension_semantics=("parallel",),            # shards chunks on v7x's 2 TCs
            vmem_limit_bytes=32 * 1024 * 1024),
    )(ctx.astype(jnp.float32), adj_all, x_all, wbuf, bbuf)
    return out.reshape(B)                                  # .squeeze()


# ----------------------------------------------------------------------------
# Deterministic parameter init + pure-JAX f32 reference
# ----------------------------------------------------------------------------
def _dense_init(key, fan_in, fan_out):
    kw, kb = jax.random.split(key)
    w = jax.random.normal(kw, (fan_in, fan_out), jnp.float32) / jnp.sqrt(fan_in)
    b = 0.01 * jax.random.normal(kb, (1, fan_out), jnp.float32)
    return w, b


def init_params(key, C, F0, gcn_dims, ctx_hidden, dmlp_hidden, fc_hidden, D):
    keys = iter(jax.random.split(key, 16))

    def stack(dims):
        return [_dense_init(next(keys), a, b) for a, b in zip(dims[:-1], dims[1:])]

    return {
        "cell": stack([C, *ctx_hidden, D]),
        "gcn": stack([F0, *gcn_dims]),
        "dmlp": stack([gcn_dims[-1], *dmlp_hidden, D]),
        "final": stack([3 * D, *fc_hidden, 1]),
    }


def reference_forward(ctx, adj_l, x_l, adj_r, x_r, params):
    dot = functools.partial(jnp.matmul, precision=jax.lax.Precision.HIGHEST)

    def mlp(x, layers, last_act=False):
        n = len(layers)
        for i, (w, b) in enumerate(layers):
            x = dot(x, w) + b
            if i < n - 1 or last_act:
                x = jnp.maximum(x, 0.0)
        return x

    def drug(adj, x):
        n = adj.shape[-1]
        a_hat = adj + jnp.eye(n, dtype=jnp.float32)[None]
        deg = jnp.sum(a_hat, axis=-1, keepdims=True)
        d_is = 1.0 / jnp.sqrt(deg)
        a_norm = d_is * a_hat * jnp.swapaxes(d_is, -1, -2)
        h = x
        for w, b in params["gcn"]:
            h = jnp.maximum(dot(a_norm, h) @ w + b, 0.0)
        g = jnp.max(h, axis=1)
        return mlp(g, params["dmlp"])

    nrm = jnp.sqrt(jnp.sum(ctx * ctx, axis=1, keepdims=True))
    ctx_n = ctx / jnp.maximum(nrm, 1e-12)
    mlp_out = mlp(ctx_n, params["cell"])
    fl, fr = drug(adj_l, x_l), drug(adj_r, x_r)
    cat = jnp.concatenate([mlp_out, fl, fr], axis=1)
    return mlp(cat, params["final"]).reshape(-1)


# ----------------------------------------------------------------------------
if __name__ == "__main__":
    # Small synthetic shapes consistent with the module structure.
    B = 16         # batch of (drug_1, drug_2, cell line) triples (2 grid chunks)
    N = 16         # padded atoms per molecule
    F0 = 32        # drug_channels (atom feature dim)
    GCN_DIMS = [64, 64, 32]     # drug_gcn_hidden_dims
    C = 64         # context_channels (cell-line feature dim)
    CTX_HIDDEN = [64, 32]       # context_hidden_dims
    D = 32         # context_output_size
    DMLP_HIDDEN = [2 * F0]      # drug_mlp_hidden_dims = [drug_channels * 2]
    FC_HIDDEN = [64, 32]        # fc_hidden_dims

    key = jax.random.PRNGKey(0)
    kp, kc, kal, kar, kxl, kxr = jax.random.split(key, 6)

    params = init_params(kp, C, F0, GCN_DIMS, CTX_HIDDEN, DMLP_HIDDEN, FC_HIDDEN, D)

    # Cell-line features (already looked up from the context vocab -> dense).
    ctx = jax.random.normal(kc, (B, C), jnp.float32)

    def rand_adj(k):
        u = (jax.random.uniform(k, (B, N, N)) < 0.2).astype(jnp.float32)
        a = jnp.triu(u, k=1)
        return a + jnp.swapaxes(a, 1, 2)        # symmetric, zero diagonal

    adj_l, adj_r = rand_adj(kal), rand_adj(kar)
    x_l = jax.random.normal(kxl, (B, N, F0), jnp.float32)
    x_r = jax.random.normal(kxr, (B, N, F0), jnp.float32)

    fwd = jax.jit(functools.partial(deepdds_forward, batch_block=8))
    out = jax.block_until_ready(fwd(ctx, adj_l, x_l, adj_r, x_r, params))

    ref = reference_forward(ctx, adj_l, x_l, adj_r, x_r, params)
    assert out.shape == (B,)
    assert jnp.all(jnp.isfinite(out))
    # Tolerance accounts for bf16 MXU operands (f32 accumulation) vs f32 ref.
    assert jnp.allclose(out, ref, rtol=3e-2, atol=3e-2), (out, ref)

    print("KERNEL_OK")
</pallas_src>

<mosaic_0001>
module attributes {stable_mosaic.version = 11 : i64} {
  func.func @_deepdds_fused_kernel(%arg0: i32, %arg1: memref<8x64xf32, #tpu.memory_space<vmem>>, %arg2: memref<2x8x16x16xbf16, #tpu.memory_space<vmem>>, %arg3: memref<2x8x16x32xbf16, #tpu.memory_space<vmem>>, %arg4: memref<608x64xbf16, #tpu.memory_space<vmem>>, %arg5: memref<88x64xf32, #tpu.memory_space<vmem>>, %arg6: memref<8x1xf32, #tpu.memory_space<vmem>>) attributes {dimension_semantics = [#tpu.dimension_semantics<parallel>], iteration_bounds = array<i64: 2>, scalar_prefetch = 0 : i64, scratch_operands = 0 : i64, tpu.core_type = #tpu.core_type<tc>, window_params = [{transform_indices = @transform_0, window_bounds = array<i64: 8, 64>}, {transform_indices = @transform_1, window_bounds = array<i64: 2, 8, 16, 16>}, {transform_indices = @transform_2, window_bounds = array<i64: 2, 8, 16, 32>}, {pipeline_mode = #tpu.pipeline_mode<synchronous>, transform_indices = @transform_3, window_bounds = array<i64: 608, 64>}, {pipeline_mode = #tpu.pipeline_mode<synchronous>, transform_indices = @transform_4, window_bounds = array<i64: 88, 64>}, {transform_indices = @transform_5, window_bounds = array<i64: 8, 1>}]} {
    %c0 = arith.constant 0 : index
    %c0_0 = arith.constant 0 : index
    %0 = vector.load %arg1[%c0, %c0_0] : memref<8x64xf32, #tpu.memory_space<vmem>>, vector<8x64xf32>
    %1 = arith.mulf %0, %0 : vector<8x64xf32>
    %cst = arith.constant dense<0.000000e+00> : vector<8xf32>
    %2 = vector.multi_reduction <add>, %1, %cst [1] : vector<8x64xf32> to vector<8xf32>
    %3 = vector.shape_cast %2 : vector<8xf32> to vector<8x1xf32>
    %4 = math.sqrt %3 : vector<8x1xf32>
    %cst_1 = arith.constant 9.99999996E-13 : f32
    %5 = vector.broadcast %cst_1 : f32 to vector<8x1xf32>
    %6 = arith.maximumf %4, %5 : vector<8x1xf32>
    %7 = vector.broadcast %6 : vector<8x1xf32> to vector<8x64xf32>
    %8 = arith.divf %0, %7 : vector<8x64xf32>
    %9 = arith.truncf %8 : vector<8x64xf32> to vector<8x64xbf16>
    %c0_2 = arith.constant 0 : index
    %c0_3 = arith.constant 0 : index
    %10 = vector.load %arg4[%c0_2, %c0_3] : memref<608x64xbf16, #tpu.memory_space<vmem>>, vector<64x64xbf16>
    %cst_4 = arith.constant dense<0.000000e+00> : vector<8x64xf32>
    %11 = tpu.matmul %9, %10, %cst_4 {dimension_numbers = #tpu.dot_dimension_numbers<[1], [0], [0], [1], [0, 0, 1, 1], [], []>} : vector<8x64xbf16>, vector<64x64xbf16>, vector<8x64xf32> -> vector<8x64xf32>
    %c0_5 = arith.constant 0 : index
    %c0_6 = arith.constant 0 : index
    %12 = vector.load %arg5[%c0_5, %c0_6] : memref<88x64xf32, #tpu.memory_space<vmem>>, vector<1x64xf32>
    %13 = vector.broadcast %12 : vector<1x64xf32> to vector<8x64xf32>
    %14 = arith.addf %11, %13 : vector<8x64xf32>
    %cst_7 = arith.constant 0.000000e+00 : f32
    %15 = vector.broadcast %cst_7 : f32 to vector<8x64xf32>
    %16 = arith.maximumf %14, %15 : vector<8x64xf32>
    %17 = arith.truncf %16 : vector<8x64xf32> to vector<8x64xbf16>
    %c64 = arith.constant 64 : index
    %c0_8 = arith.constant 0 : index
    %18 = vector.load %arg4[%c64, %c0_8] : memref<608x64xbf16, #tpu.memory_space<vmem>>, vector<64x32xbf16>
    %cst_9 = arith.constant dense<0.000000e+00> : vector<8x32xf32>
    %19 = tpu.matmul %17, %18, %cst_9 {dimension_numbers = #tpu.dot_dimension_numbers<[1], [0], [0], [1], [0, 0, 1, 1], [], []>} : vector<8x64xbf16>, vector<64x32xbf16>, vector<8x32xf32> -> vector<8x32xf32>
    %c8 = arith.constant 8 : index
    %c0_10 = arith.constant 0 : index
    %20 = vector.load %arg5[%c8, %c0_10] : memref<88x64xf32, #tpu.memory_space<vmem>>, vector<1x32xf32>
    %21 = vector.broadcast %20 : vector<1x32xf32> to vector<8x32xf32>
    %22 = arith.addf %19, %21 : vector<8x32xf32>
    %cst_11 = arith.constant 0.000000e+00 : f32
    %23 = vector.broadcast %cst_11 : f32 to vector<8x32xf32>
    %24 = arith.maximumf %22, %23 : vector<8x32xf32>
    %25 = arith.truncf %24 : vector<8x32xf32> to vector<8x32xbf16>
    %c128 = arith.constant 128 : index
    %c0_12 = arith.constant 0 : index
    %26 = vector.load %arg4[%c128, %c0_12] : memref<608x64xbf16, #tpu.memory_space<vmem>>, vector<32x32xbf16>
    %cst_13 = arith.constant dense<0.000000e+00> : vector<8x32xf32>
    %27 = tpu.matmul %25, %26, %cst_13 {dimension_numbers = #tpu.dot_dimension_numbers<[1], [0], [0], [1], [0, 0, 1, 1], [], []>} : vector<8x32xbf16>, vector<32x32xbf16>, vector<8x32xf32> -> vector<8x32xf32>
    %c16 = arith.constant 16 : index
    %c0_14 = arith.constant 0 : index
    %28 = vector.load %arg5[%c16, %c0_14] : memref<88x64xf32, #tpu.memory_space<vmem>>, vector<1x32xf32>
    %29 = vector.broadcast %28 : vector<1x32xf32> to vector<8x32xf32>
    %30 = arith.addf %27, %29 : vector<8x32xf32>
    %c0_15 = arith.constant 0 : index
    %c0_16 = arith.constant 0 : index
    %c0_17 = arith.constant 0 : index
    %c0_18 = arith.constant 0 : index
    %31 = vector.load %arg2[%c0_15, %c0_16, %c0_17, %c0_18] : memref<2x8x16x16xbf16, #tpu.memory_space<vmem>>, vector<2x8x16x16xbf16>
    %32 = vector.shape_cast %31 : vector<2x8x16x16xbf16> to vector<16x16x16xbf16>
    %33 = arith.extf %32 : vector<16x16x16xbf16> to vector<16x16x16xf32>
    %cst_19 = arith.constant dense<0.000000e+00> : vector<16x16xf32>
    %34 = vector.multi_reduction <add>, %33, %cst_19 [2] : vector<16x16x16xf32> to vector<16x16xf32>
    %35 = vector.shape_cast %34 : vector<16x16xf32> to vector<16x16x1xf32>
    %cst_20 = arith.constant 1.000000e+00 : f32
    %36 = vector.broadcast %cst_20 : f32 to vector<16x16x1xf32>
    %37 = arith.addf %35, %36 : vector<16x16x1xf32>
    %38 = math.rsqrt %37 : vector<16x16x1xf32>
    %39 = arith.mulf %38, %38 : vector<16x16x1xf32>
    %c0_21 = arith.constant 0 : index
    %c0_22 = arith.constant 0 : index
    %c0_23 = arith.constant 0 : index
    %c0_24 = arith.constant 0 : index
    %40 = vector.load %arg3[%c0_21, %c0_22, %c0_23, %c0_24] : memref<2x8x16x32xbf16, #tpu.memory_space<vmem>>, vector<2x8x16x32xbf16>
    %41 = vector.shape_cast %40 : vector<2x8x16x32xbf16> to vector<16x16x32xbf16>
    %42 = arith.extf %41 : vector<16x16x32xbf16> to vector<16x16x32xf32>
    %43 = vector.broadcast %38 : vector<16x16x1xf32> to vector<16x16x32xf32>
    %44 = arith.mulf %43, %42 : vector<16x16x32xf32>
    %45 = arith.truncf %44 : vector<16x16x32xf32> to vector<16x16x32xbf16>
    "tpu.trace_start"() <{level = 10 : i32, message = "gij,gjf->gif"}> : () -> ()
    %cst_25 = arith.constant dense<0.000000e+00> : vector<16x16x32xf32>
    %46 = tpu.matmul %32, %45, %cst_25 {dimension_numbers = #tpu.dot_dimension_numbers<[2], [1], [1], [2], [0, 0, 0, 1, 1, 2], [0], [0]>} : vector<16x16x16xbf16>, vector<16x16x32xbf16>, vector<16x16x32xf32> -> vector<16x16x32xf32>
    "tpu.trace_stop"() : () -> ()
    %47 = vector.broadcast %38 : vector<16x16x1xf32> to vector<16x16x32xf32>
    %48 = arith.mulf %47, %46 : vector<16x16x32xf32>
    %49 = vector.broadcast %39 : vector<16x16x1xf32> to vector<16x16x32xf32>
    %50 = arith.mulf %49, %42 : vector<16x16x32xf32>
    %51 = arith.addf %48, %50 : vector<16x16x32xf32>
    %52 = vector.shape_cast %51 : vector<16x16x32xf32> to vector<256x32xf32>
    %53 = arith.truncf %52 : vector<256x32xf32> to vector<256x32xbf16>
    %c160 = arith.constant 160 : index
    %c0_26 = arith.constant 0 : index
    %54 = vector.load %arg4[%c160, %c0_26] : memref<608x64xbf16, #tpu.memory_space<vmem>>, vector<32x64xbf16>
    %cst_27 = arith.constant dense<0.000000e+00> : vector<256x64xf32>
    %55 = tpu.matmul %53, %54, %cst_27 {dimension_numbers = #tpu.dot_dimension_numbers<[1], [0], [0], [1], [0, 0, 1, 1], [], []>} : vector<256x32xbf16>, vector<32x64xbf16>, vector<256x64xf32> -> vector<256x64xf32>
    %56 = vector.shape_cast %55 : vector<256x64xf32> to vector<16x16x64xf32>
    %c24 = arith.constant 24 : index
    %c0_28 = arith.constant 0 : index
    %57 = vector.load %arg5[%c24, %c0_28] : memref<88x64xf32, #tpu.memory_space<vmem>>, vector<1x64xf32>
    %58 = vector.shape_cast %57 : vector<1x64xf32> to vector<1x1x64xf32>
    %59 = vector.broadcast %58 : vector<1x1x64xf32> to vector<16x16x64xf32>
    %60 = arith.addf %56, %59 : vector<16x16x64xf32>
    %cst_29 = arith.constant 0.000000e+00 : f32
    %61 = vector.broadcast %cst_29 : f32 to vector<16x16x64xf32>
    %62 = arith.maximumf %60, %61 : vector<16x16x64xf32>
    %63 = vector.shape_cast %62 : vector<16x16x64xf32> to vector<256x64xf32>
    %64 = arith.truncf %63 : vector<256x64xf32> to vector<256x64xbf16>
    %c192 = arith.constant 192 : index
    %c0_30 = arith.constant 0 : index
    %65 = vector.load %arg4[%c192, %c0_30] : memref<608x64xbf16, #tpu.memory_space<vmem>>, vector<64x64xbf16>
    %cst_31 = arith.constant dense<0.000000e+00> : vector<256x64xf32>
    %66 = tpu.matmul %64, %65, %cst_31 {dimension_numbers = #tpu.dot_dimension_numbers<[1], [0], [0], [1], [0, 0, 1, 1], [], []>} : vector<256x64xbf16>, vector<64x64xbf16>, vector<256x64xf32> -> vector<256x64xf32>
    %67 = vector.shape_cast %66 : vector<256x64xf32> to vector<16x16x64xf32>
    %68 = vector.broadcast %38 : vector<16x16x1xf32> to vector<16x16x64xf32>
    %69 = arith.mulf %68, %67 : vector<16x16x64xf32>
    %70 = arith.truncf %69 : vector<16x16x64xf32> to vector<16x16x64xbf16>
    "tpu.trace_start"() <{level = 10 : i32, message = "gij,gjf->gif"}> : () -> ()
    %cst_32 = arith.constant dense<0.000000e+00> : vector<16x16x64xf32>
    %71 = tpu.matmul %32, %70, %cst_32 {dimension_numbers = #tpu.dot_dimension_numbers<[2], [1], [1], [2], [0, 0, 0, 1, 1, 2], [0], [0]>} : vector<16x16x16xbf16>, vector<16x16x64xbf16>, vector<16x16x64xf32> -> vector<16x16x64xf32>
    "tpu.trace_stop"() : () -> ()
    %72 = vector.broadcast %38 : vector<16x16x1xf32> to vector<16x16x64xf32>
    %73 = arith.mulf %72, %71 : vector<16x16x64xf32>
    %74 = vector.broadcast %39 : vector<16x16x1xf32> to vector<16x16x64xf32>
    %75 = arith.mulf %74, %67 : vector<16x16x64xf32>
    %76 = arith.addf %73, %75 : vector<16x16x64xf32>
    %c32 = arith.constant 32 : index
    %c0_33 = arith.constant 0 : index
    %77 = vector.load %arg5[%c32, %c0_33] : memref<88x64xf32, #tpu.memory_space<vmem>>, vector<1x64xf32>
    %78 = vector.shape_cast %77 : vector<1x64xf32> to vector<1x1x64xf32>
    %79 = vector.broadcast %78 : vector<1x1x64xf32> to vector<16x16x64xf32>
    %80 = arith.addf %76, %79 : vector<16x16x64xf32>
    %cst_34 = arith.constant 0.000000e+00 : f32
    %81 = vector.broadcast %cst_34 : f32 to vector<16x16x64xf32>
    %82 = arith.maximumf %80, %81 : vector<16x16x64xf32>
    %83 = vector.shape_cast %82 : vector<16x16x64xf32> to vector<256x64xf32>
    %84 = arith.truncf %83 : vector<256x64xf32> to vector<256x64xbf16>
    %c256 = arith.constant 256 : index
    %c0_35 = arith.constant 0 : index
    %85 = vector.load %arg4[%c256, %c0_35] : memref<608x64xbf16, #tpu.memory_space<vmem>>, vector<64x32xbf16>
    %cst_36 = arith.constant dense<0.000000e+00> : vector<256x32xf32>
    %86 = tpu.matmul %84, %85, %cst_36 {dimension_numbers = #tpu.dot_dimension_numbers<[1], [0], [0], [1], [0, 0, 1, 1], [], []>} : vector<256x64xbf16>, vector<64x32xbf16>, vector<256x32xf32> -> vector<256x32xf32>
    %87 = vector.shape_cast %86 : vector<256x32xf32> to vector<16x16x32xf32>
    %88 = vector.broadcast %38 : vector<16x16x1xf32> to vector<16x16x32xf32>
    %89 = arith.mulf %88, %87 : vector<16x16x32xf32>
    %90 = arith.truncf %89 : vector<16x16x32xf32> to vector<16x16x32xbf16>
    "tpu.trace_start"() <{level = 10 : i32, message = "gij,gjf->gif"}> : () -> ()
    %cst_37 = arith.constant dense<0.000000e+00> : vector<16x16x32xf32>
    %91 = tpu.matmul %32, %90, %cst_37 {dimension_numbers = #tpu.dot_dimension_numbers<[2], [1], [1], [2], [0, 0, 0, 1, 1, 2], [0], [0]>} : vector<16x16x16xbf16>, vector<16x16x32xbf16>, vector<16x16x32xf32> -> vector<16x16x32xf32>
    "tpu.trace_stop"() : () -> ()
    %92 = vector.broadcast %38 : vector<16x16x1xf32> to vector<16x16x32xf32>
    %93 = arith.mulf %92, %91 : vector<16x16x32xf32>
    %94 = vector.broadcast %39 : vector<16x16x1xf32> to vector<16x16x32xf32>
    %95 = arith.mulf %94, %87 : vector<16x16x32xf32>
    %96 = arith.addf %93, %95 : vector<16x16x32xf32>
    %c40 = arith.constant 40 : index
    %c0_38 = arith.constant 0 : index
    %97 = vector.load %arg5[%c40, %c0_38] : memref<88x64xf32, #tpu.memory_space<vmem>>, vector<1x32xf32>
    %98 = vector.shape_cast %97 : vector<1x32xf32> to vector<1x1x32xf32>
    %99 = vector.broadcast %98 : vector<1x1x32xf32> to vector<16x16x32xf32>
    %100 = arith.addf %96, %99 : vector<16x16x32xf32>
    %cst_39 = arith.constant 0.000000e+00 : f32
    %101 = vector.broadcast %cst_39 : f32 to vector<16x16x32xf32>
    %102 = arith.maximumf %100, %101 : vector<16x16x32xf32>
    %cst_40 = arith.constant dense<0xFF800000> : vector<16x32xf32>
    %103 = vector.multi_reduction <maximumf>, %102, %cst_40 [1] : vector<16x16x32xf32> to vector<16x32xf32>
    %104 = arith.truncf %103 : vector<16x32xf32> to vector<16x32xbf16>
    %c320 = arith.constant 320 : index
    %c0_41 = arith.constant 0 : index
    %105 = vector.load %arg4[%c320, %c0_41] : memref<608x64xbf16, #tpu.memory_space<vmem>>, vector<32x64xbf16>
    %cst_42 = arith.constant dense<0.000000e+00> : vector<16x64xf32>
    %106 = tpu.matmul %104, %105, %cst_42 {dimension_numbers = #tpu.dot_dimension_numbers<[1], [0], [0], [1], [0, 0, 1, 1], [], []>} : vector<16x32xbf16>, vector<32x64xbf16>, vector<16x64xf32> -> vector<16x64xf32>
    %c48 = arith.constant 48 : index
    %c0_43 = arith.constant 0 : index
    %107 = vector.load %arg5[%c48, %c0_43] : memref<88x64xf32, #tpu.memory_space<vmem>>, vector<1x64xf32>
    %108 = vector.broadcast %107 : vector<1x64xf32> to vector<16x64xf32>
    %109 = arith.addf %106, %108 : vector<16x64xf32>
    %cst_44 = arith.constant 0.000000e+00 : f32
    %110 = vector.broadcast %cst_44 : f32 to vector<16x64xf32>
    %111 = arith.maximumf %109, %110 : vector<16x64xf32>
    %112 = arith.truncf %111 : vector<16x64xf32> to vector<16x64xbf16>
    %c352 = arith.constant 352 : index
    %c0_45 = arith.constant 0 : index
    %113 = vector.load %arg4[%c352, %c0_45] : memref<608x64xbf16, #tpu.memory_space<vmem>>, vector<64x32xbf16>
    %cst_46 = arith.constant dense<0.000000e+00> : vector<16x32xf32>
    %114 = tpu.matmul %112, %113, %cst_46 {dimension_numbers = #tpu.dot_dimension_numbers<[1], [0], [0], [1], [0, 0, 1, 1], [], []>} : vector<16x64xbf16>, vector<64x32xbf16>, vector<16x32xf32> -> vector<16x32xf32>
    %c56 = arith.constant 56 : index
    %c0_47 = arith.constant 0 : index
    %115 = vector.load %arg5[%c56, %c0_47] : memref<88x64xf32, #tpu.memory_space<vmem>>, vector<1x32xf32>
    %116 = vector.broadcast %115 : vector<1x32xf32> to vector<16x32xf32>
    %117 = arith.addf %114, %116 : vector<16x32xf32>
    %118 = vector.extract_strided_slice %117 {offsets = [0, 0], sizes = [8, 32], strides = [1, 1]} : vector<16x32xf32> to vector<8x32xf32>
    %119 = vector.extract_strided_slice %117 {offsets = [8, 0], sizes = [8, 32], strides = [1, 1]} : vector<16x32xf32> to vector<8x32xf32>
    %c416 = arith.constant 416 : index
    %c0_48 = arith.constant 0 : index
    %120 = vector.load %arg4[%c416, %c0_48] : memref<608x64xbf16, #tpu.memory_space<vmem>>, vector<32x64xbf16>
    %c448 = arith.constant 448 : index
    %c0_49 = arith.constant 0 : index
    %121 = vector.load %arg4[%c448, %c0_49] : memref<608x64xbf16, #tpu.memory_space<vmem>>, vector<32x64xbf16>
    %c480 = arith.constant 480 : index
    %c0_50 = arith.constant 0 : index
    %122 = vector.load %arg4[%c480, %c0_50] : memref<608x64xbf16, #tpu.memory_space<vmem>>, vector<32x64xbf16>
    %123 = arith.truncf %30 : vector<8x32xf32> to vector<8x32xbf16>
    %cst_51 = arith.constant dense<0.000000e+00> : vector<8x64xf32>
    %124 = tpu.matmul %123, %120, %cst_51 {dimension_numbers = #tpu.dot_dimension_numbers<[1], [0], [0], [1], [0, 0, 1, 1], [], []>} : vector<8x32xbf16>, vector<32x64xbf16>, vector<8x64xf32> -> vector<8x64xf32>
    %125 = arith.truncf %118 : vector<8x32xf32> to vector<8x32xbf16>
    %cst_52 = arith.constant dense<0.000000e+00> : vector<8x64xf32>
    %126 = tpu.matmul %125, %121, %cst_52 {dimension_numbers = #tpu.dot_dimension_numbers<[1], [0], [0], [1], [0, 0, 1, 1], [], []>} : vector<8x32xbf16>, vector<32x64xbf16>, vector<8x64xf32> -> vector<8x64xf32>
    %127 = arith.addf %124, %126 : vector<8x64xf32>
    %128 = arith.truncf %119 : vector<8x32xf32> to vector<8x32xbf16>
    %cst_53 = arith.constant dense<0.000000e+00> : vector<8x64xf32>
    %129 = tpu.matmul %128, %122, %cst_53 {dimension_numbers = #tpu.dot_dimension_numbers<[1], [0], [0], [1], [0, 0, 1, 1], [], []>} : vector<8x32xbf16>, vector<32x64xbf16>, vector<8x64xf32> -> vector<8x64xf32>
    %130 = arith.addf %127, %129 : vector<8x64xf32>
    %c64_54 = arith.constant 64 : index
    %c0_55 = arith.constant 0 : index
    %131 = vector.load %arg5[%c64_54, %c0_55] : memref<88x64xf32, #tpu.memory_space<vmem>>, vector<1x64xf32>
    %132 = vector.broadcast %131 : vector<1x64xf32> to vector<8x64xf32>
    %133 = arith.addf %130, %132 : vector<8x64xf32>
    %cst_56 = arith.constant 0.000000e+00 : f32
    %134 = vector.broadcast %cst_56 : f32 to vector<8x64xf32>
    %135 = arith.maximumf %133, %134 : vector<8x64xf32>
    %136 = arith.truncf %135 : vector<8x64xf32> to vector<8x64xbf16>
    %c512 = arith.constant 512 : index
    %c0_57 = arith.constant 0 : index
    %137 = vector.load %arg4[%c512, %c0_57] : memref<608x64xbf16, #tpu.memory_space<vmem>>, vector<64x32xbf16>
    %cst_58 = arith.constant dense<0.000000e+00> : vector<8x32xf32>
    %138 = tpu.matmul %136, %137, %cst_58 {dimension_numbers = #tpu.dot_dimension_numbers<[1], [0], [0], [1], [0, 0, 1, 1], [], []>} : vector<8x64xbf16>, vector<64x32xbf16>, vector<8x32xf32> -> vector<8x32xf32>
    %c72 = arith.constant 72 : index
    %c0_59 = arith.constant 0 : index
    %139 = vector.load %arg5[%c72, %c0_59] : memref<88x64xf32, #tpu.memory_space<vmem>>, vector<1x32xf32>
    %140 = vector.broadcast %139 : vector<1x32xf32> to vector<8x32xf32>
    %141 = arith.addf %138, %140 : vector<8x32xf32>
    %cst_60 = arith.constant 0.000000e+00 : f32
    %142 = vector.broadcast %cst_60 : f32 to vector<8x32xf32>
    %143 = arith.maximumf %141, %142 : vector<8x32xf32>
    %144 = arith.truncf %143 : vector<8x32xf32> to vector<8x32xbf16>
    %c576 = arith.constant 576 : index
    %c0_61 = arith.constant 0 : index
    %145 = vector.load %arg4[%c576, %c0_61] : memref<608x64xbf16, #tpu.memory_space<vmem>>, vector<32x1xbf16>
    %cst_62 = arith.constant dense<0.000000e+00> : vector<8x1xf32>
    %146 = tpu.matmul %144, %145, %cst_62 {dimension_numbers = #tpu.dot_dimension_numbers<[1], [0], [0], [1], [0, 0, 1, 1], [], []>} : vector<8x32xbf16>, vector<32x1xbf16>, vector<8x1xf32> -> vector<8x1xf32>
    %c80 = arith.constant 80 : index
    %c0_63 = arith.constant 0 : index
    %147 = vector.load %arg5[%c80, %c0_63] : memref<88x64xf32, #tpu.memory_space<vmem>>, vector<1x1xf32>
    %148 = vector.broadcast %147 : vector<1x1xf32> to vector<8x1xf32>
    %149 = arith.addf %146, %148 : vector<8x1xf32>
    %c0_64 = arith.constant 0 : index
    %c0_65 = arith.constant 0 : index
    %150 = vector.load %arg6[%c0_64, %c0_65] : memref<8x1xf32, #tpu.memory_space<vmem>>, vector<8x1xf32>
    tpu.vector_store %arg6[%c0_64, %c0_65], %149 {strides = array<i32>} : memref<8x1xf32, #tpu.memory_space<vmem>>, vector<8x1xf32>,
    return
  }
  func.func @transform_0(%arg0: i32) -> (i32, i32) {
    %c0_i32 = arith.constant 0 : i32
    %c0_i32_0 = arith.constant 0 : i32
    return %arg0, %c0_i32 : i32, i32
  }
  func.func @transform_1(%arg0: i32) -> (i32, i32, i32, i32) {
    %c0_i32 = arith.constant 0 : i32
    %c0_i32_0 = arith.constant 0 : i32
    %c0_i32_1 = arith.constant 0 : i32
    %c0_i32_2 = arith.constant 0 : i32
    return %c0_i32, %arg0, %c0_i32_0, %c0_i32_1 : i32, i32, i32, i32
  }
  func.func @transform_2(%arg0: i32) -> (i32, i32, i32, i32) {
    %c0_i32 = arith.constant 0 : i32
    %c0_i32_0 = arith.constant 0 : i32
    %c0_i32_1 = arith.constant 0 : i32
    %c0_i32_2 = arith.constant 0 : i32
    return %c0_i32, %arg0, %c0_i32_0, %c0_i32_1 : i32, i32, i32, i32
  }
  func.func @transform_3(%arg0: i32) -> (i32, i32) {
    %c0_i32 = arith.constant 0 : i32
    %c0_i32_0 = arith.constant 0 : i32
    %c0_i32_1 = arith.constant 0 : i32
    return %c0_i32, %c0_i32_0 : i32, i32
  }
  func.func @transform_4(%arg0: i32) -> (i32, i32) {
    %c0_i32 = arith.constant 0 : i32
    %c0_i32_0 = arith.constant 0 : i32
    %c0_i32_1 = arith.constant 0 : i32
    return %c0_i32, %c0_i32_0 : i32, i32
  }
  func.func @transform_5(%arg0: i32) -> (i32, i32) {
    %c0_i32 = arith.constant 0 : i32
    %c0_i32_0 = arith.constant 0 : i32
    return %arg0, %c0_i32 : i32, i32
  }
}

</mosaic_0001>

<bundles_post_ra>
// kernel: deepdds_forward.1
= control target key start
LH: loop header
LB: loop body
LE: loop exit
PB: predicated region body
PF: predicated region fallthrough
CT: control target
= control target key end

     0   :  { %s6628_s18 = smov 0   ;;  %s6630_s19 = smov 0   ;;  %s8597_s0 = inlined_call_operand.vmem [shape: f32[16,64], index: 0, kind: input, shape index: {}]   ;;  %s8598_s1 = inlined_call_operand.vmem [shape: bf16[2,16,16,16], index: 1, kind: input, shape index: {}]   ;;  %s8599_s2 = inlined_call_operand.vmem [shape: bf16[2,16,16,32], index: 2, kind: input, shape index: {}]   ;;  %s8600_s3 = inlined_call_operand.vmem [shape: bf16[608,64], index: 3, kind: input, shape index: {}]   ;;  %s8601_s4 = inlined_call_operand.vmem [shape: f32[88,64], index: 4, kind: input, shape index: {}]   ;;  %s8602_s5 = inlined_call_operand.vmem [shape: f32[16,1], index: 5, kind: output, shape index: {}]  }
   0x1   :  { %s6632_s20 = smov 0  }
   0x2 LB: > { %s5443_s21 = sadd.s32 4294967295, %s6594_s20   ;;  %s6645_s22 = sadd.s32 1, %s6594_s20   ;;  %s6594_s20 = sphi %s6632_s20, %s9071_s20   ;;  %s6590_s19 = sphi %s6630_s19, %s9070_s19   ;;  %s6586_s18 = sphi %s6628_s18, %s9069_s18  }
   0x3   : > { %s45_s23 = ssub.s32 %s6594_s20, %s6645_s22  ;;  %s48_s24 = sadd.s32 1, %s6590_s19 }
   0x4   : > { %p46_p0 = scmp.eq.s32.totalorder %s45_s23, 0  ;;  %p55_p1 = scmp.ne.s32.totalorder %s6590_s19, %s6586_s18 }
   0x5   : > { %p56_p2 = scmp.eq.s32.totalorder %s6594_s20, 0  ;;  %p5446_p4 = scmp.ge.s32.totalorder %s6594_s20, 2 }
   0x6   : > { %s6654_s25 = scalar_select %p46_p0, %s6590_s19, %s48_s24  }
   0x7   : > { %p6656_p3 = por %p56_p2, %p55_p1  ;;  %181 = sbr.rel (%p5446_p4) target bundleno = 38 (0x26), region = 24 }
   0xe   : > { %191 = sbr.rel (!%p6656_p3) target bundleno = 26 (0x1a), region = 32  ;;  %s193_s27 = sand.u32 (%p6656_p3), 1, %s6590_s19  }
   0xf   : > { %s5634_s28 = sshll.u32 (%p6656_p3), %s6594_s20, 6  ;;  %s5447_s29 = sshll.u32 (%p6656_p3), %s193_s27, 7 }
  0x10   : > { %s6668_s7 = scalar_lea.vmem (%p6656_p3), %s8598_s1, %s5634_s28  ;;  %s195_s8 = scalar_lea.vmem (%p6656_p3), [#allocation2], %s5447_s29 }
  0x11   : > { %v215_v0 = vld [vmem:[%s6668_s7] sm:$0xff] (%p6656_p3)   ;;  %v219_v1 = vld [vmem:[%s6668_s7 + $0x8] sm:$0xff] (%p6656_p3)   ;;  %v223_v2 = vld [vmem:[%s6668_s7 + $0x10] sm:$0xff] (%p6656_p3)  }
  0x12   : > { %216 = vst [vmem:[%s195_s8] sm:$0xff] (%p6656_p3), %v215_v0   ;;  %220 = vst [vmem:[%s195_s8 + $0x8] sm:$0xff] (%p6656_p3), %v219_v1   ;;  %v227_v3 = vld [vmem:[%s6668_s7 + $0x18] sm:$0xff] (%p6656_p3)   ;;  %v231_v4 = vld [vmem:[%s6668_s7 + $0x20] sm:$0xff] (%p6656_p3)  }
  0x13   : > { %224 = vst [vmem:[%s195_s8 + $0x10] sm:$0xff] (%p6656_p3), %v223_v2   ;;  %v235_v5 = vld [vmem:[%s6668_s7 + $0x28] sm:$0xff] (%p6656_p3)   ;;  %228 = vst [vmem:[%s195_s8 + $0x18] sm:$0xff] (%p6656_p3), %v227_v3   ;;  %v239_v6 = vld [vmem:[%s6668_s7 + $0x30] sm:$0xff] (%p6656_p3)  }
  0x14   : > { %232 = vst [vmem:[%s195_s8 + $0x20] sm:$0xff] (%p6656_p3), %v231_v4   ;;  %236 = vst [vmem:[%s195_s8 + $0x28] sm:$0xff] (%p6656_p3), %v235_v5   ;;  %v243_v7 = vld [vmem:[%s6668_s7 + $0x38] sm:$0xff] (%p6656_p3)   ;;  %v247_v8 = vld [vmem:[%s6668_s7 + $0x80] sm:$0xff] (%p6656_p3)  }
  0x15   : > { %240 = vst [vmem:[%s195_s8 + $0x30] sm:$0xff] %v239_v6   ;;  %244 = vst [vmem:[%s195_s8 + $0x38] sm:$0xff] %v243_v7   ;;  %v251_v9 = vld [vmem:[%s6668_s7 + $0x88] sm:$0xff]   ;;  %v255_v10 = vld [vmem:[%s6668_s7 + $0x90] sm:$0xff]  }
  0x16   : > { %248 = vst [vmem:[%s195_s8 + $0x40] sm:$0xff] %v247_v8   ;;  %v259_v11 = vld [vmem:[%s6668_s7 + $0x98] sm:$0xff]   ;;  %252 = vst [vmem:[%s195_s8 + $0x48] sm:$0xff] %v251_v9   ;;  %v263_v12 = vld [vmem:[%s6668_s7 + $0xa0] sm:$0xff]  }
  0x17   : > { %256 = vst [vmem:[%s195_s8 + $0x50] sm:$0xff] %v255_v10   ;;  %260 = vst [vmem:[%s195_s8 + $0x58] sm:$0xff] %v259_v11   ;;  %v267_v13 = vld [vmem:[%s6668_s7 + $0xa8] sm:$0xff]   ;;  %v271_v14 = vld [vmem:[%s6668_s7 + $0xb0] sm:$0xff]  }
  0x18   : > { %264 = vst [vmem:[%s195_s8 + $0x60] sm:$0xff] %v263_v12   ;;  %268 = vst [vmem:[%s195_s8 + $0x68] sm:$0xff] %v267_v13   ;;  %v275_v15 = vld [vmem:[%s6668_s7 + $0xb8] sm:$0xff]  }
  0x19   : > { %272 = vst [vmem:[%s195_s8 + $0x70] sm:$0xff] %v271_v14   ;;  %276 = vst [vmem:[%s195_s8 + $0x78] sm:$0xff] %v275_v15  }
  0x1a PF: > { %365 = sbr.rel (!%p6656_p3) target bundleno = 38 (0x26), region = 73  ;;  %s367_s9 = sand.u32 (%p6656_p3), 1, %s6590_s19  }
  0x1b   : > { %s5636_s10 = sshll.u32 (%p6656_p3), %s6594_s20, 6  ;;  %s5451_s11 = sshll.u32 (%p6656_p3), %s367_s9, 7 }
  0x1c   : > { %s6693_s14 = scalar_lea.vmem (%p6656_p3), %s8599_s2, %s5636_s10  ;;  %s369_s15 = scalar_lea.vmem (%p6656_p3), [#allocation3], %s5451_s11 }
  0x1d   : > { %v389_v16 = vld [vmem:[%s6693_s14] sm:$0xff] (%p6656_p3)   ;;  %v393_v17 = vld [vmem:[%s6693_s14 + $0x8] sm:$0xff] (%p6656_p3)   ;;  %v397_v18 = vld [vmem:[%s6693_s14 + $0x10] sm:$0xff] (%p6656_p3)  }
  0x1e   : > { %390 = vst [vmem:[%s369_s15] sm:$0xff] (%p6656_p3), %v389_v16   ;;  %394 = vst [vmem:[%s369_s15 + $0x8] sm:$0xff] (%p6656_p3), %v393_v17   ;;  %v401_v19 = vld [vmem:[%s6693_s14 + $0x18] sm:$0xff] (%p6656_p3)   ;;  %v405_v20 = vld [vmem:[%s6693_s14 + $0x20] sm:$0xff] (%p6656_p3)  }
  0x1f   : > { %398 = vst [vmem:[%s369_s15 + $0x10] sm:$0xff] (%p6656_p3), %v397_v18   ;;  %v409_v21 = vld [vmem:[%s6693_s14 + $0x28] sm:$0xff] (%p6656_p3)   ;;  %402 = vst [vmem:[%s369_s15 + $0x18] sm:$0xff] (%p6656_p3), %v401_v19   ;;  %v413_v22 = vld [vmem:[%s6693_s14 + $0x30] sm:$0xff] (%p6656_p3)  }
  0x20   : > { %406 = vst [vmem:[%s369_s15 + $0x20] sm:$0xff] (%p6656_p3), %v405_v20   ;;  %410 = vst [vmem:[%s369_s15 + $0x28] sm:$0xff] (%p6656_p3), %v409_v21   ;;  %v417_v23 = vld [vmem:[%s6693_s14 + $0x38] sm:$0xff] (%p6656_p3)   ;;  %v421_v24 = vld [vmem:[%s6693_s14 + $0x80] sm:$0xff] (%p6656_p3)  }
  0x21   : > { %414 = vst [vmem:[%s369_s15 + $0x30] sm:$0xff] %v413_v22   ;;  %418 = vst [vmem:[%s369_s15 + $0x38] sm:$0xff] %v417_v23   ;;  %v425_v25 = vld [vmem:[%s6693_s14 + $0x88] sm:$0xff]   ;;  %v429_v26 = vld [vmem:[%s6693_s14 + $0x90] sm:$0xff]  }
  0x22   : > { %422 = vst [vmem:[%s369_s15 + $0x40] sm:$0xff] %v421_v24   ;;  %v433_v27 = vld [vmem:[%s6693_s14 + $0x98] sm:$0xff]   ;;  %426 = vst [vmem:[%s369_s15 + $0x48] sm:$0xff] %v425_v25   ;;  %v437_v28 = vld [vmem:[%s6693_s14 + $0xa0] sm:$0xff]  }
  0x23   : > { %430 = vst [vmem:[%s369_s15 + $0x50] sm:$0xff] %v429_v26   ;;  %434 = vst [vmem:[%s369_s15 + $0x58] sm:$0xff] %v433_v27   ;;  %v441_v29 = vld [vmem:[%s6693_s14 + $0xa8] sm:$0xff]   ;;  %v445_v30 = vld [vmem:[%s6693_s14 + $0xb0] sm:$0xff]  }
  0x24   : > { %438 = vst [vmem:[%s369_s15 + $0x60] sm:$0xff] %v437_v28   ;;  %442 = vst [vmem:[%s369_s15 + $0x68] sm:$0xff] %v441_v29   ;;  %v449_v31 = vld [vmem:[%s6693_s14 + $0xb8] sm:$0xff]  }
  0x25   : > { %446 = vst [vmem:[%s369_s15 + $0x70] sm:$0xff] %v445_v30   ;;  %450 = vst [vmem:[%s369_s15 + $0x78] sm:$0xff] %v449_v31  }
  0x26 PF: > { %p5455_p5 = scmp.ge.s32.totalorder %s6594_s20, 1  ;;  %p538_p6 = scmp.lt.s32.totalorder %s6594_s20, 3 }
  0x28   : > { %p539_p7 = pnand %p5455_p5, %p538_p6 }
  0x2a   : > { %542 = sbr.rel (%p539_p7) target bundleno = 3226 (0xc9a), region = 114 }
  0x31   : > { %p586_p8 = scmp.lt.s32.totalorder %s5443_s21, 1  ;;  %vm599_vm0 = vcmask 523264   ;;  %v6434_v35 = vld [vmem:[%s8600_s3] sm:$0xff]   ;;  %v8619_v36 = vmov 0.0   ;;  %v6435_v37 = vld [vmem:[%s8600_s3 + $0x8] sm:$0xff]   ;;  %vm6597_vm1 = vmmov 0  }
  0x32   : > { %5908 = vmatprep.subr.bf16.mxu0 %v8619_v36  ;;  %5920 = vmatprep.subr.bf16.mxu1 %v8619_v36  ;;  %v6436_v38 = vld [vmem:[%s8600_s3 + $0x10] sm:$0xff]   ;;  %v6437_v39 = vld [vmem:[%s8600_s3 + $0x18] sm:$0xff]   ;;  %s545_s8 = sand.u32 1, %s6586_s18   ;;  %v6451_v40 = vld [vmem:[%s8600_s3 + $0x20] sm:$0xff]   ;;  %vm907_vm2 = vcmask 130048   ;;  %vm799_vm5 = vcmask 261120  }
  0x33   : > { %s9073_s21 = smov (!%p586_p8, %s5443_s21), 1  ;;  %5909 = vmatpush3.bf16.msra.mxu0 %v6434_v35  ;;  %5916 = vmatprep.mubr.msk.bf16.mxu0 %vm6597_vm1, %v8619_v36  ;;  %s6756_s11 = sshll.u32 %s545_s8, 7  ;;  %v6453_v10 = vld [vmem:[%s8600_s3 + $0x28] sm:$0xff]   ;;  %vm4855_vm6 = vcmask 1041409   ;;  %vm4857_vm7 = vcmask 1042434   ;;  %vm4859_vm8 = vcmask 1043459  }
  0x34   : > { %s5458_s16 = sshll.u32 %s9073_s21, 3  ;;  %5910 = vmatprep.subr.bf16.mxu0 %v8619_v36  ;;  %5928 = vmatprep.mubr.msk.bf16.mxu1 %vm6597_vm1, %v8619_v36  ;;  %s6759_s12 = scalar_lea.vmem [#allocation2], %s6756_s11  ;;  %vm4861_vm9 = vcmask 1044484   ;;  %vm4863_vm10 = vcmask 1045509   ;;  %vm4865_vm11 = vcmask 1046534   ;;  %vm4867_vm12 = vcmask 1047559  }
  0x35   : > { %s589_s24 = scalar_lea.vmem %s8597_s0, %s5458_s16  ;;  %5921 = vmatpush3.bf16.msra.mxu1 %v6451_v40  ;;  %v6762_v41 = vld [vmem:[%s6759_s12] sm:$0xff]   ;;  %v6765_v42 = vld [vmem:[%s6759_s12 + $0x8] sm:$0xff]   ;;  %v6773_v47 = vld [vmem:[%s6759_s12 + $0x10] sm:$0xff]   ;;  %s595_s29 = scalar_lea.vmem %s8602_s5, %s5458_s16  ;;  %vm5352_vm13 = vcmask 7168  }
  0x36   : > { %v6725_v32 = vld [vmem:[%s589_s24] sm:$0xff]  ;;  %8799 = vst [vmem:[#allocation4_spill] sm:$0xff] %v6762_v41  ;;  %8800 = vst [vmem:[#allocation5_spill] sm:$0xff] %v6765_v42  ;;  %5922 = vmatprep.subr.bf16.mxu1 %v8619_v36  ;;  %v876_v43 = vunpack.c.h.bf16 %v6762_v41  ;;  %v875_v44 = vunpack.c.l.bf16 %v6762_v41  ;;  %v877_v45 = vunpack.c.l.bf16 %v6765_v42  ;;  %v878_v46 = vunpack.c.h.bf16 %v6765_v42  ;;  %v6782_v54 = vld [vmem:[%s6759_s12 + $0x18] sm:$0xff]   ;;  %s6903_s24 = scalar_lea.vmem [#allocation3], %s6756_s11 }
  0x37   : > { %v598_v33 = vmul.f32 %v6725_v32, %v6725_v32  ;;  %5911 = vmatpush3.bf16.msra.mxu0 %v6435_v37  ;;  %8801 = vst [vmem:[#allocation6_spill] sm:$0xff] %v6773_v47  ;;  %v879_v52 = vunpack.c.l.bf16 %v6773_v47  ;;  %v880_v53 = vunpack.c.h.bf16 %v6773_v47  ;;  %8802 = vst [vmem:[#allocation7_spill] sm:$0xff] %v6782_v54  ;;  %v881_v57 = vunpack.c.l.bf16 %v6782_v54  ;;  %v6789_v59 = vld [vmem:[%s6759_s12 + $0x20] sm:$0xff]   ;;  %v6796_v0 = vld [vmem:[%s6759_s12 + $0x28] sm:$0xff]  }
  0x38   : > { %5912 = vmatprep.subr.bf16.mxu0 %v8619_v36  ;;  %v911_v48 = vsel %vm907_vm2, %v876_v43, 0.0  ;;  %v908_v49 = vsel %vm907_vm2, %v875_v44, 0.0  ;;  %v914_v50 = vsel %vm907_vm2, %v877_v45, 0.0  ;;  %v917_v51 = vsel %vm907_vm2, %v878_v46, 0.0  ;;  %8803 = vst [vmem:[#allocation8_spill] sm:$0xff] %v6789_v59  ;;  %8804 = vst [vmem:[#allocation9_spill] sm:$0xff] %v6796_v0 }
  0x39   : > { %v600_v34 = vsel %vm599_vm0, %v598_v33, 0.0  ;;  %912 = vadd.xlane.f32.xlu1 %v911_v48  ;;  %v920_v55 = vsel %vm907_vm2, %v879_v52, 0.0  ;;  %v923_v56 = vsel %vm907_vm2, %v880_v53, 0.0  ;;  %v882_v58 = vunpack.c.h.bf16 %v6782_v54  ;;  %v6803_v5 = vld [vmem:[%s6759_s12 + $0x30] sm:$0xff]   ;;  %v6813_v11 = vld [vmem:[%s6759_s12 + $0x38] sm:$0xff]   ;;  %5923 = vmatpush3.bf16.msra.mxu1 %v6453_v10  ;;  %v6821_v16 = vld [vmem:[%s6759_s12 + $0x40] sm:$0xff]  }
  0x3a   : > { %601 = vadd.xlane.f32.xlu0 %v600_v34  ;;  %v926_v60 = vsel %vm907_vm2, %v881_v57, 0.0  ;;  %v883_v62 = vunpack.c.l.bf16 %v6789_v59  ;;  %v884_v63 = vunpack.c.h.bf16 %v6789_v59  ;;  %v885_v3 = vunpack.c.l.bf16 %v6796_v0  ;;  %8805 = vst [vmem:[#allocation10_spill] sm:$0xff] %v6803_v5  ;;  %8806 = vst [vmem:[#allocation11_spill] sm:$0xff] %v6813_v11  ;;  %5924 = vmatprep.subr.bf16.mxu1 %v8619_v36  ;;  %v6828_v21 = vld [vmem:[%s6759_s12 + $0x48] sm:$0xff]   ;;  %v6835_v26 = vld [vmem:[%s6759_s12 + $0x50] sm:$0xff]  }
  0x3b   : > { %5913 = vmatpush3.bf16.msra.mxu0 %v6436_v38  ;;  %v929_v61 = vsel %vm907_vm2, %v882_v58, 0.0  ;;  %v886_v4 = vunpack.c.h.bf16 %v6796_v0  ;;  %v887_v8 = vunpack.c.l.bf16 %v6803_v5  ;;  %v888_v9 = vunpack.c.h.bf16 %v6803_v5  ;;  %8807 = vst [vmem:[#allocation12_spill] sm:$0xff] %v6821_v16  ;;  %8808 = vst [vmem:[#allocation13_spill] sm:$0xff] %v6828_v21  ;;  %v6842_v31 = vld [vmem:[%s6759_s12 + $0x58] sm:$0xff]   ;;  %v6849_v38 = vld [vmem:[%s6759_s12 + $0x60] sm:$0xff]  }
  0x3c   : > { %5914 = vmatprep.subr.bf16.mxu0 %v8619_v36  ;;  %v932_v1 = vsel %vm907_vm2, %v883_v62, 0.0  ;;  %v935_v2 = vsel %vm907_vm2, %v884_v63, 0.0  ;;  %v938_v6 = vsel %vm907_vm2, %v885_v3, 0.0  ;;  %v889_v14 = vunpack.c.l.bf16 %v6813_v11  ;;  %8809 = vst [vmem:[#allocation14_spill] sm:$0xff] %v6835_v26  ;;  %8810 = vst [vmem:[#allocation15_spill] sm:$0xff] %v6842_v31  ;;  %v6856_v45 = vld [vmem:[%s6759_s12 + $0x68] sm:$0xff]  }
  0x3d   : > { %915 = vadd.xlane.f32.xlu1 %v914_v50  ;;  %v941_v7 = vsel %vm907_vm2, %v886_v4, 0.0  ;;  %v944_v12 = vsel %vm907_vm2, %v887_v8, 0.0  ;;  %v947_v13 = vsel %vm907_vm2, %v888_v9, 0.0  ;;  %v890_v15 = vunpack.c.h.bf16 %v6813_v11  ;;  %8811 = vst [vmem:[#allocation16_spill] sm:$0xff] %v6849_v38  ;;  %8812 = vst [vmem:[#allocation17_spill] sm:$0xff] %v6856_v45  ;;  %v6455_v8 = vld [vmem:[%s8600_s3 + $0x30] sm:$0xff]  }
  0x3e   : > { %909 = vadd.xlane.f32.xlu0 %v908_v49  ;;  %v950_v17 = vsel %vm907_vm2, %v889_v14, 0.0  ;;  %v891_v19 = vunpack.c.l.bf16 %v6821_v16  ;;  %v892_v20 = vunpack.c.h.bf16 %v6821_v16  ;;  %v893_v24 = vunpack.c.l.bf16 %v6828_v21  ;;  %5925 = vmatpush3.bf16.msra.mxu1 %v6455_v8  ;;  %v6456_v9 = vld [vmem:[%s8600_s3 + $0x38] sm:$0xff]  }
  0x3f   : > { %5915 = vmatpush3.bf16.msra.mxu0 %v6437_v39  ;;  %v953_v18 = vsel %vm907_vm2, %v890_v15, 0.0  ;;  %v894_v25 = vunpack.c.h.bf16 %v6828_v21  ;;  %v895_v29 = vunpack.c.l.bf16 %v6835_v26  ;;  %v896_v30 = vunpack.c.h.bf16 %v6835_v26  ;;  %5926 = vmatprep.subr.bf16.mxu1 %v8619_v36 }
  0x40   : > { %5932 = vmatprep.subr.bf16.mxu0 %v8619_v36  ;;  %v956_v22 = vsel %vm907_vm2, %v891_v19, 0.0  ;;  %v959_v23 = vsel %vm907_vm2, %v892_v20, 0.0  ;;  %v962_v27 = vsel %vm907_vm2, %v893_v24, 0.0  ;;  %v897_v35 = vunpack.c.l.bf16 %v6842_v31 }
  0x41   : > { %921 = vadd.xlane.f32.xlu1 %v920_v55  ;;  %v965_v28 = vsel %vm907_vm2, %v894_v25, 0.0  ;;  %v968_v33 = vsel %vm907_vm2, %v895_v29, 0.0  ;;  %v971_v34 = vsel %vm907_vm2, %v896_v30, 0.0  ;;  %v898_v37 = vunpack.c.h.bf16 %v6842_v31 }
  0x42   : > { %918 = vadd.xlane.f32.xlu0 %v917_v51  ;;  %v974_v39 = vsel %vm907_vm2, %v897_v35, 0.0  ;;  %v899_v43 = vunpack.c.l.bf16 %v6849_v38  ;;  %v900_v44 = vunpack.c.h.bf16 %v6849_v38  ;;  %v901_v49 = vunpack.c.l.bf16 %v6856_v45  ;;  %v6863_v51 = vld [vmem:[%s6759_s12 + $0x70] sm:$0xff]   ;;  %5927 = vmatpush3.bf16.msra.mxu1 %v6456_v9 }
  0x43   : > { %v977_v40 = vsel %vm907_vm2, %v898_v37, 0.0  ;;  %v902_v50 = vunpack.c.h.bf16 %v6856_v45  ;;  %8813 = vst [vmem:[#allocation18_spill] sm:$0xff] %v6863_v51  ;;  %v903_v55 = vunpack.c.l.bf16 %v6863_v51  ;;  %5940 = vmatprep.subr.bf16.mxu1 %v8619_v36 }
  0x44   : > { %v980_v46 = vsel %vm907_vm2, %v899_v43, 0.0  ;;  %v983_v48 = vsel %vm907_vm2, %v900_v44, 0.0  ;;  %v986_v52 = vsel %vm907_vm2, %v901_v49, 0.0 }
  0x45   : > { %927 = vadd.xlane.f32.xlu1 %v926_v60  ;;  %v989_v53 = vsel %vm907_vm2, %v902_v50, 0.0  ;;  %v992_v57 = vsel %vm907_vm2, %v903_v55, 0.0 }
  0x46   : > { %924 = vadd.xlane.f32.xlu0 %v923_v56  ;;  %v904_v56 = vunpack.c.h.bf16 %v6863_v51 }
  0x48   : > { %v995_v58 = vsel %vm907_vm2, %v904_v56, 0.0 }
  0x49   : > { %933 = vadd.xlane.f32.xlu1 %v932_v1 }
  0x4a   : > { %930 = vadd.xlane.f32.xlu0 %v929_v61 }
  0x4d   : > { %939 = vadd.xlane.f32.xlu1 %v938_v6 }
  0x4e   : > { %936 = vadd.xlane.f32.xlu0 %v935_v2 }
  0x51   : > { %945 = vadd.xlane.f32.xlu1 %v944_v12 }
  0x52   : > { %942 = vadd.xlane.f32.xlu0 %v941_v7 }
  0x55   : > { %951 = vadd.xlane.f32.xlu1 %v950_v17 }
  0x56   : > { %948 = vadd.xlane.f32.xlu0 %v947_v13 }
  0x59   : > { %957 = vadd.xlane.f32.xlu1 %v956_v22 }
  0x5a   : > { %954 = vadd.xlane.f32.xlu0 %v953_v18 }
  0x5d   : > { %963 = vadd.xlane.f32.xlu1 %v962_v27 }
  0x5e   : > { %960 = vadd.xlane.f32.xlu0 %v959_v23 }
  0x61   : > { %969 = vadd.xlane.f32.xlu1 %v968_v33 }
  0x62   : > { %966 = vadd.xlane.f32.xlu0 %v965_v28 }
  0x65   : > { %975 = vadd.xlane.f32.xlu1 %v974_v39 }
  0x66   : > { %972 = vadd.xlane.f32.xlu0 %v971_v34 }
  0x69   : > { %981 = vadd.xlane.f32.xlu1 %v980_v46 }
  0x6a   : > { %978 = vadd.xlane.f32.xlu0 %v977_v40  ;;  %v6906_v40 = vld [vmem:[%s6903_s24] sm:$0xff]  }
  0x6b   : > { %v8617_v49 = vunpack.c.h.bf16 %v6906_v40 }
  0x6d   : > { %987 = vadd.xlane.f32.xlu1 %v986_v52  ;;  %v5460_v52 = vld [vmem:[%s8601_s4] ss:$0 sm:$0xff] }
  0x6e   : > { %984 = vadd.xlane.f32.xlu0 %v983_v48  ;;  %v8618_v48 = vunpack.c.l.bf16 %v6906_v40 }
  0x71   : > { %993 = vadd.xlane.f32.xlu1 %v992_v57 }
  0x72   : > { %990 = vadd.xlane.f32.xlu0 %v989_v53 }
  0x76   : > { %996 = vadd.xlane.f32.xlu0 %v995_v58 }
  0xc6   : > { %v913_v15 = vpop.xlane.xlu1 %912 }
  0xc7   : > { %v602_v60 = vpop.xlane.xlu0 %601  ;;  %v1005_v28 = vadd.f32 1.0, %v913_v15 }
  0xc8   : > { %6504 = vrsqrt.f32 %v602_v60  ;;  %vm605_vm3 = vcmp.eq.f32.partialorder %v602_v60, inf  ;;  %v608_v63 = vand.u32 2147483648, %v602_v60  ;;  %vm607_vm4 = vcmp.eq.f32.partialorder %v602_v60, 0.0 }
  0xca   : > { %v6890_v18 = vpop.xlane.xlu1 %915 }
  0xcb   : > { %v910_v17 = vpop.xlane.xlu0 %909 }
  0xcc   : > { %v1004_v29 = vadd.f32 1.0, %v910_v17 }
  0xce   : > { %v922_v20 = vpop.xlane.xlu1 %921 }
  0xcf   : > { %v6892_v19 = vpop.xlane.xlu0 %918  ;;  %v1008_v35 = vadd.f32 1.0, %v922_v20 }
  0xd2   : > { %v6505_v61 = vpop.eup %6504  ;;  %v6894_v23 = vpop.xlane.xlu1 %927 }
  0xd3   : > { %v604_v62 = vmul.f32 %v6505_v61, %v602_v60  ;;  %v925_v22 = vpop.xlane.xlu0 %924 }
  0xd4   : > { %v1009_v39 = vadd.f32 1.0, %v925_v22 }
  0xd5   : > { %v606_v1 = vsel %vm605_vm3, %v602_v60, %v604_v62 }
  0xd6   : > { %v609_v2 = vsel %vm607_vm4, %v608_v63, %v606_v1  ;;  %v934_v25 = vpop.xlane.xlu1 %933  ;;  %v6928_v1 = vld [vmem:[%s6903_s24 + $0x10] sm:$0xff]  }
  0xd7   : > { %v610_v3 = vmax.f32 %v609_v2, 1e-12  ;;  %v6896_v24 = vpop.xlane.xlu0 %930  ;;  %v1012_v53 = vadd.f32 1.0, %v934_v25  ;;  %v8612_v8 = vunpack.c.l.bf16 %v6928_v1  ;;  %v8609_v9 = vunpack.c.h.bf16 %v6928_v1  ;;  %v6951_v25 = vld [vmem:[%s6903_s24 + $0x20] sm:$0xff]  }
  0xd9   : > { %6506 = vrcp.f32 %v610_v3 }
  0xda   : > { %v6898_v30 = vpop.xlane.xlu1 %939  ;;  %6508 = vrsqrt.f32 %v1005_v28 }
  0xdb   : > { %v937_v27 = vpop.xlane.xlu0 %936  ;;  %6510 = vrsqrt.f32 %v1004_v29 }
  0xdc   : > { %6512 = vrsqrt.f32 %v1008_v35  ;;  %v1013_v55 = vadd.f32 1.0, %v937_v27  ;;  %v8606_v35 = vunpack.c.h.bf16 %v6951_v25 }
  0xdd   : > { %6514 = vrsqrt.f32 %v1009_v39 }
  0xde   : > { %v946_v34 = vpop.xlane.xlu1 %945  ;;  %6516 = vrsqrt.f32 %v1012_v53 }
  0xdf   : > { %v6900_v33 = vpop.xlane.xlu0 %942  ;;  %6518 = vrsqrt.f32 %v1013_v55 }
  0xe2   : > { %v6908_v43 = vpop.xlane.xlu1 %951 }
  0xe3   : > { %v6507_v4 = vpop.eup %6506  ;;  %v949_v37 = vpop.xlane.xlu0 %948 }
  0xe4   : > { %v612_v6 = vmul.f32 %v6507_v4, %v6725_v32  ;;  %v6884_v32 = vld [vmem:[%s6759_s12 + $0x78] sm:$0xff]   ;;  %v6912_v46 = vpop.eup %6508  ;;  %v1017_v17 = vadd.f32 1.0, %v949_v37 }
  0xe5   : > { %8814 = vst [vmem:[#allocation19_spill] sm:$0xff] %v6884_v32  ;;  %v905_v10 = vunpack.c.l.bf16 %v6884_v32  ;;  %v906_v12 = vunpack.c.h.bf16 %v6884_v32  ;;  %v6916_v50 = vpop.eup %6510  ;;  %v1165_v60 = vmul.f32 %v6912_v46, %v8617_v49 }
  0xe6   : > { %v613_v7 = vpack.c.bf16 %v612_v6, %v612_v6  ;;  %8815 = vst [vmem:[#allocation20_spill] sm:$0xff] %v6916_v50  ;;  %v958_v56 = vpop.xlane.xlu1 %957  ;;  %v1164_v58 = vmul.f32 %v6916_v50, %v8618_v48  ;;  %v6930_v6 = vpop.eup %6512 }
  0xe7   : > { %v998_v13 = vsel %vm907_vm2, %v905_v10, 0.0  ;;  %v1001_v14 = vsel %vm907_vm2, %v906_v12, 0.0  ;;  %v6910_v44 = vpop.xlane.xlu0 %954  ;;  %v6934_v10 = vpop.eup %6514  ;;  %v1168_v20 = vmul.f32 %v6930_v6, %v8612_v8 }
  0xe8   : > { %5917 = vmatmul.mubr.msk.bf16.vlgmr.msra.gmra.mrb[0].mxu0 %vm599_vm0, %v613_v7  ;;  %999 = vadd.xlane.f32.xlu1 %v998_v13  ;;  %v1196_v7 = vpack.c.bf16 %v1165_v60, %v1164_v58  ;;  %v1169_v22 = vmul.f32 %v6934_v10, %v8609_v9  ;;  %v6953_v28 = vpop.eup %6516  ;;  %v6971_v58 = vld [vmem:[%s6903_s24 + $0x30] sm:$0xff]  }
  0xe9   : > { %5936 = vmatprep.mubr.msk.bf16.mxu0 %vm6597_vm1, %v8619_v36  ;;  %1002 = vadd.xlane.f32.xlu0 %v1001_v14  ;;  %v1016_v14 = vadd.f32 1.0, %v946_v34  ;;  %8816 = vst [vmem:[#allocation21_spill] sm:$0xff] %v6953_v28  ;;  %v8607_v34 = vunpack.c.l.bf16 %v6951_v25  ;;  %v6957_v39 = vpop.eup %6518 }
  0xea   : > { %v6936_v13 = vpop.xlane.xlu1 %963  ;;  %v1198_v29 = vpack.c.bf16 %v1169_v22, %v1168_v20  ;;  %8817 = vst [vmem:[#allocation22_spill] sm:$0xff] %v6957_v39  ;;  %v6995_v22 = vld [vmem:[%s6903_s24 + $0x40] sm:$0xff]  }
  0xeb   : > { %v961_v61 = vpop.xlane.xlu0 %960  ;;  %6520 = vrsqrt.f32 %v1016_v14  ;;  %v1172_v55 = vmul.f32 %v6953_v28, %v8607_v34 }
  0xec   : > { %6522 = vrsqrt.f32 %v1017_v17  ;;  %v1021_v53 = vadd.f32 1.0, %v961_v61 }
  0xee   : > { %v970_v27 = vpop.xlane.xlu1 %969 }
  0xef   : > { %v6938_v15 = vpop.xlane.xlu0 %966 }
  0xf3   : > { %v973_v37 = vpop.xlane.xlu0 %972 }
  0xf5   : > { %v6977_v61 = vpop.eup %6520 }
  0xf6   : > { %8818 = vst [vmem:[#allocation23_spill] sm:$0xff] %v6977_v61 }
  0xf7   : > { %v6975_v60 = vpop.xlane.xlu0 %978 }
  0xfb   : > { %v985_v20 = vpop.xlane.xlu0 %984 }
 0x1bb   : > { %v688_v57 = vpop.f32.mrb[0].mxu0 }
 0x1bc   : > { %v689_v62 = vadd.f32 %v5460_v52, %v688_v57  ;;  %v5918_v63 = vpop.f32.mrb[1].mxu0  ;;  %v1020_v52 = vadd.f32 1.0, %v958_v56  ;;  %v1173_v57 = vmul.f32 %v6957_v39, %v8606_v35  ;;  %v6973_v56 = vpop.xlane.xlu1 %975 }
 0x1bd   : > { %v691_v2 = vpop.f32.mrb[2].mxu0  ;;  %v8604_v63 = vunpack.c.l.bf16 %v6971_v58 }
 0x1be   : > { %v694_v3 = vmax.f32 %v689_v62, 0.0  ;;  %v5919_v4 = vpop.f32.mrb[3].mxu0  ;;  %6524 = vrsqrt.f32 %v1020_v52  ;;  %v1200_v62 = vpack.c.bf16 %v1173_v57, %v1172_v55  ;;  %v8603_v2 = vunpack.c.h.bf16 %v6971_v58 }
 0x1bf   : > { %6526 = vrsqrt.f32 %v1021_v53  ;;  %v1024_v4 = vadd.f32 1.0, %v970_v27  ;;  %v1176_v14 = vmul.f32 %v6977_v61, %v8604_v63  ;;  %v8608_v52 = vunpack.c.h.bf16 %v6995_v22 }
 0x1c0   : > { %v695_v12 = vpack.c.bf16 %v694_v3, %v694_v3  ;;  %v6981_v3 = vpop.eup %6522 }
 0x1c1   : > { %8819 = vst [vmem:[#allocation24_spill] sm:$0xff] %v6981_v3  ;;  %v1177_v17 = vmul.f32 %v6981_v3, %v8603_v2  ;;  %6528 = vrsqrt.f32 %v1024_v4  ;;  %v1029_v4 = vadd.f32 1.0, %v985_v20 }
 0x1c2   : > { %5929 = vmatmul.mubr.msk.bf16.vlgmr.msra.gmra.mrb[0].mxu1 %vm599_vm0, %v695_v12  ;;  %v982_v12 = vpop.xlane.xlu1 %981 }
 0x1c3   : > { %5941 = vmatpush3.bf16.msra.mxu1 %v1196_v7  ;;  %5942 = vmatprep.mubr.msk.bf16.mxu1 %vm6597_vm1, %v8619_v36  ;;  %v1025_v7 = vadd.f32 1.0, %v973_v37  ;;  %v8605_v37 = vunpack.c.l.bf16 %v6995_v22  ;;  %v1028_v57 = vadd.f32 1.0, %v982_v12  ;;  %v7019_v12 = vld [vmem:[%s6903_s24 + $0x50] sm:$0xff]  }
 0x1c4   : > { %5952 = vmatprep.subr.bf16.mxu1 %v8619_v36  ;;  %v8611_v63 = vunpack.c.l.bf16 %v7019_v12 }
 0x1c5   : > { %6530 = vrsqrt.f32 %v1025_v7 }
 0x1c6   : > { %v7003_v55 = vpop.xlane.xlu1 %987  ;;  %6532 = vrsqrt.f32 %v1028_v57 }
 0x1c7   : > { %6534 = vrsqrt.f32 %v1029_v4 }
 0x1c8   : > { %v6997_v27 = vpop.eup %6524 }
 0x1c9   : > { %8820 = vst [vmem:[#allocation25_spill] sm:$0xff] %v6997_v27  ;;  %v7001_v53 = vpop.eup %6526  ;;  %v1180_v7 = vmul.f32 %v6997_v27, %v8605_v37  ;;  %v8610_v37 = vunpack.c.h.bf16 %v7019_v12 }
 0x1ca   : > { %5943 = vmatmul.mubr.msk.bf16.vlgmr.msra.gmra.mrb[4].mxu1 %vm907_vm2, %v6762_v41  ;;  %8821 = vst [vmem:[#allocation26_spill] sm:$0xff] %v7001_v53 }
 0x1cb   : > { %5953 = vmatpush3.bf16.msra.mxu1 %v1198_v29  ;;  %5954 = vmatprep.mubr.msk.bf16.mxu1 %vm6597_vm1, %v8619_v36  ;;  %v1202_v29 = vpack.c.bf16 %v1177_v17, %v1176_v14  ;;  %v1181_v14 = vmul.f32 %v7001_v53, %v8608_v52  ;;  %v994_v17 = vpop.xlane.xlu1 %993  ;;  %v7021_v20 = vpop.eup %6528 }
 0x1cc   : > { %5964 = vmatprep.subr.bf16.mxu1 %v8619_v36  ;;  %8822 = vst [vmem:[#allocation27_spill] sm:$0xff] %v7021_v20  ;;  %v1032_v34 = vadd.f32 1.0, %v994_v17  ;;  %v1184_v57 = vmul.f32 %v7021_v20, %v8611_v63 }
 0x1ce   : > { %6536 = vrsqrt.f32 %v1032_v34 }
 0x1cf   : > { %v7025_v35 = vpop.eup %6530 }
 0x1d0   : > { %8823 = vst [vmem:[#allocation28_spill] sm:$0xff] %v7025_v35  ;;  %v1185_v4 = vmul.f32 %v7025_v35, %v8610_v37 }
 0x1d2   : > { %5955 = vmatmul.mubr.msk.bf16.vlgmr.msra.gmra.mrb[8].mxu1 %vm907_vm2, %v6773_v47 }
 0x1d3   : > { %5965 = vmatpush3.bf16.msra.mxu1 %v1200_v62  ;;  %5966 = vmatprep.mubr.msk.bf16.mxu1 %vm6597_vm1, %v8619_v36  ;;  %v7005_v62 = vpop.xlane.xlu0 %990 }
 0x1d4   : > { %5976 = vmatprep.subr.bf16.mxu1 %v8619_v36 }
 0x1d7   : > { %v997_v2 = vpop.xlane.xlu0 %996 }
 0x1d8   : > { %v1033_v52 = vadd.f32 1.0, %v997_v2  ;;  %v7041_v2 = vpop.eup %6532 }
 0x1d9   : > { %8824 = vst [vmem:[#allocation29_spill] sm:$0xff] %v7041_v2  ;;  %v7045_v9 = vpop.eup %6534 }
 0x1da   : > { %5967 = vmatmul.mubr.msk.bf16.vlgmr.msra.gmra.mrb[12].mxu1 %vm907_vm2, %v6789_v59  ;;  %6538 = vrsqrt.f32 %v1033_v52  ;;  %8825 = vst [vmem:[#allocation30_spill] sm:$0xff] %v7045_v9 }
 0x1db   : > { %5977 = vmatpush3.bf16.msra.mxu1 %v1202_v29  ;;  %5978 = vmatprep.mubr.msk.bf16.mxu1 %vm6597_vm1, %v8619_v36  ;;  %v1204_v29 = vpack.c.bf16 %v1181_v14, %v1180_v7  ;;  %v7039_v7 = vld [vmem:[%s6903_s24 + $0x60] sm:$0xff]   ;;  %v1206_v14 = vpack.c.bf16 %v1185_v4, %v1184_v57  ;;  %v7059_v57 = vld [vmem:[%s6903_s24 + $0x70] sm:$0xff]   ;;  %v7061_v4 = vpop.eup %6536 }
 0x1dc   : > { %5988 = vmatprep.subr.bf16.mxu1 %v8619_v36  ;;  %v8616_v17 = vunpack.c.l.bf16 %v7039_v7  ;;  %8826 = vst [vmem:[#allocation31_spill] sm:$0xff] %v7061_v4  ;;  %v8614_v63 = vunpack.c.h.bf16 %v7059_v57 }
 0x1de   : > { %v1188_v34 = vmul.f32 %v7041_v2, %v8616_v17 }
 0x1e2   : > { %5979 = vmatmul.mubr.msk.bf16.vlgmr.msra.gmra.mrb[16].mxu1 %vm907_vm2, %v6803_v5 }
 0x1e3   : > { %5989 = vmatpush3.bf16.msra.mxu1 %v1204_v29  ;;  %5990 = vmatprep.mubr.msk.bf16.mxu1 %vm6597_vm1, %v8619_v36  ;;  %v8613_v29 = vunpack.c.h.bf16 %v7039_v7 }
 0x1e4   : > { %6000 = vmatprep.subr.bf16.mxu1 %v8619_v36  ;;  %v7065_v8 = vpop.eup %6538 }
 0x1e5   : > { %v1189_v52 = vmul.f32 %v7045_v9, %v8613_v29  ;;  %8827 = vst [vmem:[#allocation32_spill] sm:$0xff] %v7065_v8 }
 0x1e7   : > { %v1208_v37 = vpack.c.bf16 %v1189_v52, %v1188_v34  ;;  %v1193_v34 = vmul.f32 %v7065_v8, %v8614_v63  ;;  %v1010_v63 = vadd.f32 1.0, %v6894_v23  ;;  %v5466_v23 = vld [vmem:[%s8601_s4 + $0x8] ss:$0 sm:$0xff] }
 0x1ea   : > { %5991 = vmatmul.mubr.msk.bf16.vlgmr.msra.gmra.mrb[20].mxu1 %vm907_vm2, %v6821_v16 }
 0x1eb   : > { %6001 = vmatpush3.bf16.msra.mxu1 %v1206_v14  ;;  %6002 = vmatprep.mubr.msk.bf16.mxu1 %vm6597_vm1, %v8619_v36  ;;  %v8615_v14 = vunpack.c.l.bf16 %v7059_v57 }
 0x1ec   : > { %6012 = vmatprep.subr.bf16.mxu1 %v8619_v36 }
 0x1ed   : > { %v1192_v29 = vmul.f32 %v7061_v4, %v8615_v14  ;;  %v1011_v14 = vadd.f32 1.0, %v6896_v24  ;;  %v1015_v24 = vadd.f32 1.0, %v6900_v33 }
 0x1ef   : > { %v1210_v52 = vpack.c.bf16 %v1193_v34, %v1192_v29  ;;  %v6459_v29 = vld [vmem:[%s8600_s3 + $0x48] sm:$0xff]   ;;  %v1006_v34 = vadd.f32 1.0, %v6890_v18 }
 0x1f1   : > { %6540 = vrsqrt.f32 %v1006_v34 }
 0x1f2   : > { %6003 = vmatmul.mubr.msk.bf16.vlgmr.msra.gmra.mrb[24].mxu1 %vm907_vm2, %v6835_v26 }
 0x1f3   : > { %6013 = vmatpush3.bf16.msra.mxu1 %v1208_v37  ;;  %6014 = vmatprep.mubr.msk.bf16.mxu1 %vm6597_vm1, %v8619_v36  ;;  %v6458_v37 = vld [vmem:[%s8600_s3 + $0x40] sm:$0xff]  }
 0x1f4   : > { %6024 = vmatprep.subr.bf16.mxu1 %v8619_v36  ;;  %5933 = vmatpush3.bf16.msra.mxu0 %v6458_v37  ;;  %v7097_v37 = vld [vmem:[%s6903_s24 + $0x8] sm:$0xff]  }
 0x1f5   : > { %5934 = vmatprep.subr.bf16.mxu0 %v8619_v36  ;;  %v8633_v49 = vunpack.c.h.bf16 %v7097_v37 }
 0x1f8   : > { %5935 = vmatpush3.bf16.msra.mxu0 %v6459_v29  ;;  %v8629_v29 = vunpack.c.l.bf16 %v7097_v37 }
 0x1f9   : > { %5946 = vmatprep.subr.bf16.mxu0 %v8619_v36 }
 0x1fa   : > { %6015 = vmatmul.mubr.msk.bf16.vlgmr.msra.gmra.mrb[28].mxu1 %vm907_vm2, %v6849_v38 }
 0x1fb   : > { %6025 = vmatpush3.bf16.msra.mxu1 %v1210_v52  ;;  %6026 = vmatprep.mubr.msk.bf16.mxu1 %vm6597_vm1, %v8619_v36  ;;  %v1007_v52 = vadd.f32 1.0, %v6892_v19  ;;  %v7099_v17 = vpop.eup %6540  ;;  %v1014_v19 = vadd.f32 1.0, %v6898_v30  ;;  %v7117_v36 = vld [vmem:[%s6903_s24 + $0x18] sm:$0xff]  }
 0x1fc   : > { %v8632_v16 = vunpack.c.l.bf16 %v7117_v36 }
 0x1fd   : > { %6542 = vrsqrt.f32 %v1007_v52 }
 0x1fe   : > { %6544 = vrsqrt.f32 %v1010_v63  ;;  %v1166_v63 = vmul.f32 %v7099_v17, %v8629_v29  ;;  %v8634_v29 = vunpack.c.h.bf16 %v7117_v36 }
 0x1ff   : > { %6546 = vrsqrt.f32 %v1011_v14 }
 0x200   : > { %6548 = vrsqrt.f32 %v1014_v19  ;;  %v1019_v19 = vadd.f32 1.0, %v6910_v44 }
 0x201   : > { %6550 = vrsqrt.f32 %v1015_v24  ;;  %v7134_v24 = vmul.f32 %v6912_v46, %v6912_v46 }
 0x202   : > { %6027 = vmatmul.mubr.msk.bf16.vlgmr.msra.gmra.mrb[32].mxu1 %vm907_vm2, %v6863_v51 }
 0x203   : > { %8829 = vst [vmem:[#allocation34_spill] sm:$0xff] %v7134_v24 }
 0x207   : > { %v7103_v18 = vpop.eup %6542 }
 0x208   : > { %v1167_v14 = vmul.f32 %v7103_v18, %v8633_v49  ;;  %v7119_v26 = vpop.eup %6544  ;;  %v8832_v49 = vunpack.c.h.bf16 %v6906_v40 }
 0x209   : > { %v7123_v5 = vpop.eup %6546 }
 0x20a   : > { %v1197_v33 = vpack.c.bf16 %v1167_v14, %v1166_v63  ;;  %v8830_v63 = vmov 0.0  }
 0x295   : > { %v770_v34 = vpop.f32.mrb[0].mxu1 }
 0x296   : > { %v771_v52 = vadd.f32 %v5466_v23, %v770_v34  ;;  %v5930_v48 = vpop.f32.mrb[1].mxu1 }
 0x297   : > { %v773_v30 = vpop.f32.mrb[2].mxu1  ;;  %v1018_v48 = vadd.f32 1.0, %v6908_v43  ;;  %v1171_v43 = vmul.f32 %v7123_v5, %v8634_v29  ;;  %v2029_v29 = vmul.f32 %v8832_v49, %v7134_v24  ;;  %v1022_v49 = vadd.f32 1.0, %v6936_v13 }
 0x298   : > { %v776_v51 = vmax.f32 %v771_v52, 0.0  ;;  %v5931_v38 = vpop.f32.mrb[3].mxu1  ;;  %v7147_v52 = vld [vmem:[%s6903_s24 + $0x28] sm:$0xff]  }
 0x299   : > { %v7130_v38 = vmul.f32 %v6916_v50, %v6916_v50  ;;  %6552 = vrsqrt.f32 %v1018_v48  ;;  %v8644_v47 = vunpack.c.h.bf16 %v7147_v52 }
 0x29a   : > { %v777_v23 = vpack.c.bf16 %v776_v51, %v776_v51  ;;  %v1170_v51 = vmul.f32 %v7119_v26, %v8632_v16  ;;  %6554 = vrsqrt.f32 %v1019_v19  ;;  %v8643_v19 = vunpack.c.l.bf16 %v7147_v52 }
 0x29b   : > { %8828 = vst [vmem:[#allocation33_spill] sm:$0xff] %v7130_v38  ;;  %6556 = vrsqrt.f32 %v1022_v49 }
 0x29c   : > { %5937 = vmatmul.mubr.msk.bf16.vlgmr.msra.gmra.mrb[4].mxu0 %vm799_vm5, %v777_v23  ;;  %v1199_v59 = vpack.c.bf16 %v1171_v43, %v1170_v51  ;;  %v8836_v51 = vunpack.c.l.bf16 %v6928_v1 }
 0x29d   : > { %v1254_v34 = vpop.f32.mrb[4].mxu1  ;;  %5947 = vmatpush3.bf16.msra.mxu0 %v1197_v33  ;;  %5948 = vmatprep.mubr.msk.bf16.mxu0 %vm6597_vm1, %v8830_v63  ;;  %v8831_v33 = vunpack.c.l.bf16 %v6906_v40  ;;  %v7168_v40 = vmul.f32 %v6934_v10, %v6934_v10 }
 0x29e   : > { %v1996_v44 = vmul.f32 %v6916_v50, %v1254_v34  ;;  %v5944_v14 = vpop.f32.mrb[5].mxu1  ;;  %5958 = vmatprep.subr.bf16.mxu0 %v8830_v63  ;;  %v7158_v34 = vmul.f32 %v6930_v6, %v6930_v6 }
 0x29f   : > { %v1257_v30 = vpop.f32.mrb[6].mxu1  ;;  %v2028_v23 = vmul.f32 %v8831_v33, %v7130_v38  ;;  %v7160_v14 = vpop.eup %6548  ;;  %8835 = vst [vmem:[#allocation37_spill] sm:$0xff] %v7168_v40  ;;  %v7243_v38 = vmul.f32 %v6977_v61, %v6977_v61 }
 0x2a0   : > { %v1997_v16 = vmul.f32 %v6912_v46, %v1257_v30  ;;  %v5945_v48 = vpop.f32.mrb[7].mxu1  ;;  %8833 = vst [vmem:[#allocation35_spill] sm:$0xff] %v7158_v34  ;;  %v7164_v41 = vpop.eup %6550  ;;  %v2032_v43 = vmul.f32 %v8836_v51, %v7158_v34 }
 0x2a1   : > { %8834 = vst [vmem:[#allocation36_spill] sm:$0xff] %v7164_v41  ;;  %v2060_v33 = vadd.f32 %v2028_v23, %v1996_v44  ;;  %v1023_v48 = vadd.f32 1.0, %v6938_v15  ;;  %v1175_v13 = vmul.f32 %v7164_v41, %v8644_v47  ;;  %8844 = vst [vmem:[#allocation42_spill] sm:$0xff] %v7243_v38 }
 0x2a2   : > { %v2061_v30 = vadd.f32 %v2029_v29, %v1997_v16  ;;  %v1174_v29 = vmul.f32 %v7160_v14, %v8643_v19 }
 0x2a3   : > { %v7194_v51 = vpop.eup %6552  ;;  %6558 = vrsqrt.f32 %v1023_v48  ;;  %v7211_v48 = vmul.f32 %v6957_v39, %v6957_v39 }
 0x2a4   : > { %v2092_v24 = vpack.c.bf16 %v2061_v30, %v2060_v33  ;;  %5949 = vmatmul.mubr.msk.bf16.vlgmr.msra.gmra.mrb[8].mxu0 %vm907_vm2, %v6765_v42  ;;  %v7192_v33 = vld [vmem:[%s6903_s24 + $0x38] sm:$0xff]   ;;  %8838 = vst [vmem:[#allocation38_spill] sm:$0xff] %v7194_v51 }
 0x2a5   : > { %5959 = vmatpush3.bf16.msra.mxu0 %v1199_v59  ;;  %5960 = vmatprep.mubr.msk.bf16.mxu0 %vm6597_vm1, %v8830_v63  ;;  %v1352_v16 = vpop.f32.mrb[8].mxu1  ;;  %v8837_v59 = vunpack.c.h.bf16 %v6928_v1  ;;  %v7203_v1 = vpop.eup %6554  ;;  %v8652_v49 = vunpack.c.h.bf16 %v7192_v33  ;;  %8841 = vst [vmem:[#allocation41_spill] sm:$0xff] %v7211_v48 }
 0x2a6   : > { %6040 = vmatprep.mubr.msk.bf16.mxu1 %vm799_vm5, %v2092_v24  ;;  %v2000_v15 = vmul.f32 %v6930_v6, %v1352_v16  ;;  %v5956_v44 = vpop.f32.mrb[9].mxu1  ;;  %5970 = vmatprep.subr.bf16.mxu0 %v8830_v63  ;;  %v7201_v16 = vmul.f32 %v6953_v28, %v6953_v28  ;;  %8840 = vst [vmem:[#allocation40_spill] sm:$0xff] %v7203_v1 }
 0x2a7   : > { %v2033_v23 = vmul.f32 %v8837_v59, %v7168_v40  ;;  %v1355_v30 = vpop.f32.mrb[10].mxu1  ;;  %v1201_v44 = vpack.c.bf16 %v1175_v13, %v1174_v29  ;;  %v8649_v59 = vunpack.c.l.bf16 %v7192_v33  ;;  %v8842_v13 = vunpack.c.l.bf16 %v6951_v25 }
 0x2a8   : > { %v7196_v19 = vadd.f32 %v2032_v43, %v2000_v15  ;;  %v2001_v24 = vmul.f32 %v6934_v10, %v1355_v30  ;;  %v5957_v47 = vpop.f32.mrb[11].mxu1  ;;  %8839 = vst [vmem:[#allocation39_spill] sm:$0xff] %v7201_v16  ;;  %v1027_v43 = vadd.f32 1.0, %v6975_v60  ;;  %v1179_v60 = vmul.f32 %v7203_v1, %v8652_v49  ;;  %v7232_v30 = vld [vmem:[%s6903_s24 + $0x48] sm:$0xff]  }
 0x2a9   : > { %v1026_v47 = vadd.f32 1.0, %v6973_v56  ;;  %v2036_v15 = vmul.f32 %v8842_v13, %v7201_v16  ;;  %v1178_v56 = vmul.f32 %v7194_v51, %v8649_v59 }
 0x2aa   : > { %v7207_v40 = vadd.f32 %v2033_v23, %v2001_v24 }
 0x2ab   : > { %6560 = vrsqrt.f32 %v1026_v47 }
 0x2ac   : > { %5961 = vmatmul.mubr.msk.bf16.vlgmr.msra.gmra.mrb[12].mxu0 %vm907_vm2, %v6782_v54  ;;  %6562 = vrsqrt.f32 %v1027_v43  ;;  %v7245_v54 = vpop.eup %6556 }
 0x2ad   : > { %5971 = vmatpush3.bf16.msra.mxu0 %v1201_v44  ;;  %5972 = vmatprep.mubr.msk.bf16.mxu0 %vm6597_vm1, %v8830_v63  ;;  %v1450_v23 = vpop.f32.mrb[12].mxu1  ;;  %v8843_v44 = vunpack.c.h.bf16 %v6951_v25  ;;  %8845 = vst [vmem:[#allocation43_spill] sm:$0xff] %v7245_v54  ;;  %v8662_v25 = vunpack.c.h.bf16 %v7232_v30  ;;  %v7249_v47 = vpop.eup %6558 }
 0x2ae   : > { %5982 = vmatprep.subr.bf16.mxu0 %v8830_v63  ;;  %v2004_v24 = vmul.f32 %v6953_v28, %v1450_v23  ;;  %v5968_v13 = vpop.f32.mrb[13].mxu1  ;;  %v1203_v23 = vpack.c.bf16 %v1179_v60, %v1178_v56  ;;  %8846 = vst [vmem:[#allocation44_spill] sm:$0xff] %v7249_v47  ;;  %v8848_v60 = vunpack.c.l.bf16 %v6971_v58 }
 0x2af   : > { %v2037_v29 = vmul.f32 %v8843_v44, %v7211_v48  ;;  %v1453_v16 = vpop.f32.mrb[14].mxu1  ;;  %v8659_v13 = vunpack.c.l.bf16 %v7232_v30 }
 0x2b0   : > { %v7238_v59 = vadd.f32 %v2036_v15, %v2004_v24  ;;  %v2005_v34 = vmul.f32 %v6957_v39, %v1453_v16  ;;  %v5969_v49 = vpop.f32.mrb[15].mxu1  ;;  %v7255_v16 = vmul.f32 %v6981_v3, %v6981_v3  ;;  %v1031_v15 = vadd.f32 1.0, %v7005_v62 }
 0x2b1   : > { %v1030_v49 = vadd.f32 1.0, %v7003_v55  ;;  %v2040_v24 = vmul.f32 %v8848_v60, %v7243_v38  ;;  %v1182_v55 = vmul.f32 %v7245_v54, %v8659_v13  ;;  %v1183_v62 = vmul.f32 %v7249_v47, %v8662_v25  ;;  %v1000_v13 = vpop.xlane.xlu1 %999 }
 0x2b2   : > { %v7251_v43 = vadd.f32 %v2037_v29, %v2005_v34  ;;  %8847 = vst [vmem:[#allocation45_spill] sm:$0xff] %v7255_v16  ;;  %v7276_v29 = vld [vmem:[%s6903_s24 + $0x58] sm:$0xff]   ;;  %v7287_v39 = vmul.f32 %v6997_v27, %v6997_v27 }
 0x2b3   : > { %6564 = vrsqrt.f32 %v1030_v49  ;;  %v8676_v49 = vunpack.c.h.bf16 %v7276_v29 }
 0x2b4   : > { %5973 = vmatmul.mubr.msk.bf16.vlgmr.msra.gmra.mrb[16].mxu0 %vm907_vm2, %v6796_v0  ;;  %6566 = vrsqrt.f32 %v1031_v15  ;;  %8850 = vst [vmem:[#allocation46_spill] sm:$0xff] %v7287_v39 }
 0x2b5   : > { %5983 = vmatpush3.bf16.msra.mxu0 %v1203_v23  ;;  %5984 = vmatprep.mubr.msk.bf16.mxu0 %vm6597_vm1, %v8830_v63  ;;  %v1548_v34 = vpop.f32.mrb[16].mxu1  ;;  %v8849_v23 = vunpack.c.h.bf16 %v6971_v58  ;;  %v7289_v28 = vpop.eup %6560  ;;  %v8673_v58 = vunpack.c.l.bf16 %v7276_v29 }
 0x2b6   : > { %5994 = vmatprep.subr.bf16.mxu0 %v8830_v63  ;;  %v2008_v44 = vmul.f32 %v6977_v61, %v1548_v34  ;;  %v5980_v60 = vpop.f32.mrb[17].mxu1  ;;  %8851 = vst [vmem:[#allocation47_spill] sm:$0xff] %v7289_v28  ;;  %v1205_v34 = vpack.c.bf16 %v1183_v62, %v1182_v55  ;;  %v7293_v15 = vpop.eup %6562  ;;  %v8854_v62 = vunpack.c.l.bf16 %v6995_v22 }
 0x2b7   : > { %v2041_v56 = vmul.f32 %v8849_v23, %v7255_v16  ;;  %v1551_v38 = vpop.f32.mrb[18].mxu1  ;;  %v1003_v60 = vpop.xlane.xlu0 %1002  ;;  %8852 = vst [vmem:[#allocation48_spill] sm:$0xff] %v7293_v15 }
 0x2b8   : > { %v7282_v48 = vadd.f32 %v2040_v24, %v2008_v44  ;;  %v2009_v25 = vmul.f32 %v6981_v3, %v1551_v38  ;;  %v5981_v0 = vpop.f32.mrb[19].mxu1  ;;  %v1034_v38 = vadd.f32 1.0, %v1000_v13  ;;  %v1035_v44 = vadd.f32 1.0, %v1003_v60  ;;  %v7318_v60 = vld [vmem:[%s6903_s24 + $0x68] sm:$0xff]  }
 0x2b9   : > { %v7299_v0 = vmul.f32 %v7001_v53, %v7001_v53  ;;  %v2044_v23 = vmul.f32 %v8854_v62, %v7287_v39  ;;  %v1187_v13 = vmul.f32 %v7293_v15, %v8676_v49  ;;  %v7329_v3 = vmul.f32 %v7021_v20, %v7021_v20 }
 0x2ba   : > { %v7295_v24 = vadd.f32 %v2041_v56, %v2009_v25  ;;  %v1186_v25 = vmul.f32 %v7289_v28, %v8673_v58  ;;  %6568 = vrsqrt.f32 %v1034_v38 }
 0x2bb   : > { %8853 = vst [vmem:[#allocation49_spill] sm:$0xff] %v7299_v0  ;;  %6570 = vrsqrt.f32 %v1035_v44  ;;  %8856 = vst [vmem:[#allocation50_spill] sm:$0xff] %v7329_v3 }
 0x2bc   : > { %5985 = vmatmul.mubr.msk.bf16.vlgmr.msra.gmra.mrb[20].mxu0 %vm907_vm2, %v6813_v11 }
 0x2bd   : > { %5995 = vmatpush3.bf16.msra.mxu0 %v1205_v34  ;;  %5996 = vmatprep.mubr.msk.bf16.mxu0 %vm6597_vm1, %v8830_v63  ;;  %v1646_v56 = vpop.f32.mrb[20].mxu1  ;;  %v8855_v34 = vunpack.c.h.bf16 %v6995_v22  ;;  %v7331_v61 = vpop.eup %6564  ;;  %v8688_v22 = vunpack.c.h.bf16 %v7318_v60 }
 0x2be   : > { %6006 = vmatprep.subr.bf16.mxu0 %v8830_v63  ;;  %v2012_v55 = vmul.f32 %v6997_v27, %v1646_v56  ;;  %v5992_v62 = vpop.f32.mrb[21].mxu1  ;;  %8857 = vst [vmem:[#allocation51_spill] sm:$0xff] %v7331_v61  ;;  %v1207_v56 = vpack.c.bf16 %v1187_v13, %v1186_v25  ;;  %v7335_v38 = vpop.eup %6566  ;;  %v7360_v13 = vld [vmem:[%s6903_s24 + $0x78] sm:$0xff]  }
 0x2bf   : > { %v2045_v39 = vmul.f32 %v8855_v34, %v7299_v0  ;;  %v1649_v16 = vpop.f32.mrb[22].mxu1  ;;  %v8685_v62 = vunpack.c.l.bf16 %v7318_v60  ;;  %8858 = vst [vmem:[#allocation52_spill] sm:$0xff] %v7335_v38 }
 0x2c0   : > { %v7324_v58 = vadd.f32 %v2044_v23, %v2012_v55  ;;  %v2013_v11 = vmul.f32 %v7001_v53, %v1649_v16  ;;  %v5993_v49 = vpop.f32.mrb[23].mxu1  ;;  %v7341_v16 = vmul.f32 %v7025_v35, %v7025_v35  ;;  %v8860_v55 = vunpack.c.l.bf16 %v7019_v12 }
 0x2c2   : > { %v7337_v44 = vadd.f32 %v2045_v39, %v2013_v11  ;;  %8859 = vst [vmem:[#allocation53_spill] sm:$0xff] %v7341_v16  ;;  %v2048_v23 = vmul.f32 %v8860_v55, %v7329_v3  ;;  %v1190_v11 = vmul.f32 %v7331_v61, %v8685_v62  ;;  %v1191_v39 = vmul.f32 %v7335_v38, %v8688_v22 }
 0x2c3   : > { %v7371_v22 = vmul.f32 %v7041_v2, %v7041_v2 }
 0x2c4   : > { %5997 = vmatmul.mubr.msk.bf16.vlgmr.msra.gmra.mrb[24].mxu0 %vm907_vm2, %v6828_v21  ;;  %v7373_v53 = vpop.eup %6568  ;;  %v1209_v27 = vpack.c.bf16 %v1191_v39, %v1190_v11 }
 0x2c5   : > { %6007 = vmatpush3.bf16.msra.mxu0 %v1207_v56  ;;  %6008 = vmatprep.mubr.msk.bf16.mxu0 %vm6597_vm1, %v8830_v63  ;;  %v1744_v25 = vpop.f32.mrb[24].mxu1  ;;  %v8861_v56 = vunpack.c.h.bf16 %v7019_v12  ;;  %8862 = vst [vmem:[#allocation54_spill] sm:$0xff] %v7371_v22  ;;  %8863 = vst [vmem:[#allocation55_spill] sm:$0xff] %v7373_v53 }
 0x2c6   : > { %6018 = vmatprep.subr.bf16.mxu0 %v8830_v63  ;;  %v2016_v34 = vmul.f32 %v7021_v20, %v1744_v25  ;;  %v6004_v55 = vpop.f32.mrb[25].mxu1  ;;  %v8699_v25 = vunpack.c.l.bf16 %v7360_v13  ;;  %v7377_v20 = vpop.eup %6570 }
 0x2c7   : > { %v2049_v49 = vmul.f32 %v8861_v56, %v7341_v16  ;;  %v1747_v3 = vpop.f32.mrb[26].mxu1  ;;  %v8702_v55 = vunpack.c.h.bf16 %v7360_v13  ;;  %8864 = vst [vmem:[#allocation56_spill] sm:$0xff] %v7377_v20 }
 0x2c8   : > { %v7366_v0 = vadd.f32 %v2048_v23, %v2016_v34  ;;  %v2017_v62 = vmul.f32 %v7025_v35, %v1747_v3  ;;  %v6005_v21 = vpop.f32.mrb[27].mxu1  ;;  %v7383_v23 = vmul.f32 %v7045_v9, %v7045_v9  ;;  %v8866_v3 = vunpack.c.l.bf16 %v7039_v7 }
 0x2ca   : > { %v7379_v12 = vadd.f32 %v2049_v49, %v2017_v62  ;;  %8865 = vst [vmem:[#allocation57_spill] sm:$0xff] %v7383_v23  ;;  %v2052_v11 = vmul.f32 %v8866_v3, %v7371_v22  ;;  %v1194_v62 = vmul.f32 %v7373_v53, %v8699_v25  ;;  %v1195_v49 = vmul.f32 %v7377_v20, %v8702_v55 }
 0x2cc   : > { %6009 = vmatmul.mubr.msk.bf16.vlgmr.msra.gmra.mrb[28].mxu0 %vm907_vm2, %v6842_v31  ;;  %v7410_v31 = vmul.f32 %v7061_v4, %v7061_v4  ;;  %v1211_v55 = vpack.c.bf16 %v1195_v49, %v1194_v62  ;;  %v8871_v49 = vunpack.c.h.bf16 %v7059_v57 }
 0x2cd   : > { %6019 = vmatpush3.bf16.msra.mxu0 %v1209_v27  ;;  %6020 = vmatprep.mubr.msk.bf16.mxu0 %vm6597_vm1, %v8830_v63  ;;  %v1842_v39 = vpop.f32.mrb[28].mxu1  ;;  %v8867_v27 = vunpack.c.h.bf16 %v7039_v7 }
 0x2ce   : > { %6030 = vmatprep.subr.bf16.mxu0 %v8830_v63  ;;  %v2020_v34 = vmul.f32 %v7041_v2, %v1842_v39  ;;  %v6016_v56 = vpop.f32.mrb[29].mxu1  ;;  %8868 = vst [vmem:[#allocation58_spill] sm:$0xff] %v7410_v31  ;;  %v7416_v39 = vmul.f32 %v7065_v8, %v7065_v8 }
 0x2cf   : > { %v2053_v3 = vmul.f32 %v8867_v27, %v7383_v23  ;;  %v1845_v21 = vpop.f32.mrb[30].mxu1 }
 0x2d0   : > { %v7405_v22 = vadd.f32 %v2052_v11, %v2020_v34  ;;  %v2021_v16 = vmul.f32 %v7045_v9, %v1845_v21  ;;  %v6017_v25 = vpop.f32.mrb[31].mxu1  ;;  %8869 = vst [vmem:[#allocation59_spill] sm:$0xff] %v7416_v39  ;;  %v2057_v34 = vmul.f32 %v8871_v49, %v7416_v39 }
 0x2d1   : > { %v8870_v25 = vunpack.c.l.bf16 %v7059_v57  ;;  %v6461_v57 = vld [vmem:[%s8600_s3 + $0x58] sm:$0xff]  }
 0x2d2   : > { %v7412_v35 = vadd.f32 %v2053_v3, %v2021_v16 }
 0x2d3   : > { %v2056_v21 = vmul.f32 %v8870_v25, %v7410_v31  ;;  %v6460_v25 = vld [vmem:[%s8600_s3 + $0x50] sm:$0xff]  }
 0x2d4   : > { %6021 = vmatmul.mubr.msk.bf16.vlgmr.msra.gmra.mrb[32].mxu0 %vm907_vm2, %v6856_v45  ;;  %6036 = vmatprep.subr.bf16.mxu1 %v6460_v25  ;;  %v7477_v45 = vmul.f32 %v7123_v5, %v7123_v5 }
 0x2d5   : > { %6031 = vmatpush3.bf16.msra.mxu0 %v1211_v55  ;;  %6032 = vmatprep.mubr.msk.bf16.mxu0 %vm6597_vm1, %v8830_v63  ;;  %v1940_v16 = vpop.f32.mrb[32].mxu1 }
 0x2d6   : > { %v2024_v11 = vmul.f32 %v7061_v4, %v1940_v16  ;;  %v6028_v62 = vpop.f32.mrb[33].mxu1  ;;  %6037 = vmatpush3.bf16.msra.mxu1 %v6460_v25 }
 0x2d7   : > { %v1943_v56 = vpop.f32.mrb[34].mxu1  ;;  %6038 = vmatprep.subr.bf16.mxu1 %v6461_v57 }
 0x2d8   : > { %v7431_v27 = vadd.f32 %v2056_v21, %v2024_v11  ;;  %v2025_v3 = vmul.f32 %v7065_v8, %v1943_v56  ;;  %v6029_v7 = vpop.f32.mrb[35].mxu1  ;;  %v6463_v21 = vld [vmem:[%s8600_s3 + $0x68] sm:$0xff]   ;;  %v7461_v56 = vmul.f32 %v7103_v18, %v7103_v18 }
 0x2d9   : > { %v6462_v7 = vld [vmem:[%s8600_s3 + $0x60] sm:$0xff]  }
 0x2da   : > { %v7434_v23 = vadd.f32 %v2057_v34, %v2025_v3  ;;  %6039 = vmatpush3.bf16.msra.mxu1 %v6461_v57  ;;  %6072 = vmatprep.subr.bf16.mxu0 %v6462_v7  ;;  %v7457_v34 = vmul.f32 %v7099_v17, %v7099_v17  ;;  %v8874_v57 = vunpack.c.l.bf16 %v7097_v37 }
 0x2db   : > { %6112 = vmatprep.subr.bf16.mxu1 %v8830_v63 }
 0x2dc   : > { %6033 = vmatmul.mubr.msk.bf16.vlgmr.msra.gmra.mrb[36].mxu0 %vm907_vm2, %v6884_v32  ;;  %8873 = vst [vmem:[#allocation61_spill] sm:$0xff] %v7457_v34  ;;  %v7473_v32 = vmul.f32 %v7119_v26, %v7119_v26 }
 0x2dd   : > { %6073 = vmatpush3.bf16.msra.mxu0 %v6462_v7  ;;  %v2030_v7 = vmul.f32 %v8874_v57, %v7457_v34 }
 0x2de   : > { %6074 = vmatprep.subr.bf16.mxu0 %v6463_v21 }
 0x2e1   : > { %6075 = vmatpush3.bf16.msra.mxu0 %v6463_v21 }
 0x36f   : > { %v7453_v16 = vpop.f32.mrb[4].mxu0 }
 0x370   : > { %8872 = vst [vmem:[#allocation60_spill] sm:$0xff] %v7453_v16  ;;  %v5938_v11 = vpop.f32.mrb[5].mxu0 }
 0x371   : > { %v840_v62 = vpop.f32.mrb[6].mxu0 }
 0x372   : > { %v5939_v49 = vpop.f32.mrb[7].mxu0 }
 0x373   : > { %v8875_v49 = vunpack.c.h.bf16 %v7097_v37 }
 0x375   : > { %v2031_v16 = vmul.f32 %v8875_v49, %v7461_v56 }
 0x377   : > { %v1303_v3 = vpop.f32.mrb[8].mxu0 }
 0x378   : > { %v1998_v25 = vmul.f32 %v7099_v17, %v1303_v3  ;;  %v5950_v21 = vpop.f32.mrb[9].mxu0 }
 0x379   : > { %v1306_v55 = vpop.f32.mrb[10].mxu0 }
 0x37a   : > { %v2062_v11 = vadd.f32 %v2030_v7, %v1998_v25  ;;  %v1999_v62 = vmul.f32 %v7103_v18, %v1306_v55  ;;  %v5951_v39 = vpop.f32.mrb[11].mxu0  ;;  %v8876_v55 = vunpack.c.l.bf16 %v7117_v36 }
 0x37c   : > { %v2063_v31 = vadd.f32 %v2031_v16, %v1999_v62  ;;  %v2034_v7 = vmul.f32 %v8876_v55, %v7473_v32  ;;  %v8877_v16 = vpack.c.bf16 %v7207_v40, %v7196_v19  ;;  %v7494_v55 = vmul.f32 %v7160_v14, %v7160_v14 }
 0x37e   : > { %v2093_v3 = vpack.c.bf16 %v2063_v31, %v2062_v11  ;;  %v8878_v11 = vunpack.c.h.bf16 %v7117_v36 }
 0x37f   : > { %v1401_v57 = vpop.f32.mrb[12].mxu0 }
 0x380   : > { %v2002_v25 = vmul.f32 %v7119_v26, %v1401_v57  ;;  %v5962_v37 = vpop.f32.mrb[13].mxu0  ;;  %6041 = vmatmul.mubr.msk.bf16.vlgmr.msra.gmra.mrb[36].mxu1 %vm799_vm5, %v2093_v3  ;;  %v2035_v62 = vmul.f32 %v8878_v11, %v7477_v45  ;;  %v8881_v11 = vunpack.c.h.bf16 %v7147_v52 }
 0x381   : > { %v1404_v39 = vpop.f32.mrb[14].mxu0  ;;  %6044 = vmatprep.mubr.msk.bf16.mxu1 %vm799_vm5, %v8877_v16  ;;  %v7498_v37 = vmul.f32 %v7164_v41, %v7164_v41  ;;  %v8880_v16 = vpack.c.bf16 %v7251_v43, %v7238_v59 }
 0x382   : > { %v2066_v31 = vadd.f32 %v2034_v7, %v2002_v25  ;;  %v2003_v21 = vmul.f32 %v7123_v5, %v1404_v39  ;;  %v5963_v49 = vpop.f32.mrb[15].mxu0  ;;  %v8879_v25 = vunpack.c.l.bf16 %v7147_v52 }
 0x384   : > { %v2067_v57 = vadd.f32 %v2035_v62, %v2003_v21  ;;  %v2038_v7 = vmul.f32 %v8879_v25, %v7494_v55  ;;  %v2039_v62 = vmul.f32 %v8881_v11, %v7498_v37  ;;  %v7519_v25 = vmul.f32 %v7203_v1, %v7203_v1 }
 0x386   : > { %v2095_v3 = vpack.c.bf16 %v2067_v57, %v2066_v31  ;;  %8883 = vst [vmem:[#allocation63_spill] sm:$0xff] %v7519_v25 }
 0x387   : > { %v1499_v19 = vpop.f32.mrb[16].mxu0 }
 0x388   : > { %v2006_v40 = vmul.f32 %v7160_v14, %v1499_v19  ;;  %v5974_v36 = vpop.f32.mrb[17].mxu0  ;;  %6045 = vmatmul.mubr.msk.bf16.gmra.mrb[40].mxu1 %vm799_vm5, %v2095_v3  ;;  %v7515_v19 = vmul.f32 %v7194_v51, %v7194_v51 }
 0x389   : > { %v1502_v39 = vpop.f32.mrb[18].mxu0  ;;  %6048 = vmatprep.mubr.msk.bf16.mxu1 %vm799_vm5, %v8880_v16 }
 0x38a   : > { %v2070_v31 = vadd.f32 %v2038_v7, %v2006_v40  ;;  %v2007_v21 = vmul.f32 %v7164_v41, %v1502_v39  ;;  %v5975_v49 = vpop.f32.mrb[19].mxu0  ;;  %8882 = vst [vmem:[#allocation62_spill] sm:$0xff] %v7515_v19  ;;  %v8884_v40 = vunpack.c.l.bf16 %v7192_v33  ;;  %v8885_v39 = vpack.c.bf16 %v7295_v24, %v7282_v48 }
 0x38c   : > { %v2071_v57 = vadd.f32 %v2039_v62, %v2007_v21  ;;  %v2042_v7 = vmul.f32 %v8884_v40, %v7515_v19  ;;  %v8886_v21 = vunpack.c.h.bf16 %v7192_v33 }
 0x38e   : > { %v2097_v3 = vpack.c.bf16 %v2071_v57, %v2070_v31  ;;  %v2043_v11 = vmul.f32 %v8886_v21, %v7519_v25  ;;  %v7536_v57 = vmul.f32 %v7245_v54, %v7245_v54 }
 0x38f   : > { %v1597_v59 = vpop.f32.mrb[20].mxu0 }
 0x390   : > { %v2010_v43 = vmul.f32 %v7194_v51, %v1597_v59  ;;  %v5986_v52 = vpop.f32.mrb[21].mxu0  ;;  %6049 = vmatmul.mubr.msk.bf16.gmra.mrb[44].mxu1 %vm799_vm5, %v2097_v3  ;;  %8887 = vst [vmem:[#allocation64_spill] sm:$0xff] %v7536_v57  ;;  %v7540_v59 = vmul.f32 %v7249_v47, %v7249_v47 }
 0x391   : > { %v1600_v36 = vpop.f32.mrb[22].mxu0  ;;  %6052 = vmatprep.mubr.msk.bf16.mxu1 %vm799_vm5, %v8885_v39  ;;  %v8890_v52 = vpack.c.bf16 %v7337_v44, %v7324_v58 }
 0x392   : > { %v2074_v16 = vadd.f32 %v2042_v7, %v2010_v43  ;;  %v2011_v31 = vmul.f32 %v7203_v1, %v1600_v36  ;;  %v5987_v62 = vpop.f32.mrb[23].mxu0  ;;  %8888 = vst [vmem:[#allocation65_spill] sm:$0xff] %v7540_v59  ;;  %v8889_v43 = vunpack.c.l.bf16 %v7232_v30 }
 0x393   : > { %v7557_v62 = vmul.f32 %v7289_v28, %v7289_v28 }
 0x394   : > { %v2075_v49 = vadd.f32 %v2043_v11, %v2011_v31  ;;  %v2046_v40 = vmul.f32 %v8889_v43, %v7536_v57  ;;  %v8919_v57 = vld [vmem:[#allocation9_spill] sm:$0xff] }
 0x395   : > { %8892 = vst [vmem:[#allocation66_spill] sm:$0xff] %v7557_v62 }
 0x396   : > { %v2099_v3 = vpack.c.bf16 %v2075_v49, %v2074_v16  ;;  %v8891_v16 = vunpack.c.h.bf16 %v7232_v30 }
 0x397   : > { %v1695_v48 = vpop.f32.mrb[24].mxu0 }
 0x398   : > { %v2014_v24 = vmul.f32 %v7245_v54, %v1695_v48  ;;  %v5998_v33 = vpop.f32.mrb[25].mxu0  ;;  %6053 = vmatmul.mubr.msk.bf16.gmra.mrb[48].mxu1 %vm799_vm5, %v2099_v3  ;;  %v2047_v31 = vmul.f32 %v8891_v16, %v7540_v59  ;;  %v7561_v3 = vmul.f32 %v7293_v15, %v7293_v15  ;;  %v8894_v48 = vunpack.c.l.bf16 %v7276_v29 }
 0x399   : > { %v1698_v7 = vpop.f32.mrb[26].mxu0  ;;  %6056 = vmatprep.mubr.msk.bf16.mxu1 %vm799_vm5, %v8890_v52  ;;  %v8896_v52 = vunpack.c.h.bf16 %v7276_v29 }
 0x39a   : > { %v2078_v36 = vadd.f32 %v2046_v40, %v2014_v24  ;;  %v2015_v39 = vmul.f32 %v7249_v47, %v1698_v7  ;;  %v5999_v21 = vpop.f32.mrb[27].mxu0  ;;  %8893 = vst [vmem:[#allocation67_spill] sm:$0xff] %v7561_v3  ;;  %v2050_v24 = vmul.f32 %v8894_v48, %v7557_v62  ;;  %v8895_v40 = vpack.c.bf16 %v7379_v12, %v7366_v0 }
 0x39b   : > { %v8900_v48 = vpack.c.bf16 %v7412_v35, %v7405_v22 }
 0x39c   : > { %v2079_v11 = vadd.f32 %v2047_v31, %v2015_v39  ;;  %v7578_v31 = vmul.f32 %v7331_v61, %v7331_v61 }
 0x39e   : > { %v2101_v49 = vpack.c.bf16 %v2079_v11, %v2078_v36  ;;  %v2051_v36 = vmul.f32 %v8896_v52, %v7561_v3  ;;  %8897 = vst [vmem:[#allocation68_spill] sm:$0xff] %v7578_v31  ;;  %v7582_v11 = vmul.f32 %v7335_v38, %v7335_v38  ;;  %v7599_v52 = vmul.f32 %v7373_v53, %v7373_v53 }
 0x39f   : > { %v1793_v58 = vpop.f32.mrb[28].mxu0 }
 0x3a0   : > { %v2018_v44 = vmul.f32 %v7289_v28, %v1793_v58  ;;  %v6010_v30 = vpop.f32.mrb[29].mxu0  ;;  %6057 = vmatmul.mubr.msk.bf16.gmra.mrb[52].mxu1 %vm799_vm5, %v2101_v49  ;;  %8898 = vst [vmem:[#allocation69_spill] sm:$0xff] %v7582_v11  ;;  %v8899_v49 = vunpack.c.l.bf16 %v7318_v60  ;;  %8902 = vst [vmem:[#allocation70_spill] sm:$0xff] %v7599_v52 }
 0x3a1   : > { %v1796_v43 = vpop.f32.mrb[30].mxu0  ;;  %6060 = vmatprep.mubr.msk.bf16.mxu1 %vm799_vm5, %v8895_v40 }
 0x3a2   : > { %v2082_v33 = vadd.f32 %v2050_v24, %v2018_v44  ;;  %v2019_v7 = vmul.f32 %v7293_v15, %v1796_v43  ;;  %v6011_v39 = vpop.f32.mrb[31].mxu0  ;;  %v2054_v58 = vmul.f32 %v8899_v49, %v7578_v31  ;;  %v8901_v43 = vunpack.c.h.bf16 %v7318_v60 }
 0x3a3   : > { %v7603_v39 = vmul.f32 %v7377_v20, %v7377_v20 }
 0x3a4   : > { %v2083_v16 = vadd.f32 %v2051_v36, %v2019_v7  ;;  %v2055_v40 = vmul.f32 %v8901_v43, %v7582_v11  ;;  %v8915_v11 = vld [vmem:[#allocation24_spill] sm:$0xff] }
 0x3a5   : > { %8903 = vst [vmem:[#allocation71_spill] sm:$0xff] %v7603_v39 }
 0x3a6   : > { %v2103_v21 = vpack.c.bf16 %v2083_v16, %v2082_v33  ;;  %v8904_v16 = vunpack.c.l.bf16 %v7360_v13 }
 0x3a7   : > { %v1891_v0 = vpop.f32.mrb[32].mxu0 }
 0x3a8   : > { %v2022_v12 = vmul.f32 %v7331_v61, %v1891_v0  ;;  %v6022_v29 = vpop.f32.mrb[33].mxu0  ;;  %6061 = vmatmul.mubr.msk.bf16.gmra.mrb[56].mxu1 %vm799_vm5, %v2103_v21  ;;  %v2058_v21 = vmul.f32 %v8904_v16, %v7599_v52  ;;  %v8912_v52 = vld [vmem:[#allocation7_spill] sm:$0xff] }
 0x3a9   : > { %v1894_v44 = vpop.f32.mrb[34].mxu0  ;;  %6064 = vmatprep.mubr.msk.bf16.mxu1 %vm799_vm5, %v8900_v48  ;;  %v8906_v29 = vunpack.c.h.bf16 %v7360_v13  ;;  %v7631_v13 = vld [vmem:[%s8601_s4 + $0x18] ss:$0 sm:$0xff] }
 0x3aa   : > { %v2086_v24 = vadd.f32 %v2054_v58, %v2022_v12  ;;  %v2023_v30 = vmul.f32 %v7335_v38, %v1894_v44  ;;  %v6023_v33 = vpop.f32.mrb[35].mxu0  ;;  %v8905_v12 = vpack.c.bf16 %v7434_v23, %v7431_v27  ;;  %v6464_v23 = vld [vmem:[%s8600_s3 + $0x70] sm:$0xff]   ;;  %v6465_v27 = vld [vmem:[%s8600_s3 + $0x78] sm:$0xff]  }
 0x3ab   : > { %v2059_v44 = vmul.f32 %v8906_v29, %v7603_v39  ;;  %6076 = vmatprep.subr.bf16.mxu0 %v6464_v23 }
 0x3ac   : > { %v2087_v7 = vadd.f32 %v2055_v40, %v2023_v30  ;;  %6077 = vmatpush3.bf16.msra.mxu0 %v6464_v23 }
 0x3ad   : > { %6078 = vmatprep.subr.bf16.mxu0 %v6465_v27 }
 0x3ae   : > { %v2105_v36 = vpack.c.bf16 %v2087_v7, %v2086_v24 }
 0x3af   : > { %v1989_v35 = vpop.f32.mrb[36].mxu0 }
 0x3b0   : > { %v2026_v22 = vmul.f32 %v7373_v53, %v1989_v35  ;;  %v6034_v60 = vpop.f32.mrb[37].mxu0  ;;  %6065 = vmatmul.mubr.msk.bf16.gmra.mrb[60].mxu1 %vm799_vm5, %v2105_v36  ;;  %6079 = vmatpush3.bf16.msra.mxu0 %v6465_v27 }
 0x3b1   : > { %v1992_v0 = vpop.f32.mrb[38].mxu0  ;;  %6068 = vmatprep.mubr.msk.bf16.mxu1 %vm799_vm5, %v8905_v12  ;;  %6124 = vmatprep.subr.bf16.mxu0 %v8830_v63 }
 0x3b2   : > { %v2090_v49 = vadd.f32 %v2058_v21, %v2026_v22  ;;  %v2027_v58 = vmul.f32 %v7377_v20, %v1992_v0  ;;  %v6035_v48 = vpop.f32.mrb[39].mxu0 }
 0x3b4   : > { %v2091_v24 = vadd.f32 %v2059_v44, %v2027_v58 }
 0x3b6   : > { %v2107_v30 = vpack.c.bf16 %v2091_v24, %v2090_v49 }
 0x3b8   : > { %6069 = vmatmul.mubr.msk.bf16.gmra.mrb[64].mxu1 %vm799_vm5, %v2107_v30 }
 0x3b9   : > { %6114 = vmatprep.mubr.msk.bf16.mxu1 %vm6597_vm1, %v8830_v63 }
 0x453   : > { %v6042_v43 = vpop.f32.mrb[36].mxu1 }
 0x454   : > { %v2340_v40 = vadd.f32 %v6042_v43, %v7631_v13  ;;  %v2206_v33 = vpop.f32.mrb[37].mxu1 }
 0x455   : > { %v2338_v7 = vadd.f32 %v7631_v13, %v2206_v33  ;;  %v6043_v36 = vpop.f32.mrb[38].mxu1 }
 0x456   : > { %v2341_v35 = vadd.f32 %v6043_v36, %v7631_v13  ;;  %v2209_v22 = vpop.f32.mrb[39].mxu1  ;;  %v2372_v21 = vmax.f32 %v2340_v40, 0.0 }
 0x457   : > { %v2339_v16 = vadd.f32 %v7631_v13, %v2209_v22  ;;  %v2370_v0 = vmax.f32 %v2338_v7, 0.0 }
 0x458   : > { %v2373_v60 = vmax.f32 %v2341_v35, 0.0 }
 0x459   : > { %v2371_v12 = vmax.f32 %v2339_v16, 0.0 }
 0x45a   : > { %v2403_v49 = vpack.c.bf16 %v2373_v60, %v2372_v21 }
 0x45b   : > { %v2402_v58 = vpack.c.bf16 %v2371_v12, %v2370_v0  ;;  %v6046_v29 = vpop.f32.mrb[40].mxu1 }
 0x45c   : > { %v2344_v44 = vadd.f32 %v6046_v29, %v7631_v13  ;;  %v2222_v48 = vpop.f32.mrb[41].mxu1 }
 0x45d   : > { %v2342_v24 = vadd.f32 %v7631_v13, %v2222_v48  ;;  %v6047_v30 = vpop.f32.mrb[42].mxu1  ;;  %6080 = vmatprep.mubr.msk.bf16.mxu0 %vm599_vm0, %v2402_v58 }
 0x45e   : > { %v2345_v23 = vadd.f32 %v6047_v30, %v7631_v13  ;;  %v2225_v27 = vpop.f32.mrb[43].mxu1  ;;  %6081 = vmatmul.mubr.msk.bf16.vlgmr.msra.gmra.mrb[40].mxu0 %vm599_vm0, %v2403_v49  ;;  %v2376_v40 = vmax.f32 %v2344_v44, 0.0 }
 0x45f   : > { %v2343_v43 = vadd.f32 %v7631_v13, %v2225_v27  ;;  %v2374_v7 = vmax.f32 %v2342_v24, 0.0 }
 0x460   : > { %v2377_v33 = vmax.f32 %v2345_v23, 0.0 }
 0x461   : > { %v2375_v36 = vmax.f32 %v2343_v43, 0.0 }
 0x462   : > { %v2405_v35 = vpack.c.bf16 %v2377_v33, %v2376_v40 }
 0x463   : > { %v2404_v22 = vpack.c.bf16 %v2375_v36, %v2374_v7  ;;  %v6050_v16 = vpop.f32.mrb[44].mxu1 }
 0x464   : > { %v2348_v21 = vadd.f32 %v6050_v16, %v7631_v13  ;;  %v2238_v60 = vpop.f32.mrb[45].mxu1 }
 0x465   : > { %v2346_v0 = vadd.f32 %v7631_v13, %v2238_v60  ;;  %v6051_v12 = vpop.f32.mrb[46].mxu1  ;;  %6084 = vmatprep.mubr.msk.bf16.mxu0 %vm599_vm0, %v2404_v22 }
 0x466   : > { %v2349_v58 = vadd.f32 %v6051_v12, %v7631_v13  ;;  %v2241_v49 = vpop.f32.mrb[47].mxu1  ;;  %6085 = vmatmul.mubr.msk.bf16.gmra.mrb[44].mxu0 %vm599_vm0, %v2405_v35  ;;  %v2380_v44 = vmax.f32 %v2348_v21, 0.0 }
 0x467   : > { %v2347_v29 = vadd.f32 %v7631_v13, %v2241_v49  ;;  %v2378_v24 = vmax.f32 %v2346_v0, 0.0 }
 0x468   : > { %v2381_v48 = vmax.f32 %v2349_v58, 0.0 }
 0x469   : > { %v2379_v30 = vmax.f32 %v2347_v29, 0.0 }
 0x46a   : > { %v2407_v23 = vpack.c.bf16 %v2381_v48, %v2380_v44 }
 0x46b   : > { %v2406_v27 = vpack.c.bf16 %v2379_v30, %v2378_v24  ;;  %v6054_v43 = vpop.f32.mrb[48].mxu1 }
 0x46c   : > { %v2352_v40 = vadd.f32 %v6054_v43, %v7631_v13  ;;  %v2254_v33 = vpop.f32.mrb[49].mxu1 }
 0x46d   : > { %v2350_v7 = vadd.f32 %v7631_v13, %v2254_v33  ;;  %v6055_v36 = vpop.f32.mrb[50].mxu1  ;;  %6088 = vmatprep.mubr.msk.bf16.mxu0 %vm599_vm0, %v2406_v27 }
 0x46e   : > { %v2353_v22 = vadd.f32 %v6055_v36, %v7631_v13  ;;  %v2257_v35 = vpop.f32.mrb[51].mxu1  ;;  %6089 = vmatmul.mubr.msk.bf16.gmra.mrb[48].mxu0 %vm599_vm0, %v2407_v23  ;;  %v2384_v21 = vmax.f32 %v2352_v40, 0.0 }
 0x46f   : > { %v2351_v16 = vadd.f32 %v7631_v13, %v2257_v35  ;;  %v2382_v0 = vmax.f32 %v2350_v7, 0.0 }
 0x470   : > { %v2385_v60 = vmax.f32 %v2353_v22, 0.0 }
 0x471   : > { %v2383_v12 = vmax.f32 %v2351_v16, 0.0 }
 0x472   : > { %v2409_v58 = vpack.c.bf16 %v2385_v60, %v2384_v21 }
 0x473   : > { %v2408_v49 = vpack.c.bf16 %v2383_v12, %v2382_v0  ;;  %v6058_v29 = vpop.f32.mrb[52].mxu1 }
 0x474   : > { %v2356_v44 = vadd.f32 %v6058_v29, %v7631_v13  ;;  %v2270_v48 = vpop.f32.mrb[53].mxu1 }
 0x475   : > { %v2354_v24 = vadd.f32 %v7631_v13, %v2270_v48  ;;  %v6059_v30 = vpop.f32.mrb[54].mxu1  ;;  %6092 = vmatprep.mubr.msk.bf16.mxu0 %vm599_vm0, %v2408_v49 }
 0x476   : > { %v2357_v27 = vadd.f32 %v6059_v30, %v7631_v13  ;;  %v2273_v23 = vpop.f32.mrb[55].mxu1  ;;  %6093 = vmatmul.mubr.msk.bf16.gmra.mrb[52].mxu0 %vm599_vm0, %v2409_v58  ;;  %v2388_v40 = vmax.f32 %v2356_v44, 0.0 }
 0x477   : > { %v2355_v43 = vadd.f32 %v7631_v13, %v2273_v23  ;;  %v2386_v7 = vmax.f32 %v2354_v24, 0.0 }
 0x478   : > { %v2389_v33 = vmax.f32 %v2357_v27, 0.0 }
 0x479   : > { %v2387_v36 = vmax.f32 %v2355_v43, 0.0 }
 0x47a   : > { %v2411_v22 = vpack.c.bf16 %v2389_v33, %v2388_v40 }
 0x47b   : > { %v2410_v35 = vpack.c.bf16 %v2387_v36, %v2386_v7  ;;  %v6062_v16 = vpop.f32.mrb[56].mxu1 }
 0x47c   : > { %v2360_v21 = vadd.f32 %v6062_v16, %v7631_v13  ;;  %v2286_v60 = vpop.f32.mrb[57].mxu1 }
 0x47d   : > { %v2358_v0 = vadd.f32 %v7631_v13, %v2286_v60  ;;  %v6063_v12 = vpop.f32.mrb[58].mxu1  ;;  %6096 = vmatprep.mubr.msk.bf16.mxu0 %vm599_vm0, %v2410_v35 }
 0x47e   : > { %v2361_v49 = vadd.f32 %v6063_v12, %v7631_v13  ;;  %v2289_v58 = vpop.f32.mrb[59].mxu1  ;;  %6097 = vmatmul.mubr.msk.bf16.gmra.mrb[56].mxu0 %vm599_vm0, %v2411_v22  ;;  %v2392_v44 = vmax.f32 %v2360_v21, 0.0 }
 0x47f   : > { %v2359_v29 = vadd.f32 %v7631_v13, %v2289_v58  ;;  %v2390_v24 = vmax.f32 %v2358_v0, 0.0 }
 0x480   : > { %v2393_v48 = vmax.f32 %v2361_v49, 0.0 }
 0x481   : > { %v2391_v30 = vmax.f32 %v2359_v29, 0.0 }
 0x482   : > { %v2413_v27 = vpack.c.bf16 %v2393_v48, %v2392_v44 }
 0x483   : > { %v2412_v23 = vpack.c.bf16 %v2391_v30, %v2390_v24  ;;  %v6066_v43 = vpop.f32.mrb[60].mxu1 }
 0x484   : > { %v2364_v40 = vadd.f32 %v6066_v43, %v7631_v13  ;;  %v2302_v33 = vpop.f32.mrb[61].mxu1 }
 0x485   : > { %v2362_v7 = vadd.f32 %v7631_v13, %v2302_v33  ;;  %v6067_v36 = vpop.f32.mrb[62].mxu1  ;;  %6100 = vmatprep.mubr.msk.bf16.mxu0 %vm599_vm0, %v2412_v23 }
 0x486   : > { %v2365_v35 = vadd.f32 %v6067_v36, %v7631_v13  ;;  %v2305_v22 = vpop.f32.mrb[63].mxu1  ;;  %6101 = vmatmul.mubr.msk.bf16.gmra.mrb[60].mxu0 %vm599_vm0, %v2413_v27  ;;  %v2396_v21 = vmax.f32 %v2364_v40, 0.0 }
 0x487   : > { %v2363_v16 = vadd.f32 %v7631_v13, %v2305_v22  ;;  %v2394_v0 = vmax.f32 %v2362_v7, 0.0 }
 0x488   : > { %v2397_v60 = vmax.f32 %v2365_v35, 0.0 }
 0x489   : > { %v2395_v12 = vmax.f32 %v2363_v16, 0.0 }
 0x48a   : > { %v2415_v49 = vpack.c.bf16 %v2397_v60, %v2396_v21 }
 0x48b   : > { %v2414_v58 = vpack.c.bf16 %v2395_v12, %v2394_v0  ;;  %v6070_v29 = vpop.f32.mrb[64].mxu1 }
 0x48c   : > { %v2368_v44 = vadd.f32 %v6070_v29, %v7631_v13  ;;  %v2318_v48 = vpop.f32.mrb[65].mxu1 }
 0x48d   : > { %v2366_v24 = vadd.f32 %v7631_v13, %v2318_v48  ;;  %v6071_v30 = vpop.f32.mrb[66].mxu1  ;;  %6104 = vmatprep.mubr.msk.bf16.mxu0 %vm599_vm0, %v2414_v58 }
 0x48e   : > { %v2369_v23 = vadd.f32 %v6071_v30, %v7631_v13  ;;  %v2321_v27 = vpop.f32.mrb[67].mxu1  ;;  %6105 = vmatmul.mubr.msk.bf16.gmra.mrb[64].mxu0 %vm599_vm0, %v2415_v49  ;;  %v2400_v40 = vmax.f32 %v2368_v44, 0.0 }
 0x48f   : > { %v2367_v43 = vadd.f32 %v7631_v13, %v2321_v27  ;;  %v2398_v7 = vmax.f32 %v2366_v24, 0.0 }
 0x490   : > { %v2401_v33 = vmax.f32 %v2369_v23, 0.0 }
 0x491   : > { %v2399_v36 = vmax.f32 %v2367_v43, 0.0 }
 0x492   : > { %v2417_v35 = vpack.c.bf16 %v2401_v33, %v2400_v40  ;;  %v8907_v40 = vld [vmem:[#allocation4_spill] sm:$0xff] }
 0x493   : > { %v2416_v22 = vpack.c.bf16 %v2399_v36, %v2398_v7 }
 0x495   : > { %6108 = vmatprep.mubr.msk.bf16.mxu0 %vm599_vm0, %v2416_v22 }
 0x496   : > { %6109 = vmatmul.mubr.msk.bf16.gmra.mrb[68].mxu0 %vm599_vm0, %v2417_v35 }
 0x497   : > { %6126 = vmatprep.mubr.msk.bf16.mxu0 %vm6597_vm1, %v8830_v63 }
 0x531   : > { %v7683_v16 = vpop.f32.mrb[40].mxu0 }
 0x532   : > { %v7685_v21 = vpop.f32.mrb[41].mxu0  ;;  %v2661_v13 = vmul.f32 %v7099_v17, %v7683_v16 }
 0x533   : > { %v7687_v60 = vpop.f32.mrb[42].mxu0  ;;  %v2659_v49 = vmul.f32 %v6916_v50, %v7685_v21 }
 0x534   : > { %v2662_v0 = vmul.f32 %v7103_v18, %v7687_v60  ;;  %v7693_v12 = vpop.f32.mrb[43].mxu0 }
 0x535   : > { %v2660_v58 = vmul.f32 %v6912_v46, %v7693_v12 }
 0x536   : > { %v2692_v29 = vpack.c.bf16 %v2662_v0, %v2661_v13 }
 0x537   : > { %v2691_v44 = vpack.c.bf16 %v2660_v58, %v2659_v49 }
 0x539   : > { %v7699_v48 = vpop.f32.mrb[44].mxu0  ;;  %6113 = vmatpush3.bf16.msra.mxu1 %v2691_v44  ;;  %v8908_v44 = vld [vmem:[#allocation6_spill] sm:$0xff] }
 0x53a   : > { %v7701_v24 = vpop.f32.mrb[45].mxu0  ;;  %6118 = vmatprep.subr.bf16.mxu1 %v8830_v63  ;;  %v2665_v23 = vmul.f32 %v7119_v26, %v7699_v48 }
 0x53b   : > { %v7704_v30 = vpop.f32.mrb[46].mxu0  ;;  %v2663_v33 = vmul.f32 %v6930_v6, %v7701_v24 }
 0x53c   : > { %v2666_v27 = vmul.f32 %v7123_v5, %v7704_v30  ;;  %v7710_v43 = vpop.f32.mrb[47].mxu0  ;;  %6115 = vmatmul.mubr.msk.bf16.vlgmr.msra.gmra.mrb[68].mxu1 %vm907_vm2, %v8907_v40 }
 0x53d   : > { %v2664_v7 = vmul.f32 %v6934_v10, %v7710_v43  ;;  %6119 = vmatpush3.bf16.msra.mxu1 %v2692_v29  ;;  %6120 = vmatprep.mubr.msk.bf16.mxu1 %vm6597_vm1, %v8830_v63 }
 0x53e   : > { %v2694_v36 = vpack.c.bf16 %v2666_v27, %v2665_v23  ;;  %6130 = vmatprep.subr.bf16.mxu1 %v8830_v63  ;;  %v8909_v23 = vld [vmem:[#allocation21_spill] sm:$0xff] }
 0x53f   : > { %v2693_v35 = vpack.c.bf16 %v2664_v7, %v2663_v33  ;;  %v8910_v33 = vld [vmem:[#allocation22_spill] sm:$0xff] }
 0x541   : > { %v7721_v22 = vpop.f32.mrb[48].mxu0  ;;  %6125 = vmatpush3.bf16.msra.mxu0 %v2693_v35 }
 0x542   : > { %v7723_v13 = vpop.f32.mrb[49].mxu0  ;;  %6136 = vmatprep.subr.bf16.mxu0 %v8830_v63  ;;  %v2669_v49 = vmul.f32 %v7160_v14, %v7721_v22 }
 0x543   : > { %v7726_v0 = vpop.f32.mrb[50].mxu0  ;;  %v2667_v27 = vmul.f32 %v8909_v23, %v7723_v13 }
 0x544   : > { %v2670_v58 = vmul.f32 %v7164_v41, %v7726_v0  ;;  %v7732_v29 = vpop.f32.mrb[51].mxu0  ;;  %6121 = vmatmul.mubr.msk.bf16.vlgmr.msra.gmra.mrb[72].mxu1 %vm907_vm2, %v6765_v42  ;;  %6127 = vmatmul.mubr.msk.bf16.vlgmr.msra.gmra.mrb[72].mxu0 %vm907_vm2, %v8908_v44 }
 0x545   : > { %v2668_v7 = vmul.f32 %v8910_v33, %v7732_v29  ;;  %6131 = vmatpush3.bf16.msra.mxu1 %v2694_v36  ;;  %6132 = vmatprep.mubr.msk.bf16.mxu1 %vm6597_vm1, %v8830_v63 }
 0x546   : > { %v2696_v35 = vpack.c.bf16 %v2670_v58, %v2669_v49  ;;  %6138 = vmatprep.mubr.msk.bf16.mxu0 %vm6597_vm1, %v8830_v63  ;;  %6142 = vmatprep.subr.bf16.mxu1 %v8830_v63 }
 0x547   : > { %v2695_v42 = vpack.c.bf16 %v2668_v7, %v2667_v27  ;;  %v8913_v27 = vld [vmem:[#allocation8_spill] sm:$0xff] }
 0x549   : > { %v7747_v40 = vpop.f32.mrb[52].mxu0  ;;  %6137 = vmatpush3.bf16.msra.mxu0 %v2695_v42  ;;  %v8914_v42 = vld [vmem:[#allocation23_spill] sm:$0xff] }
 0x54a   : > { %v7749_v44 = vpop.f32.mrb[53].mxu0  ;;  %6148 = vmatprep.subr.bf16.mxu0 %v8830_v63  ;;  %v2673_v36 = vmul.f32 %v7194_v51, %v7747_v40 }
 0x54b   : > { %v7752_v39 = vpop.f32.mrb[54].mxu0  ;;  %v2671_v7 = vmul.f32 %v8914_v42, %v7749_v44 }
 0x54c   : > { %8911 = vst [vmem:[#allocation21_spill] sm:$0xff] %v7752_v39  ;;  %v2674_v49 = vmul.f32 %v7203_v1, %v7752_v39  ;;  %v7758_v58 = vpop.f32.mrb[55].mxu0  ;;  %6133 = vmatmul.mubr.msk.bf16.vlgmr.msra.gmra.mrb[76].mxu1 %vm907_vm2, %v8912_v52  ;;  %6139 = vmatmul.mubr.msk.bf16.vlgmr.msra.gmra.mrb[76].mxu0 %vm907_vm2, %v8913_v27  ;;  %v8922_v1 = vld [vmem:[#allocation26_spill] sm:$0xff] }
 0x54d   : > { %v2672_v31 = vmul.f32 %v8915_v11, %v7758_v58  ;;  %6143 = vmatpush3.bf16.msra.mxu1 %v2696_v35  ;;  %6144 = vmatprep.mubr.msk.bf16.mxu1 %vm6597_vm1, %v8830_v63 }
 0x54e   : > { %v2698_v3 = vpack.c.bf16 %v2674_v49, %v2673_v36  ;;  %6150 = vmatprep.mubr.msk.bf16.mxu0 %vm6597_vm1, %v8830_v63  ;;  %6154 = vmatprep.subr.bf16.mxu1 %v8830_v63 }
 0x54f   : > { %v2697_v52 = vpack.c.bf16 %v2672_v31, %v2671_v7  ;;  %v8920_v31 = vld [vmem:[#allocation10_spill] sm:$0xff] }
 0x551   : > { %v7773_v62 = vpop.f32.mrb[56].mxu0  ;;  %6149 = vmatpush3.bf16.msra.mxu0 %v2697_v52  ;;  %v8921_v52 = vld [vmem:[#allocation25_spill] sm:$0xff] }
 0x552   : > { %8916 = vst [vmem:[#allocation22_spill] sm:$0xff] %v7773_v62  ;;  %v7775_v27 = vpop.f32.mrb[57].mxu0  ;;  %6160 = vmatprep.subr.bf16.mxu0 %v8830_v63  ;;  %v2677_v35 = vmul.f32 %v7245_v54, %v7773_v62  ;;  %v8925_v62 = vld [vmem:[#allocation11_spill] sm:$0xff] }
 0x553   : > { %v7778_v59 = vpop.f32.mrb[58].mxu0  ;;  %v2675_v7 = vmul.f32 %v8921_v52, %v7775_v27 }
 0x554   : > { %8917 = vst [vmem:[#allocation72_spill] sm:$0xff] %v7778_v59  ;;  %v2678_v36 = vmul.f32 %v7249_v47, %v7778_v59  ;;  %v7784_v49 = vpop.f32.mrb[59].mxu0  ;;  %6145 = vmatmul.mubr.msk.bf16.vlgmr.msra.gmra.mrb[80].mxu1 %vm907_vm2, %v8919_v57  ;;  %6151 = vmatmul.mubr.msk.bf16.vlgmr.msra.gmra.mrb[80].mxu0 %vm907_vm2, %v8920_v31 }
 0x555   : > { %8918 = vst [vmem:[#allocation73_spill] sm:$0xff] %v7784_v49  ;;  %v2676_v39 = vmul.f32 %v8922_v1, %v7784_v49  ;;  %6155 = vmatpush3.bf16.msra.mxu1 %v2698_v3  ;;  %6156 = vmatprep.mubr.msk.bf16.mxu1 %vm6597_vm1, %v8830_v63  ;;  %v8928_v1 = vld [vmem:[#allocation28_spill] sm:$0xff] }
 0x556   : > { %v2700_v54 = vpack.c.bf16 %v2678_v36, %v2677_v35  ;;  %6162 = vmatprep.mubr.msk.bf16.mxu0 %vm6597_vm1, %v8830_v63  ;;  %6166 = vmatprep.subr.bf16.mxu1 %v8830_v63 }
 0x557   : > { %v2699_v57 = vpack.c.bf16 %v2676_v39, %v2675_v7  ;;  %v8926_v39 = vld [vmem:[#allocation12_spill] sm:$0xff] }
 0x559   : > { %v7799_v47 = vpop.f32.mrb[60].mxu0  ;;  %6161 = vmatpush3.bf16.msra.mxu0 %v2699_v57  ;;  %v8927_v57 = vld [vmem:[#allocation27_spill] sm:$0xff] }
 0x55a   : > { %8923 = vst [vmem:[#allocation74_spill] sm:$0xff] %v7799_v47  ;;  %v7801_v31 = vpop.f32.mrb[61].mxu0  ;;  %6172 = vmatprep.subr.bf16.mxu0 %v8830_v63  ;;  %v2681_v3 = vmul.f32 %v7289_v28, %v7799_v47  ;;  %v8931_v47 = vld [vmem:[#allocation13_spill] sm:$0xff] }
 0x55b   : > { %v7804_v59 = vpop.f32.mrb[62].mxu0  ;;  %v2679_v7 = vmul.f32 %v8927_v57, %v7801_v31 }
 0x55c   : > { %8924 = vst [vmem:[#allocation75_spill] sm:$0xff] %v7804_v59  ;;  %v2682_v35 = vmul.f32 %v7293_v15, %v7804_v59  ;;  %v7810_v36 = vpop.f32.mrb[63].mxu0  ;;  %6157 = vmatmul.mubr.msk.bf16.vlgmr.msra.gmra.mrb[84].mxu1 %vm907_vm2, %v8925_v62  ;;  %6163 = vmatmul.mubr.msk.bf16.vlgmr.msra.gmra.mrb[84].mxu0 %vm907_vm2, %v8926_v39 }
 0x55d   : > { %v2680_v49 = vmul.f32 %v8928_v1, %v7810_v36  ;;  %6167 = vmatpush3.bf16.msra.mxu1 %v2700_v54  ;;  %6168 = vmatprep.mubr.msk.bf16.mxu1 %vm6597_vm1, %v8830_v63 }
 0x55e   : > { %v2702_v28 = vpack.c.bf16 %v2682_v35, %v2681_v3  ;;  %6174 = vmatprep.mubr.msk.bf16.mxu0 %vm6597_vm1, %v8830_v63  ;;  %6178 = vmatprep.subr.bf16.mxu1 %v8830_v63 }
 0x55f   : > { %v2701_v62 = vpack.c.bf16 %v2680_v49, %v2679_v7  ;;  %v8932_v49 = vld [vmem:[#allocation14_spill] sm:$0xff] }
 0x561   : > { %v7825_v15 = vpop.f32.mrb[64].mxu0  ;;  %6173 = vmatpush3.bf16.msra.mxu0 %v2701_v62 }
 0x562   : > { %8929 = vst [vmem:[#allocation76_spill] sm:$0xff] %v7825_v15  ;;  %v7827_v39 = vpop.f32.mrb[65].mxu0  ;;  %6184 = vmatprep.subr.bf16.mxu0 %v8830_v63  ;;  %v2685_v54 = vmul.f32 %v7331_v61, %v7825_v15  ;;  %v8937_v15 = vld [vmem:[#allocation15_spill] sm:$0xff] }
 0x563   : > { %v7830_v59 = vpop.f32.mrb[66].mxu0  ;;  %v2683_v62 = vmul.f32 %v7041_v2, %v7827_v39 }
 0x564   : > { %8930 = vst [vmem:[#allocation77_spill] sm:$0xff] %v7830_v59  ;;  %v2686_v3 = vmul.f32 %v7335_v38, %v7830_v59  ;;  %v7836_v35 = vpop.f32.mrb[67].mxu0  ;;  %6169 = vmatmul.mubr.msk.bf16.vlgmr.msra.gmra.mrb[88].mxu1 %vm907_vm2, %v8931_v47  ;;  %6175 = vmatmul.mubr.msk.bf16.vlgmr.msra.gmra.mrb[88].mxu0 %vm907_vm2, %v8932_v49 }
 0x565   : > { %v2684_v7 = vmul.f32 %v7045_v9, %v7836_v35  ;;  %6179 = vmatpush3.bf16.msra.mxu1 %v2702_v28  ;;  %6180 = vmatprep.mubr.msk.bf16.mxu1 %vm6597_vm1, %v8830_v63 }
 0x566   : > { %v2704_v61 = vpack.c.bf16 %v2686_v3, %v2685_v54  ;;  %6186 = vmatprep.mubr.msk.bf16.mxu0 %vm6597_vm1, %v8830_v63  ;;  %6190 = vmatprep.subr.bf16.mxu1 %v8830_v63 }
 0x567   : > { %v2703_v47 = vpack.c.bf16 %v2684_v7, %v2683_v62  ;;  %v8938_v62 = vld [vmem:[#allocation16_spill] sm:$0xff] }
 0x569   : > { %v7851_v38 = vpop.f32.mrb[68].mxu0  ;;  %6185 = vmatpush3.bf16.msra.mxu0 %v2703_v47 }
 0x56a   : > { %8933 = vst [vmem:[#allocation78_spill] sm:$0xff] %v7851_v38  ;;  %v7853_v49 = vpop.f32.mrb[69].mxu0  ;;  %6196 = vmatprep.subr.bf16.mxu0 %v8830_v63  ;;  %v2689_v28 = vmul.f32 %v7373_v53, %v7851_v38 }
 0x56b   : > { %8934 = vst [vmem:[#allocation79_spill] sm:$0xff] %v7853_v49  ;;  %v7856_v59 = vpop.f32.mrb[70].mxu0  ;;  %v2687_v47 = vmul.f32 %v7061_v4, %v7853_v49 }
 0x56c   : > { %8935 = vst [vmem:[#allocation80_spill] sm:$0xff] %v7856_v59  ;;  %v2690_v54 = vmul.f32 %v7377_v20, %v7856_v59  ;;  %v7862_v3 = vpop.f32.mrb[71].mxu0  ;;  %6181 = vmatmul.mubr.msk.bf16.vlgmr.msra.gmra.mrb[92].mxu1 %vm907_vm2, %v8937_v15  ;;  %6187 = vmatmul.mubr.msk.bf16.vlgmr.msra.gmra.mrb[92].mxu0 %vm907_vm2, %v8938_v62  ;;  %v8939_v20 = vld [vmem:[#allocation17_spill] sm:$0xff]  ;;  %v8940_v62 = vld [vmem:[#allocation18_spill] sm:$0xff] }
 0x56d   : > { %8936 = vst [vmem:[#allocation81_spill] sm:$0xff] %v7862_v3  ;;  %v2688_v7 = vmul.f32 %v7065_v8, %v7862_v3  ;;  %6191 = vmatpush3.bf16.msra.mxu1 %v2704_v61  ;;  %6192 = vmatprep.mubr.msk.bf16.mxu1 %vm6597_vm1, %v8830_v63  ;;  %v8941_v61 = vld [vmem:[#allocation19_spill] sm:$0xff] }
 0x56e   : > { %v2706_v53 = vpack.c.bf16 %v2690_v54, %v2689_v28  ;;  %6198 = vmatprep.mubr.msk.bf16.mxu0 %vm6597_vm1, %v8830_v63  ;;  %6202 = vmatprep.subr.bf16.mxu1 %v8830_v63  ;;  %v6468_v28 = vld [vmem:[%s8600_s3 + $0x90] sm:$0xff]   ;;  %v6469_v54 = vld [vmem:[%s8600_s3 + $0x98] sm:$0xff]  }
 0x56f   : > { %v2705_v15 = vpack.c.bf16 %v2688_v7, %v2687_v47  ;;  %v8942_v7 = vld [vmem:[#allocation33_spill] sm:$0xff] }
 0x571   : > { %6197 = vmatpush3.bf16.msra.mxu0 %v2705_v15  ;;  %v6466_v15 = vld [vmem:[%s8600_s3 + $0x80] sm:$0xff]  }
 0x572   : > { %6208 = vmatprep.subr.bf16.mxu0 %v6466_v15 }
 0x574   : > { %6193 = vmatmul.mubr.msk.bf16.vlgmr.msra.gmra.mrb[96].mxu1 %vm907_vm2, %v8939_v20  ;;  %6199 = vmatmul.mubr.msk.bf16.vlgmr.msra.gmra.mrb[96].mxu0 %vm907_vm2, %v8940_v62  ;;  %v8943_v20 = vld [vmem:[#allocation34_spill] sm:$0xff] }
 0x575   : > { %6203 = vmatpush3.bf16.msra.mxu1 %v2706_v53  ;;  %6204 = vmatprep.mubr.msk.bf16.mxu1 %vm6597_vm1, %v8830_v63  ;;  %v6467_v53 = vld [vmem:[%s8600_s3 + $0x88] sm:$0xff]   ;;  %v3396_v59 = vmul.f32 %v7693_v12, %v8943_v20 }
 0x576   : > { %6248 = vmatprep.subr.bf16.mxu1 %v8830_v63  ;;  %6209 = vmatpush3.bf16.msra.mxu0 %v6466_v15  ;;  %v3395_v15 = vmul.f32 %v7685_v21, %v8942_v7 }
 0x577   : > { %6210 = vmatprep.subr.bf16.mxu0 %v6467_v53 }
 0x57a   : > { %6211 = vmatpush3.bf16.msra.mxu0 %v6467_v53 }
 0x57b   : > { %6212 = vmatprep.subr.bf16.mxu0 %v6468_v28 }
 0x57c   : > { %6205 = vmatmul.mubr.msk.bf16.vlgmr.msra.gmra.mrb[100].mxu1 %vm907_vm2, %v8941_v61  ;;  %v7907_v61 = vld [vmem:[%s8601_s4 + $0x20] ss:$0 sm:$0xff] }
 0x57d   : > { %6250 = vmatprep.mubr.msk.bf16.mxu1 %vm6597_vm1, %v8830_v63 }
 0x57e   : > { %6213 = vmatpush3.bf16.msra.mxu0 %v6468_v28 }
 0x57f   : > { %6214 = vmatprep.subr.bf16.mxu0 %v6469_v54 }
 0x582   : > { %6215 = vmatpush3.bf16.msra.mxu0 %v6469_v54 }
 0x583   : > { %6302 = vmatprep.subr.bf16.mxu0 %v8830_v63 }
 0x60f   : > { %v2741_v47 = vpop.f32.mrb[68].mxu1 }
 0x610   : > { %v3363_v53 = vmul.f32 %v6916_v50, %v2741_v47  ;;  %v6116_v62 = vpop.f32.mrb[69].mxu1  ;;  %v8944_v47 = vld [vmem:[#allocation35_spill] sm:$0xff] }
 0x611   : > { %v2744_v28 = vpop.f32.mrb[70].mxu1  ;;  %v3397_v62 = vmul.f32 %v7683_v16, %v7457_v34  ;;  %v3399_v7 = vmul.f32 %v7701_v24, %v8944_v47 }
 0x612   : > { %v3427_v38 = vadd.f32 %v3395_v15, %v3363_v53  ;;  %v3364_v54 = vmul.f32 %v6912_v46, %v2744_v28  ;;  %v6117_v63 = vpop.f32.mrb[71].mxu1 }
 0x614   : > { %v3464_v8 = vadd.f32 %v7907_v61, %v3427_v38  ;;  %v3428_v3 = vadd.f32 %v3396_v59, %v3364_v54  ;;  %v3398_v38 = vmul.f32 %v7687_v60, %v7461_v56 }
 0x616   : > { %v3465_v21 = vadd.f32 %v7907_v61, %v3428_v3  ;;  %v3496_v49 = vmax.f32 %v3464_v8, 0.0  ;;  %v8945_v8 = vld [vmem:[#allocation37_spill] sm:$0xff] }
 0x617   : > { %v2782_v50 = vpop.f32.mrb[72].mxu1  ;;  %v2823_v4 = vpop.f32.mrb[72].mxu0 }
 0x618   : > { %v3497_v9 = vmax.f32 %v3465_v21, 0.0  ;;  %v3365_v12 = vmul.f32 %v7099_v17, %v2782_v50  ;;  %v3367_v15 = vmul.f32 %v6930_v6, %v2823_v4  ;;  %v6122_v63 = vpop.f32.mrb[73].mxu1  ;;  %v6128_v53 = vpop.f32.mrb[73].mxu0  ;;  %v3400_v21 = vmul.f32 %v7710_v43, %v8945_v8 }
 0x619   : > { %v2785_v59 = vpop.f32.mrb[74].mxu1  ;;  %v2826_v3 = vpop.f32.mrb[74].mxu0 }
 0x61a   : > { %v3528_v28 = vpack.c.bf16 %v3497_v9, %v3496_v49  ;;  %v3429_v16 = vadd.f32 %v3397_v62, %v3365_v12  ;;  %v3431_v54 = vadd.f32 %v3399_v7, %v3367_v15  ;;  %v3366_v24 = vmul.f32 %v7103_v18, %v2785_v59  ;;  %v6123_v47 = vpop.f32.mrb[75].mxu1  ;;  %v6129_v34 = vpop.f32.mrb[75].mxu0  ;;  %v8946_v7 = vld [vmem:[#allocation39_spill] sm:$0xff] }
 0x61b   : > { %v3368_v50 = vmul.f32 %v6934_v10, %v2826_v3  ;;  %v3401_v49 = vmul.f32 %v7699_v48, %v7473_v32  ;;  %v3403_v34 = vmul.f32 %v7723_v13, %v8946_v7  ;;  %v8947_v7 = vld [vmem:[#allocation41_spill] sm:$0xff] }
 0x61c   : > { %v3466_v4 = vadd.f32 %v7907_v61, %v3429_v16  ;;  %v3430_v63 = vadd.f32 %v3398_v38, %v3366_v24  ;;  %6216 = vmatprep.mubr.msk.bf16.mxu0 %vm599_vm0, %v3528_v28  ;;  %v3468_v60 = vadd.f32 %v7907_v61, %v3431_v54  ;;  %v3402_v16 = vmul.f32 %v7704_v30, %v7477_v45 }
 0x61d   : > { %v3432_v53 = vadd.f32 %v3400_v21, %v3368_v50 }
 0x61e   : > { %v3467_v9 = vadd.f32 %v7907_v61, %v3430_v63  ;;  %v3498_v12 = vmax.f32 %v3466_v4, 0.0  ;;  %v3500_v54 = vmax.f32 %v3468_v60, 0.0 }
 0x61f   : > { %v3469_v43 = vadd.f32 %v7907_v61, %v3432_v53  ;;  %v2864_v62 = vpop.f32.mrb[76].mxu1  ;;  %v2905_v47 = vpop.f32.mrb[76].mxu0 }
 0x620   : > { %v3499_v15 = vmax.f32 %v3467_v9, 0.0  ;;  %v3369_v38 = vmul.f32 %v7119_v26, %v2864_v62  ;;  %v3371_v59 = vmul.f32 %v8909_v23, %v2905_v47  ;;  %v6134_v3 = vpop.f32.mrb[77].mxu1  ;;  %v6140_v28 = vpop.f32.mrb[77].mxu0  ;;  %v3404_v62 = vmul.f32 %v7732_v29, %v8947_v7 }
 0x621   : > { %v3501_v48 = vmax.f32 %v3469_v43, 0.0  ;;  %v2867_v24 = vpop.f32.mrb[78].mxu1  ;;  %v2908_v21 = vpop.f32.mrb[78].mxu0 }
 0x622   : > { %v3529_v13 = vpack.c.bf16 %v3499_v15, %v3498_v12  ;;  %v3433_v50 = vadd.f32 %v3401_v49, %v3369_v38  ;;  %v3435_v63 = vadd.f32 %v3403_v34, %v3371_v59  ;;  %v3370_v53 = vmul.f32 %v7123_v5, %v2867_v24  ;;  %v6135_v4 = vpop.f32.mrb[79].mxu1  ;;  %v6141_v9 = vpop.f32.mrb[79].mxu0  ;;  %v8948_v12 = vld [vmem:[#allocation42_spill] sm:$0xff] }
 0x623   : > { %v3530_v47 = vpack.c.bf16 %v3501_v48, %v3500_v54  ;;  %v3372_v3 = vmul.f32 %v8910_v33, %v2908_v21  ;;  %v3405_v34 = vmul.f32 %v7721_v22, %v7494_v55  ;;  %v3407_v29 = vmul.f32 %v7749_v44, %v8948_v12 }
 0x624   : > { %v3470_v28 = vadd.f32 %v7907_v61, %v3433_v50  ;;  %v3434_v30 = vadd.f32 %v3402_v16, %v3370_v53  ;;  %6217 = vmatmul.mubr.msk.bf16.vlgmr.msra.gmra.mrb[100].mxu0 %vm599_vm0, %v3529_v13  ;;  %v3472_v60 = vadd.f32 %v7907_v61, %v3435_v63  ;;  %v3406_v50 = vmul.f32 %v7726_v0, %v7498_v37 }
 0x625   : > { %v3436_v43 = vadd.f32 %v3404_v62, %v3372_v3  ;;  %6220 = vmatprep.mubr.msk.bf16.mxu0 %vm599_vm0, %v3530_v47 }
 0x626   : > { %v3471_v49 = vadd.f32 %v7907_v61, %v3434_v30  ;;  %v3502_v16 = vmax.f32 %v3470_v28, 0.0  ;;  %v3504_v63 = vmax.f32 %v3472_v60, 0.0  ;;  %v8949_v30 = vld [vmem:[#allocation45_spill] sm:$0xff] }
 0x627   : > { %v3473_v15 = vadd.f32 %v7907_v61, %v3436_v43  ;;  %v2946_v38 = vpop.f32.mrb[80].mxu1  ;;  %v2987_v59 = vpop.f32.mrb[80].mxu0  ;;  %v3408_v43 = vmul.f32 %v7758_v58, %v8949_v30  ;;  %v8971_v30 = vld [vmem:[#allocation57_spill] sm:$0xff] }
 0x628   : > { %v3503_v54 = vmax.f32 %v3471_v49, 0.0  ;;  %v3373_v48 = vmul.f32 %v7160_v14, %v2946_v38  ;;  %v3375_v24 = vmul.f32 %v8914_v42, %v2987_v59  ;;  %v6146_v21 = vpop.f32.mrb[81].mxu1  ;;  %v6152_v13 = vpop.f32.mrb[81].mxu0 }
 0x629   : > { %v3505_v22 = vmax.f32 %v3473_v15, 0.0  ;;  %v2949_v53 = vpop.f32.mrb[82].mxu1  ;;  %v2990_v4 = vpop.f32.mrb[82].mxu0 }
 0x62a   : > { %v3531_v44 = vpack.c.bf16 %v3503_v54, %v3502_v16  ;;  %v3437_v9 = vadd.f32 %v3405_v34, %v3373_v48  ;;  %v3439_v62 = vadd.f32 %v3407_v29, %v3375_v24  ;;  %v3374_v47 = vmul.f32 %v7164_v41, %v2949_v53  ;;  %v6147_v3 = vpop.f32.mrb[83].mxu1  ;;  %v6153_v28 = vpop.f32.mrb[83].mxu0  ;;  %v8950_v16 = vld [vmem:[#allocation46_spill] sm:$0xff] }
 0x62b   : > { %v3532_v49 = vpack.c.bf16 %v3505_v22, %v3504_v63  ;;  %v3376_v38 = vmul.f32 %v8915_v11, %v2990_v4  ;;  %v3409_v29 = vmul.f32 %v7747_v40, %v7515_v19  ;;  %v3411_v58 = vmul.f32 %v7775_v27, %v8950_v16  ;;  %v8951_v4 = vld [vmem:[#allocation21_spill] sm:$0xff] }
 0x62c   : > { %v3474_v59 = vadd.f32 %v7907_v61, %v3437_v9  ;;  %v3438_v0 = vadd.f32 %v3406_v50, %v3374_v47  ;;  %6221 = vmatmul.mubr.msk.bf16.gmra.mrb[104].mxu0 %vm599_vm0, %v3531_v44  ;;  %v3476_v60 = vadd.f32 %v7907_v61, %v3439_v62  ;;  %v3410_v44 = vmul.f32 %v8951_v4, %v7519_v25  ;;  %v8963_v25 = vld [vmem:[#allocation53_spill] sm:$0xff] }
 0x62d   : > { %v3440_v15 = vadd.f32 %v3408_v43, %v3376_v38  ;;  %6224 = vmatprep.mubr.msk.bf16.mxu0 %vm599_vm0, %v3532_v49  ;;  %v8952_v43 = vld [vmem:[#allocation40_spill] sm:$0xff] }
 0x62e   : > { %v3475_v34 = vadd.f32 %v7907_v61, %v3438_v0  ;;  %v3506_v21 = vmax.f32 %v3474_v59, 0.0  ;;  %v3508_v9 = vmax.f32 %v3476_v60, 0.0  ;;  %v8953_v0 = vld [vmem:[#allocation49_spill] sm:$0xff] }
 0x62f   : > { %v3477_v54 = vadd.f32 %v7907_v61, %v3440_v15  ;;  %v3028_v48 = vpop.f32.mrb[84].mxu1  ;;  %v3069_v24 = vpop.f32.mrb[84].mxu0  ;;  %v8954_v15 = vld [vmem:[#allocation73_spill] sm:$0xff] }
 0x630   : > { %v3507_v13 = vmax.f32 %v3475_v34, 0.0  ;;  %v3377_v50 = vmul.f32 %v7194_v51, %v3028_v48  ;;  %v3379_v63 = vmul.f32 %v8921_v52, %v3069_v24  ;;  %v6158_v22 = vpop.f32.mrb[85].mxu1  ;;  %v6164_v53 = vpop.f32.mrb[85].mxu0  ;;  %v3412_v34 = vmul.f32 %v8954_v15, %v8953_v0  ;;  %v8955_v24 = vld [vmem:[#allocation26_spill] sm:$0xff]  ;;  %v8961_v15 = vld [vmem:[#allocation72_spill] sm:$0xff] }
 0x631   : > { %v3509_v40 = vmax.f32 %v3477_v54, 0.0  ;;  %v3031_v62 = vpop.f32.mrb[86].mxu1  ;;  %v3072_v47 = vpop.f32.mrb[86].mxu0  ;;  %v8962_v0 = vld [vmem:[#allocation44_spill] sm:$0xff] }
 0x632   : > { %v3533_v27 = vpack.c.bf16 %v3507_v13, %v3506_v21  ;;  %v3441_v3 = vadd.f32 %v3409_v29, %v3377_v50  ;;  %v3443_v28 = vadd.f32 %v3411_v58, %v3379_v63  ;;  %v3378_v49 = vmul.f32 %v8952_v43, %v3031_v62  ;;  %v6159_v38 = vpop.f32.mrb[87].mxu1  ;;  %v6165_v59 = vpop.f32.mrb[87].mxu0  ;;  %v8956_v58 = vld [vmem:[#allocation64_spill] sm:$0xff]  ;;  %v8957_v21 = vld [vmem:[#allocation22_spill] sm:$0xff] }
 0x633   : > { %v3534_v48 = vpack.c.bf16 %v3509_v40, %v3508_v9  ;;  %v3380_v22 = vmul.f32 %v8955_v24, %v3072_v47  ;;  %v3413_v13 = vmul.f32 %v8957_v21, %v8956_v58  ;;  %v8958_v50 = vld [vmem:[#allocation50_spill] sm:$0xff]  ;;  %v8960_v59 = vld [vmem:[#allocation65_spill] sm:$0xff] }
 0x634   : > { %v3478_v53 = vadd.f32 %v7907_v61, %v3441_v3  ;;  %v3442_v4 = vadd.f32 %v3410_v44, %v3378_v49  ;;  %6225 = vmatmul.mubr.msk.bf16.gmra.mrb[108].mxu0 %vm599_vm0, %v3533_v27  ;;  %v3480_v60 = vadd.f32 %v7907_v61, %v3443_v28  ;;  %v3415_v63 = vmul.f32 %v7801_v31, %v8958_v50  ;;  %v8959_v27 = vld [vmem:[#allocation43_spill] sm:$0xff] }
 0x635   : > { %v3444_v54 = vadd.f32 %v3412_v34, %v3380_v22  ;;  %6228 = vmatprep.mubr.msk.bf16.mxu0 %vm599_vm0, %v3534_v48  ;;  %v3414_v34 = vmul.f32 %v8961_v15, %v8960_v59  ;;  %v8982_v59 = vld [vmem:[#allocation59_spill] sm:$0xff] }
 0x636   : > { %v3479_v29 = vadd.f32 %v7907_v61, %v3442_v4  ;;  %v3510_v44 = vmax.f32 %v3478_v53, 0.0  ;;  %v3512_v48 = vmax.f32 %v3480_v60, 0.0 }
 0x637   : > { %v3481_v9 = vadd.f32 %v7907_v61, %v3444_v54  ;;  %v3110_v40 = vpop.f32.mrb[88].mxu1  ;;  %v3151_v62 = vpop.f32.mrb[88].mxu0 }
 0x638   : > { %v3511_v47 = vmax.f32 %v3479_v29, 0.0  ;;  %v3381_v3 = vmul.f32 %v8959_v27, %v3110_v40  ;;  %v3383_v28 = vmul.f32 %v8927_v57, %v3151_v62  ;;  %v6170_v49 = vpop.f32.mrb[89].mxu1  ;;  %v6176_v38 = vpop.f32.mrb[89].mxu0  ;;  %v3416_v40 = vmul.f32 %v7810_v36, %v8963_v25  ;;  %v8970_v25 = vld [vmem:[#allocation48_spill] sm:$0xff] }
 0x639   : > { %v3513_v22 = vmax.f32 %v3481_v9, 0.0  ;;  %v3113_v4 = vpop.f32.mrb[90].mxu1  ;;  %v3154_v21 = vpop.f32.mrb[90].mxu0 }
 0x63a   : > { %v3535_v31 = vpack.c.bf16 %v3511_v47, %v3510_v44  ;;  %v3445_v50 = vadd.f32 %v3413_v13, %v3381_v3  ;;  %v3447_v54 = vadd.f32 %v3415_v63, %v3383_v28  ;;  %v3382_v16 = vmul.f32 %v8962_v0, %v3113_v4  ;;  %v6171_v53 = vpop.f32.mrb[91].mxu1  ;;  %v6177_v29 = vpop.f32.mrb[91].mxu0  ;;  %v8964_v63 = vld [vmem:[#allocation66_spill] sm:$0xff] }
 0x63b   : > { %v3536_v62 = vpack.c.bf16 %v3513_v22, %v3512_v48  ;;  %v3384_v49 = vmul.f32 %v8928_v1, %v3154_v21  ;;  %v8965_v44 = vld [vmem:[#allocation74_spill] sm:$0xff]  ;;  %v8967_v22 = vld [vmem:[#allocation47_spill] sm:$0xff] }
 0x63c   : > { %v3482_v38 = vadd.f32 %v7907_v61, %v3445_v50  ;;  %v3446_v15 = vadd.f32 %v3414_v34, %v3382_v16  ;;  %6229 = vmatmul.mubr.msk.bf16.gmra.mrb[112].mxu0 %vm599_vm0, %v3535_v31  ;;  %v3484_v60 = vadd.f32 %v7907_v61, %v3447_v54  ;;  %v3417_v47 = vmul.f32 %v8965_v44, %v8964_v63  ;;  %v8966_v3 = vld [vmem:[#allocation54_spill] sm:$0xff]  ;;  %v8968_v53 = vld [vmem:[#allocation67_spill] sm:$0xff] }
 0x63d   : > { %v3448_v9 = vadd.f32 %v3416_v40, %v3384_v49  ;;  %6232 = vmatprep.mubr.msk.bf16.mxu0 %vm599_vm0, %v3536_v62  ;;  %v3419_v36 = vmul.f32 %v7827_v39, %v8966_v3  ;;  %v8969_v29 = vld [vmem:[#allocation75_spill] sm:$0xff] }
 0x63e   : > { %v3483_v13 = vadd.f32 %v7907_v61, %v3446_v15  ;;  %v3514_v16 = vmax.f32 %v3482_v38, 0.0  ;;  %v3418_v40 = vmul.f32 %v8969_v29, %v8968_v53  ;;  %v3516_v62 = vmax.f32 %v3484_v60, 0.0  ;;  %v8981_v53 = vld [vmem:[#allocation52_spill] sm:$0xff] }
 0x63f   : > { %v3485_v28 = vadd.f32 %v7907_v61, %v3448_v9  ;;  %v3192_v48 = vpop.f32.mrb[92].mxu1  ;;  %v3233_v50 = vpop.f32.mrb[92].mxu0 }
 0x640   : > { %v3515_v34 = vmax.f32 %v3483_v13, 0.0  ;;  %v3385_v4 = vmul.f32 %v8967_v22, %v3192_v48  ;;  %v3387_v21 = vmul.f32 %v7041_v2, %v3233_v50  ;;  %v6182_v31 = vpop.f32.mrb[93].mxu1  ;;  %v6188_v54 = vpop.f32.mrb[93].mxu0  ;;  %v3420_v48 = vmul.f32 %v7836_v35, %v8971_v30  ;;  %v8976_v35 = vld [vmem:[#allocation79_spill] sm:$0xff] }
 0x641   : > { %v3517_v49 = vmax.f32 %v3485_v28, 0.0  ;;  %v3195_v15 = vpop.f32.mrb[94].mxu1  ;;  %v3236_v44 = vpop.f32.mrb[94].mxu0  ;;  %v8972_v31 = vld [vmem:[#allocation30_spill] sm:$0xff] }
 0x642   : > { %v3537_v39 = vpack.c.bf16 %v3515_v34, %v3514_v16  ;;  %v3449_v3 = vadd.f32 %v3417_v47, %v3385_v4  ;;  %v3451_v9 = vadd.f32 %v3419_v36, %v3387_v21  ;;  %v3386_v19 = vmul.f32 %v8970_v25, %v3195_v15  ;;  %v6183_v38 = vpop.f32.mrb[95].mxu1  ;;  %v6189_v13 = vpop.f32.mrb[95].mxu0  ;;  %v8973_v36 = vld [vmem:[#allocation68_spill] sm:$0xff]  ;;  %v8975_v4 = vld [vmem:[#allocation58_spill] sm:$0xff]  ;;  %v8977_v15 = vld [vmem:[#allocation51_spill] sm:$0xff] }
 0x643   : > { %v3538_v50 = vpack.c.bf16 %v3517_v49, %v3516_v62  ;;  %v3388_v54 = vmul.f32 %v8972_v31, %v3236_v44  ;;  %v8974_v16 = vld [vmem:[#allocation76_spill] sm:$0xff]  ;;  %v3423_v21 = vmul.f32 %v8976_v35, %v8975_v4 }
 0x644   : > { %v3486_v12 = vadd.f32 %v7907_v61, %v3449_v3  ;;  %v3450_v29 = vadd.f32 %v3418_v40, %v3386_v19  ;;  %6233 = vmatmul.mubr.msk.bf16.gmra.mrb[116].mxu0 %vm599_vm0, %v3537_v39  ;;  %v3488_v60 = vadd.f32 %v7907_v61, %v3451_v9  ;;  %v3421_v34 = vmul.f32 %v8974_v16, %v8973_v36  ;;  %v8978_v39 = vld [vmem:[#allocation31_spill] sm:$0xff] }
 0x645   : > { %v3452_v28 = vadd.f32 %v3420_v48, %v3388_v54  ;;  %6236 = vmatprep.mubr.msk.bf16.mxu0 %vm599_vm0, %v3538_v50  ;;  %v8979_v48 = vld [vmem:[#allocation69_spill] sm:$0xff] }
 0x646   : > { %v3487_v47 = vadd.f32 %v7907_v61, %v3450_v29  ;;  %v3518_v19 = vmax.f32 %v3486_v12, 0.0  ;;  %v8980_v50 = vld [vmem:[#allocation77_spill] sm:$0xff]  ;;  %v3520_v29 = vmax.f32 %v3488_v60, 0.0 }
 0x647   : > { %v3489_v62 = vadd.f32 %v7907_v61, %v3452_v28  ;;  %v3274_v49 = vpop.f32.mrb[96].mxu1  ;;  %v3315_v3 = vpop.f32.mrb[96].mxu0  ;;  %v3422_v54 = vmul.f32 %v8980_v50, %v8979_v48 }
 0x648   : > { %v3519_v40 = vmax.f32 %v3487_v47, 0.0  ;;  %v3389_v44 = vmul.f32 %v8977_v15, %v3274_v49  ;;  %v3391_v9 = vmul.f32 %v8978_v39, %v3315_v3  ;;  %v6194_v38 = vpop.f32.mrb[97].mxu1  ;;  %v6200_v13 = vpop.f32.mrb[97].mxu0  ;;  %v8983_v49 = vld [vmem:[#allocation81_spill] sm:$0xff] }
 0x649   : > { %v3521_v16 = vmax.f32 %v3489_v62, 0.0  ;;  %v3277_v30 = vpop.f32.mrb[98].mxu1  ;;  %v3318_v36 = vpop.f32.mrb[98].mxu0  ;;  %v3424_v58 = vmul.f32 %v8983_v49, %v8982_v59  ;;  %v8984_v38 = vld [vmem:[#allocation32_spill] sm:$0xff] }
 0x64a   : > { %v3539_v35 = vpack.c.bf16 %v3519_v40, %v3518_v19  ;;  %v3453_v4 = vadd.f32 %v3421_v34, %v3389_v44  ;;  %v3455_v28 = vadd.f32 %v3423_v21, %v3391_v9  ;;  %v3390_v63 = vmul.f32 %v8981_v53, %v3277_v30  ;;  %v6195_v12 = vpop.f32.mrb[99].mxu1  ;;  %v6201_v47 = vpop.f32.mrb[99].mxu0  ;;  %v8985_v19 = vld [vmem:[#allocation70_spill] sm:$0xff] }
 0x64b   : > { %v3540_v3 = vpack.c.bf16 %v3521_v16, %v3520_v29  ;;  %v3392_v13 = vmul.f32 %v8984_v38, %v3318_v36  ;;  %v8986_v40 = vld [vmem:[#allocation78_spill] sm:$0xff]  ;;  %v8987_v29 = vld [vmem:[#allocation55_spill] sm:$0xff] }
 0x64c   : > { %v3490_v7 = vadd.f32 %v7907_v61, %v3453_v4  ;;  %v3454_v50 = vadd.f32 %v3422_v54, %v3390_v63  ;;  %6237 = vmatmul.mubr.msk.bf16.gmra.mrb[120].mxu0 %vm599_vm0, %v3539_v35  ;;  %v3492_v60 = vadd.f32 %v7907_v61, %v3455_v28  ;;  %v3425_v44 = vmul.f32 %v8986_v40, %v8985_v19  ;;  %v8988_v28 = vld [vmem:[#allocation71_spill] sm:$0xff] }
 0x64d   : > { %v3456_v62 = vadd.f32 %v3424_v58, %v3392_v13  ;;  %6240 = vmatprep.mubr.msk.bf16.mxu0 %vm599_vm0, %v3540_v3  ;;  %v8989_v58 = vld [vmem:[#allocation80_spill] sm:$0xff] }
 0x64e   : > { %v3491_v30 = vadd.f32 %v7907_v61, %v3454_v50  ;;  %v3522_v9 = vmax.f32 %v3490_v7, 0.0  ;;  %v3524_v54 = vmax.f32 %v3492_v60, 0.0  ;;  %v3426_v12 = vmul.f32 %v8989_v58, %v8988_v28  ;;  %v8990_v3 = vld [vmem:[#allocation56_spill] sm:$0xff] }
 0x64f   : > { %v3493_v34 = vadd.f32 %v7907_v61, %v3456_v62  ;;  %v3356_v21 = vpop.f32.mrb[100].mxu1 }
 0x650   : > { %v3523_v36 = vmax.f32 %v3491_v30, 0.0  ;;  %v3393_v4 = vmul.f32 %v8987_v29, %v3356_v21  ;;  %v6206_v63 = vpop.f32.mrb[101].mxu1  ;;  %v8991_v21 = vmov 0.0  }
 0x651   : > { %v3525_v16 = vmax.f32 %v3493_v34, 0.0  ;;  %v3359_v35 = vpop.f32.mrb[102].mxu1  ;;  %v8992_v63 = vld [vmem:[#allocation20_spill] sm:$0xff] }
 0x652   : > { %v3541_v47 = vpack.c.bf16 %v3523_v36, %v3522_v9  ;;  %v3457_v49 = vadd.f32 %v3425_v44, %v3393_v4  ;;  %v3394_v13 = vmul.f32 %v8990_v3, %v3359_v35  ;;  %v6207_v50 = vpop.f32.mrb[103].mxu1 }
 0x653   : > { %v3542_v62 = vpack.c.bf16 %v3525_v16, %v3524_v54 }
 0x654   : > { %v3494_v59 = vadd.f32 %v7907_v61, %v3457_v49  ;;  %v3458_v40 = vadd.f32 %v3426_v12, %v3394_v13  ;;  %6241 = vmatmul.mubr.msk.bf16.gmra.mrb[124].mxu0 %vm599_vm0, %v3541_v47 }
 0x655   : > { %6244 = vmatprep.mubr.msk.bf16.mxu0 %vm599_vm0, %v3542_v62 }
 0x656   : > { %v3495_v7 = vadd.f32 %v7907_v61, %v3458_v40  ;;  %v3526_v60 = vmax.f32 %v3494_v59, 0.0  ;;  %v8993_v40 = vld [vmem:[#allocation4_spill] sm:$0xff] }
 0x658   : > { %v3527_v30 = vmax.f32 %v3495_v7, 0.0 }
 0x65a   : > { %v3543_v34 = vpack.c.bf16 %v3527_v30, %v3526_v60 }
 0x65c   : > { %6245 = vmatmul.mubr.msk.bf16.gmra.mrb[128].mxu0 %vm599_vm0, %v3543_v34 }
 0x65d   : > { %6304 = vmatprep.mubr.msk.bf16.mxu0 %vm6597_vm1, %v8991_v21 }
 0x6f7   : > { %v8052_v44 = vpop.f32.mrb[100].mxu0 }
 0x6f8   : > { %v8054_v9 = vpop.f32.mrb[101].mxu0  ;;  %v3787_v4 = vmul.f32 %v7099_v17, %v8052_v44 }
 0x6f9   : > { %v8056_v36 = vpop.f32.mrb[102].mxu0  ;;  %v3785_v54 = vmul.f32 %v8992_v63, %v8054_v9 }
 0x6fa   : > { %v3788_v61 = vmul.f32 %v7103_v18, %v8056_v36  ;;  %v8062_v59 = vpop.f32.mrb[103].mxu0 }
 0x6fb   : > { %v3786_v16 = vmul.f32 %v6912_v46, %v8062_v59 }
 0x6fc   : > { %v3818_v35 = vpack.c.bf16 %v3788_v61, %v3787_v4 }
 0x6fd   : > { %v3817_v58 = vpack.c.bf16 %v3786_v16, %v3785_v54 }
 0x6ff   : > { %v8068_v12 = vpop.f32.mrb[104].mxu0  ;;  %6249 = vmatpush3.bf16.msra.mxu1 %v3817_v58 }
 0x700   : > { %v8070_v47 = vpop.f32.mrb[105].mxu0  ;;  %6254 = vmatprep.subr.bf16.mxu1 %v8991_v21  ;;  %v3791_v13 = vmul.f32 %v7119_v26, %v8068_v12 }
 0x701   : > { %v8073_v49 = vpop.f32.mrb[106].mxu0  ;;  %v3789_v7 = vmul.f32 %v6930_v6, %v8070_v47 }
 0x702   : > { %v3792_v50 = vmul.f32 %v7123_v5, %v8073_v49  ;;  %v8079_v62 = vpop.f32.mrb[107].mxu0  ;;  %6251 = vmatmul.mubr.msk.bf16.vlgmr.msra.gmra.mrb[104].mxu1 %vm907_vm2, %v8993_v40  ;;  %v8994_v40 = vld [vmem:[#allocation5_spill] sm:$0xff] }
 0x703   : > { %v3790_v60 = vmul.f32 %v6934_v10, %v8079_v62  ;;  %6255 = vmatpush3.bf16.msra.mxu1 %v3818_v35  ;;  %6256 = vmatprep.mubr.msk.bf16.mxu1 %vm6597_vm1, %v8991_v21 }
 0x704   : > { %v3820_v30 = vpack.c.bf16 %v3792_v50, %v3791_v13  ;;  %6260 = vmatprep.subr.bf16.mxu1 %v8991_v21 }
 0x705   : > { %v3819_v34 = vpack.c.bf16 %v3790_v60, %v3789_v7 }
 0x707   : > { %v8090_v4 = vpop.f32.mrb[108].mxu0 }
 0x708   : > { %v8092_v61 = vpop.f32.mrb[109].mxu0  ;;  %v3795_v16 = vmul.f32 %v7160_v14, %v8090_v4 }
 0x709   : > { %v8094_v54 = vpop.f32.mrb[110].mxu0  ;;  %v3793_v13 = vmul.f32 %v8909_v23, %v8092_v61 }
 0x70a   : > { %v3796_v58 = vmul.f32 %v7164_v41, %v8094_v54  ;;  %v8100_v35 = vpop.f32.mrb[111].mxu0  ;;  %6257 = vmatmul.mubr.msk.bf16.vlgmr.msra.gmra.mrb[108].mxu1 %vm907_vm2, %v8994_v40 }
 0x70b   : > { %v3794_v50 = vmul.f32 %v8910_v33, %v8100_v35  ;;  %6261 = vmatpush3.bf16.msra.mxu1 %v3819_v34  ;;  %6262 = vmatprep.mubr.msk.bf16.mxu1 %vm6597_vm1, %v8991_v21 }
 0x70c   : > { %v3822_v7 = vpack.c.bf16 %v3796_v58, %v3795_v16  ;;  %6266 = vmatprep.subr.bf16.mxu1 %v8991_v21  ;;  %v8999_v16 = vld [vmem:[#allocation6_spill] sm:$0xff] }
 0x70d   : > { %v3821_v60 = vpack.c.bf16 %v3794_v50, %v3793_v13 }
 0x70f   : > { %v8111_v28 = vpop.f32.mrb[112].mxu0 }
 0x710   : > { %8995 = vst [vmem:[#allocation34_spill] sm:$0xff] %v8111_v28  ;;  %v8113_v19 = vpop.f32.mrb[113].mxu0  ;;  %v8119_v40 = vmul.f32 %v7194_v51, %v8111_v28 }
 0x711   : > { %8996 = vst [vmem:[#allocation37_spill] sm:$0xff] %v8113_v19  ;;  %v8115_v48 = vpop.f32.mrb[114].mxu0  ;;  %v3797_v58 = vmul.f32 %v8914_v42, %v8113_v19 }
 0x712   : > { %8997 = vst [vmem:[#allocation21_spill] sm:$0xff] %v8115_v48  ;;  %v8123_v34 = vmul.f32 %v8952_v43, %v8115_v48  ;;  %v8125_v41 = vpop.f32.mrb[115].mxu0  ;;  %6263 = vmatmul.mubr.msk.bf16.vlgmr.msra.gmra.mrb[112].mxu1 %vm907_vm2, %v8999_v16 }
 0x713   : > { %8998 = vst [vmem:[#allocation73_spill] sm:$0xff] %v8125_v41  ;;  %v3798_v13 = vmul.f32 %v8915_v11, %v8125_v41  ;;  %6267 = vmatpush3.bf16.msra.mxu1 %v3820_v30  ;;  %6268 = vmatprep.mubr.msk.bf16.mxu1 %vm6597_vm1, %v8991_v21  ;;  %v9002_v41 = vld [vmem:[#allocation7_spill] sm:$0xff] }
 0x714   : > { %6272 = vmatprep.subr.bf16.mxu1 %v8991_v21 }
 0x715   : > { %v3823_v43 = vpack.c.bf16 %v3798_v13, %v3797_v58 }
 0x717   : > { %v8138_v48 = vpop.f32.mrb[116].mxu0 }
 0x718   : > { %v8140_v51 = vpop.f32.mrb[117].mxu0  ;;  %v3803_v28 = vmul.f32 %v8959_v27, %v8138_v48 }
 0x719   : > { %9000 = vst [vmem:[#allocation22_spill] sm:$0xff] %v8140_v51  ;;  %v8142_v16 = vpop.f32.mrb[118].mxu0  ;;  %v8154_v58 = vmul.f32 %v8921_v52, %v8140_v51 }
 0x71a   : > { %v3804_v30 = vmul.f32 %v8962_v0, %v8142_v16  ;;  %v8148_v11 = vpop.f32.mrb[119].mxu0  ;;  %6269 = vmatmul.mubr.msk.bf16.vlgmr.msra.gmra.mrb[116].mxu1 %vm907_vm2, %v9002_v41 }
 0x71b   : > { %9001 = vst [vmem:[#allocation43_spill] sm:$0xff] %v8148_v11  ;;  %v8158_v13 = vmul.f32 %v8955_v24, %v8148_v11  ;;  %6273 = vmatpush3.bf16.msra.mxu1 %v3821_v60  ;;  %6274 = vmatprep.mubr.msk.bf16.mxu1 %vm6597_vm1, %v8991_v21  ;;  %v9004_v24 = vld [vmem:[#allocation13_spill] sm:$0xff] }
 0x71c   : > { %v3826_v50 = vpack.c.bf16 %v3804_v30, %v3803_v28  ;;  %6278 = vmatprep.subr.bf16.mxu1 %v8991_v21 }
 0x71d   : > { %v3825_v42 = vpack.c.bf16 %v8158_v13, %v8154_v58 }
 0x71e   : > { %6303 = vmatpush3.bf16.msra.mxu0 %v3826_v50  ;;  %v9006_v50 = vld [vmem:[#allocation8_spill] sm:$0xff] }
 0x71f   : > { %v8165_v41 = vpop.f32.mrb[120].mxu0  ;;  %6314 = vmatprep.subr.bf16.mxu0 %v8991_v21 }
 0x720   : > { %v8168_v52 = vpop.f32.mrb[121].mxu0  ;;  %v3807_v28 = vmul.f32 %v8967_v22, %v8165_v41 }
 0x721   : > { %9003 = vst [vmem:[#allocation72_spill] sm:$0xff] %v8168_v52  ;;  %v8170_v51 = vpop.f32.mrb[122].mxu0  ;;  %6305 = vmatmul.mubr.msk.bf16.vlgmr.msra.gmra.mrb[132].mxu0 %vm907_vm2, %v9004_v24  ;;  %v3805_v58 = vmul.f32 %v8927_v57, %v8168_v52  ;;  %v9007_v57 = vld [vmem:[#allocation15_spill] sm:$0xff] }
 0x722   : > { %v3808_v60 = vmul.f32 %v8970_v25, %v8170_v51  ;;  %v8178_v30 = vpop.f32.mrb[123].mxu0  ;;  %6275 = vmatmul.mubr.msk.bf16.vlgmr.msra.gmra.mrb[120].mxu1 %vm907_vm2, %v9006_v50  ;;  %6316 = vmatprep.mubr.msk.bf16.mxu0 %vm6597_vm1, %v8991_v21 }
 0x723   : > { %9005 = vst [vmem:[#allocation44_spill] sm:$0xff] %v8178_v30  ;;  %v3806_v24 = vmul.f32 %v8928_v1, %v8178_v30  ;;  %6279 = vmatpush3.bf16.msra.mxu1 %v3822_v7  ;;  %6280 = vmatprep.mubr.msk.bf16.mxu1 %vm6597_vm1, %v8991_v21 }
 0x724   : > { %v3828_v13 = vpack.c.bf16 %v3808_v60, %v3807_v28  ;;  %6284 = vmatprep.subr.bf16.mxu1 %v8991_v21 }
 0x725   : > { %v3827_v11 = vpack.c.bf16 %v3806_v24, %v3805_v58  ;;  %v9009_v58 = vld [vmem:[#allocation9_spill] sm:$0xff] }
 0x726   : > { %6315 = vmatpush3.bf16.msra.mxu0 %v3828_v13 }
 0x727   : > { %v8191_v19 = vpop.f32.mrb[124].mxu0  ;;  %6326 = vmatprep.subr.bf16.mxu0 %v8991_v21 }
 0x728   : > { %v8194_v50 = vpop.f32.mrb[125].mxu0  ;;  %v3811_v7 = vmul.f32 %v8977_v15, %v8191_v19 }
 0x729   : > { %v8196_v25 = vpop.f32.mrb[126].mxu0  ;;  %6317 = vmatmul.mubr.msk.bf16.vlgmr.msra.gmra.mrb[136].mxu0 %vm907_vm2, %v9007_v57  ;;  %v3809_v24 = vmul.f32 %v7041_v2, %v8194_v50  ;;  %v9010_v2 = vld [vmem:[#allocation17_spill] sm:$0xff] }
 0x72a   : > { %v3812_v28 = vmul.f32 %v8981_v53, %v8196_v25  ;;  %v8204_v60 = vpop.f32.mrb[127].mxu0  ;;  %6281 = vmatmul.mubr.msk.bf16.vlgmr.msra.gmra.mrb[124].mxu1 %vm907_vm2, %v9009_v58  ;;  %6328 = vmatprep.mubr.msk.bf16.mxu0 %vm6597_vm1, %v8991_v21 }
 0x72b   : > { %9008 = vst [vmem:[#allocation74_spill] sm:$0xff] %v8204_v60  ;;  %v3810_v57 = vmul.f32 %v8972_v31, %v8204_v60  ;;  %6285 = vmatpush3.bf16.msra.mxu1 %v3823_v43  ;;  %6286 = vmatprep.mubr.msk.bf16.mxu1 %vm6597_vm1, %v8991_v21  ;;  %v9013_v60 = vld [vmem:[#allocation19_spill] sm:$0xff] }
 0x72c   : > { %v3830_v13 = vpack.c.bf16 %v3812_v28, %v3811_v7  ;;  %6290 = vmatprep.subr.bf16.mxu1 %v8991_v21 }
 0x72d   : > { %v3829_v1 = vpack.c.bf16 %v3810_v57, %v3809_v24  ;;  %v9011_v24 = vld [vmem:[#allocation10_spill] sm:$0xff] }
 0x72e   : > { %6327 = vmatpush3.bf16.msra.mxu0 %v3830_v13  ;;  %v9012_v13 = vpack.c.bf16 %v8123_v34, %v8119_v40  ;;  %v9015_v40 = vld [vmem:[#allocation12_spill] sm:$0xff]  ;;  %v6472_v34 = vld [vmem:[%s8600_s3 + $0xb0] sm:$0xff]  }
 0x72f   : > { %v8217_v30 = vpop.f32.mrb[128].mxu0  ;;  %6338 = vmatprep.subr.bf16.mxu0 %v8991_v21 }
 0x730   : > { %v8220_v58 = vpop.f32.mrb[129].mxu0  ;;  %v3815_v43 = vmul.f32 %v8987_v29, %v8217_v30 }
 0x731   : > { %v8222_v52 = vpop.f32.mrb[130].mxu0  ;;  %6329 = vmatmul.mubr.msk.bf16.vlgmr.msra.gmra.mrb[140].mxu0 %vm907_vm2, %v9010_v2  ;;  %v3813_v57 = vmul.f32 %v8978_v39, %v8220_v58  ;;  %v9014_v39 = vld [vmem:[#allocation11_spill] sm:$0xff] }
 0x732   : > { %v3816_v7 = vmul.f32 %v8990_v3, %v8222_v52  ;;  %v8230_v28 = vpop.f32.mrb[131].mxu0  ;;  %6287 = vmatmul.mubr.msk.bf16.vlgmr.msra.gmra.mrb[128].mxu1 %vm907_vm2, %v9011_v24  ;;  %6340 = vmatprep.mubr.msk.bf16.mxu0 %vm6597_vm1, %v8991_v21 }
 0x733   : > { %v3814_v2 = vmul.f32 %v8984_v38, %v8230_v28  ;;  %6291 = vmatpush3.bf16.msra.mxu1 %v9012_v13  ;;  %6292 = vmatprep.mubr.msk.bf16.mxu1 %vm6597_vm1, %v8991_v21 }
 0x734   : > { %v3832_v31 = vpack.c.bf16 %v3816_v7, %v3815_v43  ;;  %6296 = vmatprep.subr.bf16.mxu1 %v8991_v21  ;;  %v9019_v7 = vld [vmem:[#allocation33_spill] sm:$0xff] }
 0x735   : > { %v3831_v24 = vpack.c.bf16 %v3814_v2, %v3813_v57  ;;  %v4521_v57 = vmul.f32 %v8054_v9, %v9019_v7 }
 0x736   : > { %6339 = vmatpush3.bf16.msra.mxu0 %v3832_v31  ;;  %v9016_v31 = vld [vmem:[#allocation14_spill] sm:$0xff] }
 0x737   : > { %6352 = vmatprep.subr.bf16.mxu0 %v8991_v21 }
 0x739   : > { %6341 = vmatmul.mubr.msk.bf16.vlgmr.msra.gmra.mrb[144].mxu0 %vm907_vm2, %v9013_v60  ;;  %v6473_v60 = vld [vmem:[%s8600_s3 + $0xb8] sm:$0xff]  }
 0x73a   : > { %6293 = vmatmul.mubr.msk.bf16.vlgmr.msra.gmra.mrb[132].mxu1 %vm907_vm2, %v9014_v39  ;;  %6360 = vmatprep.mubr.msk.bf16.mxu0 %vm6597_vm1, %v8991_v21  ;;  %v6471_v39 = vld [vmem:[%s8600_s3 + $0xa8] sm:$0xff]  }
 0x73b   : > { %6297 = vmatpush3.bf16.msra.mxu1 %v3825_v42  ;;  %6298 = vmatprep.mubr.msk.bf16.mxu1 %vm6597_vm1, %v8991_v21  ;;  %v9017_v42 = vld [vmem:[#allocation16_spill] sm:$0xff] }
 0x73c   : > { %6308 = vmatprep.subr.bf16.mxu1 %v8991_v21  ;;  %6353 = vmatpush3.bf16.msra.mxu0 %v6472_v34 }
 0x73d   : > { %6354 = vmatprep.subr.bf16.mxu0 %v8991_v21 }
 0x740   : > { %6355 = vmatpush3.bf16.msra.mxu0 %v6473_v60 }
 0x741   : > { %6356 = vmatprep.subr.bf16.mxu0 %v8991_v21 }
 0x742   : > { %6299 = vmatmul.mubr.msk.bf16.vlgmr.msra.gmra.mrb[136].mxu1 %vm907_vm2, %v9015_v40 }
 0x743   : > { %6309 = vmatpush3.bf16.msra.mxu1 %v3827_v11  ;;  %6310 = vmatprep.mubr.msk.bf16.mxu1 %vm6597_vm1, %v8991_v21  ;;  %v9018_v11 = vld [vmem:[#allocation18_spill] sm:$0xff] }
 0x744   : > { %6320 = vmatprep.subr.bf16.mxu1 %v8991_v21 }
 0x74a   : > { %6311 = vmatmul.mubr.msk.bf16.vlgmr.msra.gmra.mrb[140].mxu1 %vm907_vm2, %v9016_v31  ;;  %v4522_v31 = vmul.f32 %v8062_v59, %v8943_v20  ;;  %v4524_v20 = vmul.f32 %v8056_v36, %v7461_v56  ;;  %v9021_v56 = vld [vmem:[#allocation35_spill] sm:$0xff] }
 0x74b   : > { %6321 = vmatpush3.bf16.msra.mxu1 %v3829_v1  ;;  %6322 = vmatprep.mubr.msk.bf16.mxu1 %vm6597_vm1, %v8991_v21  ;;  %v6470_v1 = vld [vmem:[%s8600_s3 + $0xa0] sm:$0xff]   ;;  %v4525_v36 = vmul.f32 %v8070_v47, %v9021_v56 }
 0x74c   : > { %6332 = vmatprep.subr.bf16.mxu1 %v8991_v21 }
 0x752   : > { %6323 = vmatmul.mubr.msk.bf16.vlgmr.msra.gmra.mrb[144].mxu1 %vm907_vm2, %v9017_v42 }
 0x753   : > { %6333 = vmatpush3.bf16.msra.mxu1 %v3831_v24  ;;  %6334 = vmatprep.mubr.msk.bf16.mxu1 %vm6597_vm1, %v8991_v21  ;;  %v8297_v24 = vld [vmem:[%s8601_s4 + $0x28] ss:$0 sm:$0xff] }
 0x754   : > { %6344 = vmatprep.subr.bf16.mxu1 %v8991_v21 }
 0x75a   : > { %6335 = vmatmul.mubr.msk.bf16.vlgmr.msra.gmra.mrb[148].mxu1 %vm907_vm2, %v9018_v11 }
 0x75b   : > { %6348 = vmatprep.mubr.msk.bf16.mxu1 %vm6597_vm1, %v8991_v21  ;;  %6345 = vmatpush3.bf16.msra.mxu1 %v6470_v1 }
 0x75c   : > { %6346 = vmatprep.subr.bf16.mxu1 %v8991_v21 }
 0x75f   : > { %6347 = vmatpush3.bf16.msra.mxu1 %v6471_v39 }
 0x760   : > { %6364 = vmatprep.subr.bf16.mxu1 %v8991_v21 }
 0x7d5   : > { %v3867_v43 = vpop.f32.mrb[104].mxu1 }
 0x7d6   : > { %v4489_v2 = vmul.f32 %v8992_v63, %v3867_v43  ;;  %v6252_v13 = vpop.f32.mrb[105].mxu1  ;;  %v9020_v43 = vld [vmem:[#allocation61_spill] sm:$0xff] }
 0x7d7   : > { %v3870_v40 = vpop.f32.mrb[106].mxu1  ;;  %v4523_v7 = vmul.f32 %v8052_v44, %v9020_v43 }
 0x7d8   : > { %v4553_v42 = vadd.f32 %v4521_v57, %v4489_v2  ;;  %v4490_v11 = vmul.f32 %v6912_v46, %v3870_v40  ;;  %v6253_v1 = vpop.f32.mrb[107].mxu1 }
 0x7da   : > { %v4590_v9 = vadd.f32 %v8297_v24, %v4553_v42  ;;  %v4554_v39 = vadd.f32 %v4522_v31, %v4490_v11 }
 0x7dc   : > { %v4622_v63 = vmax.f32 %v4590_v9, 0.0  ;;  %v4591_v34 = vadd.f32 %v8297_v24, %v4554_v39 }
 0x7dd   : > { %v3908_v60 = vpop.f32.mrb[108].mxu1 }
 0x7de   : > { %v4623_v13 = vmax.f32 %v4591_v34, 0.0  ;;  %v4491_v21 = vmul.f32 %v7099_v17, %v3908_v60  ;;  %v6258_v38 = vpop.f32.mrb[109].mxu1  ;;  %v4654_v46 = vsel %vm799_vm5, %v4622_v63, -inf }
 0x7df   : > { %v3911_v59 = vpop.f32.mrb[110].mxu1 }
 0x7e0   : > { %v4655_v57 = vsel %vm799_vm5, %v4623_v13, -inf  ;;  %v4555_v2 = vadd.f32 %v4523_v7, %v4491_v21  ;;  %v4492_v40 = vmul.f32 %v7103_v18, %v3911_v59  ;;  %v6259_v31 = vpop.f32.mrb[111].mxu1  ;;  %v4526_v18 = vmul.f32 %v8079_v62, %v8945_v8 }
 0x7e1   : > { %v4656_v42 = vmax.f32 %v4654_v46, %v4655_v57 }
 0x7e2   : > { %v4592_v11 = vadd.f32 %v8297_v24, %v4555_v2  ;;  %v4556_v44 = vadd.f32 %v4524_v20, %v4492_v40 }
 0x7e3   : > { %v4657_v1 = vrot.slane %v4656_v42, 4 }
 0x7e4   : > { %v4624_v9 = vmax.f32 %v4592_v11, 0.0  ;;  %v4593_v17 = vadd.f32 %v8297_v24, %v4556_v44  ;;  %v4527_v44 = vmul.f32 %v8068_v12, %v7473_v32  ;;  %v8334_v32 = vmul.f32 %v8090_v4, %v7494_v55  ;;  %v9024_v55 = vld [vmem:[#allocation64_spill] sm:$0xff] }
 0x7e5   : > { %v4658_v38 = vmax.f32 %v4656_v42, %v4657_v1  ;;  %v3949_v39 = vpop.f32.mrb[112].mxu1  ;;  %v4539_v4 = vmul.f32 %v8138_v48, %v9024_v55 }
 0x7e6   : > { %v4625_v63 = vmax.f32 %v4593_v17, 0.0  ;;  %v4493_v34 = vmul.f32 %v6930_v6, %v3949_v39  ;;  %v6264_v21 = vpop.f32.mrb[113].mxu1  ;;  %v4663_v7 = vsel %vm799_vm5, %v4624_v9, -inf }
 0x7e7   : > { %v4659_v60 = vrot.slane %v4658_v38, 2  ;;  %v3952_v43 = vpop.f32.mrb[114].mxu1 }
 0x7e8   : > { %v4664_v13 = vsel %vm799_vm5, %v4625_v63, -inf  ;;  %v4557_v20 = vadd.f32 %v4525_v36, %v4493_v34  ;;  %v4494_v59 = vmul.f32 %v6934_v10, %v3952_v43  ;;  %v6265_v46 = vpop.f32.mrb[115].mxu1 }
 0x7e9   : > { %v4660_v57 = vmax.f32 %v4658_v38, %v4659_v60  ;;  %v4665_v2 = vmax.f32 %v4663_v7, %v4664_v13  ;;  %v4528_v38 = vmul.f32 %v8073_v49, %v7477_v45  ;;  %v9022_v60 = vld [vmem:[#allocation39_spill] sm:$0xff]  ;;  %v8341_v13 = vmul.f32 %v8094_v54, %v7498_v37 }
 0x7ea   : > { %v4594_v47 = vadd.f32 %v8297_v24, %v4557_v20  ;;  %v4558_v40 = vadd.f32 %v4526_v18, %v4494_v59  ;;  %v4529_v43 = vmul.f32 %v8092_v61, %v9022_v60  ;;  %v9023_v20 = vld [vmem:[#allocation41_spill] sm:$0xff] }
 0x7eb   : > { %v4661_v6 = vrot.slane %v4660_v57, 1  ;;  %v4666_v31 = vrot.slane %v4665_v2, 4 }
 0x7ec   : > { %v4626_v42 = vmax.f32 %v4594_v47, 0.0  ;;  %v4595_v8 = vadd.f32 %v8297_v24, %v4558_v40 }
 0x7ed   : > { %v4667_v62 = vmax.f32 %v4665_v2, %v4666_v31  ;;  %v3990_v11 = vpop.f32.mrb[116].mxu1  ;;  %v4662_v1 = vmax.f32 %v4660_v57, %v4661_v6  ;;  %v9025_v57 = vld [vmem:[#allocation65_spill] sm:$0xff]  ;;  %v9026_v6 = vld [vmem:[#allocation66_spill] sm:$0xff] }
 0x7ee   : > { %v4627_v9 = vmax.f32 %v4595_v8, 0.0  ;;  %v4495_v10 = vmul.f32 %v7119_v26, %v3990_v11  ;;  %v6270_v17 = vpop.f32.mrb[117].mxu1  ;;  %v4672_v36 = vsel %vm799_vm5, %v4626_v42, -inf  ;;  %v4540_v2 = vmul.f32 %v8142_v16, %v9025_v57 }
 0x7ef   : > { %v4668_v39 = vrot.slane %v4667_v62, 2  ;;  %v3993_v56 = vpop.f32.mrb[118].mxu1  ;;  %v4798_v45 = vpack.c.bf16 %v4662_v1, %v4662_v1  ;;  %v4543_v31 = vmul.f32 %v8165_v41, %v9026_v6 }
 0x7f0   : > { %v4673_v63 = vsel %vm799_vm5, %v4627_v9, -inf  ;;  %v4559_v34 = vadd.f32 %v4527_v44, %v4495_v10  ;;  %v4496_v21 = vmul.f32 %v7123_v5, %v3993_v56  ;;  %v6271_v18 = vpop.f32.mrb[119].mxu1  ;;  %v4530_v5 = vmul.f32 %v8100_v35, %v9023_v20 }
 0x7f1   : > { %v4669_v12 = vmax.f32 %v4667_v62, %v4668_v39  ;;  %v4674_v26 = vmax.f32 %v4672_v36, %v4673_v63  ;;  %v4839_v62 = vunpack.c.l.b16 %v4798_v45 }
 0x7f2   : > { %v4596_v49 = vadd.f32 %v8297_v24, %v4559_v34  ;;  %v4560_v7 = vadd.f32 %v4528_v38, %v4496_v21 }
 0x7f3   : > { %v4670_v59 = vrot.slane %v4669_v12, 1  ;;  %v4675_v46 = vrot.slane %v4674_v26, 4 }
 0x7f4   : > { %v4628_v61 = vmax.f32 %v4596_v49, 0.0  ;;  %v4597_v47 = vadd.f32 %v8297_v24, %v4560_v7  ;;  %v4236_v40 = vpop.f32.mrb[132].mxu0 }
 0x7f5   : > { %v4671_v37 = vmax.f32 %v4669_v12, %v4670_v59  ;;  %v4676_v54 = vmax.f32 %v4674_v26, %v4675_v46  ;;  %v4507_v42 = vmul.f32 %v8959_v27, %v4236_v40  ;;  %v4031_v35 = vpop.f32.mrb[120].mxu1  ;;  %v6306_v8 = vpop.f32.mrb[133].mxu0  ;;  %v9027_v12 = vld [vmem:[#allocation67_spill] sm:$0xff] }
 0x7f6   : > { %v4629_v11 = vmax.f32 %v4597_v47, 0.0  ;;  %v4497_v48 = vmul.f32 %v8909_v23, %v4031_v35  ;;  %v6276_v44 = vpop.f32.mrb[121].mxu1  ;;  %v4239_v16 = vpop.f32.mrb[134].mxu0  ;;  %v4681_v39 = vsel %vm799_vm5, %v4628_v61, -inf  ;;  %v4544_v26 = vmul.f32 %v8170_v51, %v9027_v12 }
 0x7f7   : > { %v4799_v1 = vpack.c.bf16 %v4671_v37, %v4671_v37  ;;  %v4677_v9 = vrot.slane %v4676_v54, 2  ;;  %v4571_v10 = vadd.f32 %v4539_v4, %v4507_v42  ;;  %v4508_v17 = vmul.f32 %v8962_v0, %v4239_v16  ;;  %v4034_v38 = vpop.f32.mrb[122].mxu1  ;;  %v6307_v41 = vpop.f32.mrb[135].mxu0 }
 0x7f8   : > { %v4682_v27 = vsel %vm799_vm5, %v4629_v11, -inf  ;;  %v4561_v56 = vadd.f32 %v4529_v43, %v4497_v48  ;;  %v4498_v36 = vmul.f32 %v8910_v33, %v4034_v38  ;;  %v6277_v63 = vpop.f32.mrb[123].mxu1  ;;  %v9028_v11 = vld [vmem:[#allocation48_spill] sm:$0xff] }
 0x7f9   : > { %v4840_v34 = vunpack.c.l.b16 %v4799_v1  ;;  %v4678_v21 = vmax.f32 %v4676_v54, %v4677_v9  ;;  %v4683_v23 = vmax.f32 %v4681_v39, %v4682_v27  ;;  %v4608_v18 = vadd.f32 %v8297_v24, %v4571_v10  ;;  %v9029_v10 = vld [vmem:[#allocation36_spill] sm:$0xff] }
 0x7fa   : > { %v4598_v0 = vadd.f32 %v8297_v24, %v4561_v56  ;;  %v4572_v60 = vadd.f32 %v4540_v2, %v4508_v17  ;;  %v4562_v45 = vadd.f32 %v4530_v5, %v4498_v36 }
 0x7fb   : > { %v4856_v49 = vsel %vm4855_vm6, %v4840_v34, %v4839_v62  ;;  %v4679_v7 = vrot.slane %v4678_v21, 1  ;;  %v4684_v20 = vrot.slane %v4683_v23, 4  ;;  %v4640_v43 = vmax.f32 %v4608_v18, 0.0  ;;  %v9030_v34 = vld [vmem:[#allocation42_spill] sm:$0xff] }
 0x7fc   : > { %v4630_v33 = vmax.f32 %v4598_v0, 0.0  ;;  %v4609_v59 = vadd.f32 %v8297_v24, %v4572_v60  ;;  %v4599_v46 = vadd.f32 %v8297_v24, %v4562_v45  ;;  %v4318_v55 = vpop.f32.mrb[136].mxu0  ;;  %v9032_v0 = vld [vmem:[#allocation68_spill] sm:$0xff] }
 0x7fd   : > { %v4680_v4 = vmax.f32 %v4678_v21, %v4679_v7  ;;  %v4685_v57 = vmax.f32 %v4683_v23, %v4684_v20  ;;  %v4735_v51 = vsel %vm799_vm5, %v4640_v43, -inf  ;;  %v4511_v61 = vmul.f32 %v8967_v22, %v4318_v55  ;;  %v4072_v2 = vpop.f32.mrb[124].mxu1  ;;  %v6318_v5 = vpop.f32.mrb[137].mxu0  ;;  %v9031_v21 = vld [vmem:[#allocation37_spill] sm:$0xff] }
 0x7fe   : > { %v4690_v47 = vsel %vm799_vm5, %v4630_v33, -inf  ;;  %v4641_v40 = vmax.f32 %v4609_v59, 0.0  ;;  %v4631_v6 = vmax.f32 %v4599_v46, 0.0  ;;  %v4499_v37 = vmul.f32 %v7160_v14, %v4072_v2  ;;  %v6282_v54 = vpop.f32.mrb[125].mxu1  ;;  %v4321_v42 = vpop.f32.mrb[138].mxu0 }
 0x7ff   : > { %v4800_v35 = vpack.c.bf16 %v4680_v4, %v4680_v4  ;;  %v4686_v8 = vrot.slane %v4685_v57, 2  ;;  %v4575_v62 = vadd.f32 %v4543_v31, %v4511_v61  ;;  %v4512_v48 = vmul.f32 %v9028_v11, %v4321_v42  ;;  %v4075_v44 = vpop.f32.mrb[126].mxu1  ;;  %v6319_v16 = vpop.f32.mrb[139].mxu0  ;;  %v9033_v4 = vld [vmem:[#allocation69_spill] sm:$0xff]  ;;  %v9034_v42 = vld [vmem:[#allocation23_spill] sm:$0xff] }
 0x800   : > { %v4736_v1 = vsel %vm799_vm5, %v4641_v40, -inf  ;;  %v4691_v22 = vsel %vm799_vm5, %v4631_v6, -inf  ;;  %v4563_v9 = vadd.f32 %v8334_v32, %v4499_v37  ;;  %v4500_v17 = vmul.f32 %v9029_v10, %v4075_v44  ;;  %v6283_v38 = vpop.f32.mrb[127].mxu1 }
 0x801   : > { %v4841_v41 = vunpack.c.l.b16 %v4800_v35  ;;  %v4687_v14 = vmax.f32 %v4685_v57, %v4686_v8  ;;  %v8374_v39 = vmax.f32 %v4735_v51, %v4736_v1  ;;  %v4692_v27 = vmax.f32 %v4690_v47, %v4691_v22 }
 0x802   : > { %v4612_v31 = vadd.f32 %v8297_v24, %v4575_v62  ;;  %v4600_v56 = vadd.f32 %v8297_v24, %v4563_v9  ;;  %v4576_v36 = vadd.f32 %v4544_v26, %v4512_v48  ;;  %v4564_v63 = vadd.f32 %v8341_v13, %v4500_v17 }
 0x803   : > { %v4533_v23 = vmul.f32 %v9031_v21, %v9030_v34  ;;  %v4858_v32 = vsel %vm4857_vm7, %v4841_v41, %v4856_v49  ;;  %v4688_v18 = vrot.slane %v4687_v14, 1  ;;  %v4693_v12 = vrot.slane %v4692_v27, 4  ;;  %v9037_v34 = vld [vmem:[#allocation24_spill] sm:$0xff] }
 0x804   : > { %v4547_v60 = vmul.f32 %v8191_v19, %v9032_v0  ;;  %v4644_v45 = vmax.f32 %v4612_v31, 0.0  ;;  %v4613_v7 = vadd.f32 %v8297_v24, %v4576_v36  ;;  %v4601_v20 = vadd.f32 %v8297_v24, %v4564_v63  ;;  %v4400_v43 = vpop.f32.mrb[140].mxu0  ;;  %v9036_v31 = vld [vmem:[#allocation73_spill] sm:$0xff]  ;;  %v9039_v0 = vld [vmem:[#allocation34_spill] sm:$0xff] }
 0x805   : > { %v4689_v33 = vmax.f32 %v4687_v14, %v4688_v18  ;;  %v4694_v26 = vmax.f32 %v4692_v27, %v4693_v12  ;;  %v4632_v59 = vmax.f32 %v4600_v56, 0.0  ;;  %v4515_v13 = vmul.f32 %v8977_v15, %v4400_v43  ;;  %v4113_v46 = vpop.f32.mrb[128].mxu1  ;;  %v6330_v55 = vpop.f32.mrb[141].mxu0  ;;  %v9035_v27 = vld [vmem:[#allocation45_spill] sm:$0xff]  ;;  %v9040_v43 = vld [vmem:[#allocation70_spill] sm:$0xff] }
 0x806   : > { %v4548_v49 = vmul.f32 %v8196_v25, %v9033_v4  ;;  %v4645_v57 = vmax.f32 %v4613_v7, 0.0  ;;  %v4633_v51 = vmax.f32 %v4601_v20, 0.0  ;;  %v6288_v19 = vpop.f32.mrb[129].mxu1  ;;  %v4403_v61 = vpop.f32.mrb[142].mxu0  ;;  %v4753_v47 = vsel %vm799_vm5, %v4644_v45, -inf }
 0x807   : > { %v4801_v2 = vpack.c.bf16 %v4689_v33, %v4689_v33  ;;  %v4695_v5 = vrot.slane %v4694_v26, 2  ;;  %v4579_v40 = vadd.f32 %v4547_v60, %v4515_v13  ;;  %v4116_v6 = vpop.f32.mrb[130].mxu1  ;;  %v6331_v37 = vpop.f32.mrb[143].mxu0  ;;  %v4501_v35 = vmul.f32 %v9034_v42, %v4113_v46 }
 0x808   : > { %v4754_v54 = vsel %vm799_vm5, %v4645_v57, -inf  ;;  %v4700_v15 = vsel %vm799_vm5, %v4633_v51, -inf  ;;  %v4516_v25 = vmul.f32 %v8981_v53, %v4403_v61  ;;  %v6289_v8 = vpop.f32.mrb[131].mxu1  ;;  %v4699_v48 = vsel %vm799_vm5, %v4632_v59, -inf }
 0x809   : > { %v4842_v62 = vunpack.c.l.b16 %v4801_v2  ;;  %v4696_v11 = vmax.f32 %v4694_v26, %v4695_v5  ;;  %v8395_v44 = vmax.f32 %v4753_v47, %v4754_v54  ;;  %v4701_v16 = vmax.f32 %v4699_v48, %v4700_v15  ;;  %v9042_v54 = vld [vmem:[#allocation63_spill] sm:$0xff]  ;;  %v9043_v15 = vld [vmem:[#allocation21_spill] sm:$0xff] }
 0x80a   : > { %v4616_v1 = vadd.f32 %v8297_v24, %v4579_v40  ;;  %v4565_v22 = vadd.f32 %v4533_v23, %v4501_v35  ;;  %v4580_v9 = vadd.f32 %v4548_v49, %v4516_v25  ;;  %v4534_v56 = vmul.f32 %v9036_v31, %v9035_v27  ;;  %v9038_v23 = vld [vmem:[#allocation62_spill] sm:$0xff]  ;;  %v9044_v35 = vld [vmem:[#allocation71_spill] sm:$0xff] }
 0x80b   : > { %v4860_v10 = vsel %vm4859_vm8, %v4842_v62, %v4858_v32  ;;  %v4697_v17 = vrot.slane %v4696_v11, 1  ;;  %v4702_v38 = vrot.slane %v4701_v16, 4  ;;  %v4502_v21 = vmul.f32 %v9037_v34, %v4116_v6  ;;  %v9041_v6 = vld [vmem:[#allocation38_spill] sm:$0xff] }
 0x80c   : > { %v4648_v41 = vmax.f32 %v4616_v1, 0.0  ;;  %v4617_v14 = vadd.f32 %v8297_v24, %v4580_v9  ;;  %v4482_v53 = vpop.f32.mrb[144].mxu0  ;;  %v4602_v63 = vadd.f32 %v8297_v24, %v4565_v22  ;;  %v4535_v60 = vmul.f32 %v9039_v0, %v9038_v23  ;;  %v9045_v1 = vld [vmem:[#allocation46_spill] sm:$0xff]  ;;  %v9051_v23 = vld [vmem:[#allocation72_spill] sm:$0xff] }
 0x80d   : > { %v4698_v36 = vmax.f32 %v4696_v11, %v4697_v17  ;;  %v4154_v18 = vpop.f32.mrb[132].mxu1  ;;  %v6342_v12 = vpop.f32.mrb[145].mxu0  ;;  %v4703_v32 = vmax.f32 %v4701_v16, %v4702_v38  ;;  %v4551_v33 = vmul.f32 %v8217_v30, %v9040_v43  ;;  %v4566_v59 = vadd.f32 %v4534_v56, %v4502_v21  ;;  %v9046_v22 = vld [vmem:[#allocation22_spill] sm:$0xff]  ;;  %v9048_v56 = vld [vmem:[#allocation49_spill] sm:$0xff] }
 0x80e   : > { %v4649_v45 = vmax.f32 %v4617_v14, 0.0  ;;  %v6294_v7 = vpop.f32.mrb[133].mxu1  ;;  %v4485_v20 = vpop.f32.mrb[146].mxu0  ;;  %v4771_v4 = vsel %vm799_vm5, %v4648_v41, -inf  ;;  %v4519_v57 = vmul.f32 %v8987_v29, %v4482_v53  ;;  %v4738_v19 = vrot.slane %v8374_v39, 4  ;;  %v9047_v41 = vld [vmem:[#allocation40_spill] sm:$0xff] }
 0x80f   : > { %v4802_v26 = vpack.c.bf16 %v4698_v36, %v4698_v36  ;;  %v4157_v13 = vpop.f32.mrb[134].mxu1  ;;  %v6343_v46 = vpop.f32.mrb[147].mxu0  ;;  %v4704_v55 = vrot.slane %v4703_v32, 2  ;;  %v4634_v2 = vmax.f32 %v4602_v63, 0.0  ;;  %v4603_v47 = vadd.f32 %v8297_v24, %v4566_v59  ;;  %v9049_v36 = vld [vmem:[#allocation43_spill] sm:$0xff]  ;;  %v9050_v12 = vld [vmem:[#allocation50_spill] sm:$0xff] }
 0x810   : > { %v4772_v49 = vsel %vm799_vm5, %v4649_v45, -inf  ;;  %v6295_v51 = vpop.f32.mrb[135].mxu1  ;;  %v4583_v40 = vadd.f32 %v4551_v33, %v4519_v57  ;;  %v4503_v37 = vmul.f32 %v9041_v6, %v4154_v18  ;;  %v4536_v42 = vmul.f32 %v9043_v15, %v9042_v54  ;;  %v9052_v46 = vld [vmem:[#allocation25_spill] sm:$0xff] }
 0x811   : > { %v4843_v61 = vunpack.c.l.b16 %v4802_v26  ;;  %v8412_v5 = vmax.f32 %v4771_v4, %v4772_v49  ;;  %v4705_v30 = vmax.f32 %v4703_v32, %v4704_v55  ;;  %v4552_v25 = vmul.f32 %v8222_v52, %v9044_v35  ;;  %v9053_v51 = vld [vmem:[#allocation26_spill] sm:$0xff] }
 0x812   : > { %v4520_v8 = vmul.f32 %v8990_v3, %v4485_v20  ;;  %v4635_v11 = vmax.f32 %v4603_v47, 0.0  ;;  %v4620_v48 = vadd.f32 %v8297_v24, %v4583_v40  ;;  %v4567_v16 = vadd.f32 %v4535_v60, %v4503_v37 }
 0x813   : > { %v4862_v29 = vsel %vm4861_vm9, %v4843_v61, %v4860_v10  ;;  %v4706_v62 = vrot.slane %v4705_v30, 1  ;;  %v4537_v9 = vmul.f32 %v9046_v22, %v9045_v1  ;;  %v4739_v17 = vmax.f32 %v8374_v39, %v4738_v19  ;;  %v9055_v22 = vld [vmem:[#allocation53_spill] sm:$0xff] }
 0x814   : > { %v4584_v38 = vadd.f32 %v4552_v25, %v4520_v8  ;;  %v4504_v14 = vmul.f32 %v9047_v41, %v4157_v13  ;;  %v4708_v52 = vsel %vm799_vm5, %v4634_v2, -inf  ;;  %v4709_v10 = vsel %vm799_vm5, %v4635_v11, -inf  ;;  %v9054_v8 = vld [vmem:[#allocation27_spill] sm:$0xff]  ;;  %v9057_v41 = vld [vmem:[#allocation28_spill] sm:$0xff] }
 0x815   : > { %v4195_v53 = vpop.f32.mrb[136].mxu1  ;;  %v4707_v27 = vmax.f32 %v4705_v30, %v4706_v62  ;;  %v4604_v3 = vadd.f32 %v8297_v24, %v4567_v16  ;;  %v4538_v63 = vmul.f32 %v9049_v36, %v9048_v56  ;;  %v4710_v34 = vmax.f32 %v4708_v52, %v4709_v10 }
 0x816   : > { %v6300_v31 = vpop.f32.mrb[137].mxu1  ;;  %v4652_v21 = vmax.f32 %v4620_v48, 0.0  ;;  %v4621_v18 = vadd.f32 %v8297_v24, %v4584_v38  ;;  %v4541_v0 = vmul.f32 %v9051_v23, %v9050_v12  ;;  %v4568_v32 = vadd.f32 %v4536_v42, %v4504_v14  ;;  %v9058_v12 = vld [vmem:[#allocation54_spill] sm:$0xff] }
 0x817   : > { %v4198_v39 = vpop.f32.mrb[138].mxu1  ;;  %v4803_v60 = vpack.c.bf16 %v4707_v27, %v4707_v27  ;;  %v4740_v7 = vrot.slane %v4739_v17, 2  ;;  %v4756_v20 = vrot.slane %v8395_v44, 4  ;;  %v4711_v43 = vrot.slane %v4710_v34, 4 }
 0x818   : > { %v6301_v45 = vpop.f32.mrb[139].mxu1  ;;  %v4653_v33 = vmax.f32 %v4621_v18, 0.0  ;;  %v4636_v59 = vmax.f32 %v4604_v3, 0.0  ;;  %v4605_v13 = vadd.f32 %v8297_v24, %v4568_v32  ;;  %v4505_v55 = vmul.f32 %v9052_v46, %v4195_v53 }
 0x819   : > { %v4844_v26 = vunpack.c.l.b16 %v4803_v60  ;;  %v4712_v4 = vmax.f32 %v4710_v34, %v4711_v43  ;;  %v4789_v49 = vsel %vm799_vm5, %v4652_v21, -inf  ;;  %v4506_v19 = vmul.f32 %v9053_v51, %v4198_v39  ;;  %v9059_v45 = vld [vmem:[#allocation57_spill] sm:$0xff] }
 0x81a   : > { %v4790_v57 = vsel %vm799_vm5, %v4653_v33, -inf  ;;  %v4637_v2 = vmax.f32 %v4605_v13, 0.0  ;;  %v4569_v30 = vadd.f32 %v4537_v9, %v4505_v55  ;;  %v4741_v40 = vmax.f32 %v4739_v17, %v4740_v7  ;;  %v9056_v9 = vld [vmem:[#allocation44_spill] sm:$0xff]  ;;  %v9060_v7 = vld [vmem:[#allocation74_spill] sm:$0xff]  ;;  %v9061_v51 = vld [vmem:[#allocation29_spill] sm:$0xff] }
 0x81b   : > { %v8441_v61 = vmax.f32 %v4789_v49, %v4790_v57  ;;  %v4864_v47 = vsel %vm4863_vm10, %v4844_v26, %v4862_v29  ;;  %v4757_v6 = vmax.f32 %v8395_v44, %v4756_v20  ;;  %v4713_v37 = vrot.slane %v4712_v4, 2 }
 0x81c   : > { %v4570_v54 = vadd.f32 %v4538_v63, %v4506_v19  ;;  %v4717_v42 = vsel %vm799_vm5, %v4636_v59, -inf  ;;  %v4718_v35 = vsel %vm799_vm5, %v4637_v2, -inf  ;;  %v4606_v25 = vadd.f32 %v8297_v24, %v4569_v30 }
 0x81d   : > { %v4277_v15 = vpop.f32.mrb[140].mxu1  ;;  %v4714_v48 = vmax.f32 %v4712_v4, %v4713_v37  ;;  %v4719_v16 = vmax.f32 %v4717_v42, %v4718_v35  ;;  %v4542_v44 = vmul.f32 %v9056_v9, %v9055_v22  ;;  %v4742_v27 = vrot.slane %v4741_v40, 1 }
 0x81e   : > { %v4509_v62 = vmul.f32 %v9054_v8, %v4277_v15  ;;  %v6312_v11 = vpop.f32.mrb[141].mxu1  ;;  %v4607_v1 = vadd.f32 %v8297_v24, %v4570_v54  ;;  %v4638_v17 = vmax.f32 %v4606_v25, 0.0  ;;  %v4758_v31 = vrot.slane %v4757_v6, 2  ;;  %v9062_v15 = vld [vmem:[#allocation30_spill] sm:$0xff] }
 0x81f   : > { %v4280_v29 = vpop.f32.mrb[142].mxu1  ;;  %v4715_v52 = vrot.slane %v4714_v48, 1  ;;  %v4720_v10 = vrot.slane %v4719_v16, 4  ;;  %v4774_v56 = vrot.slane %v8412_v5, 4  ;;  %v4545_v23 = vmul.f32 %v8194_v50, %v9058_v12  ;;  %v9064_v11 = vld [vmem:[#allocation59_spill] sm:$0xff] }
 0x820   : > { %v4573_v38 = vadd.f32 %v4541_v0, %v4509_v62  ;;  %v4510_v14 = vmul.f32 %v9057_v41, %v4280_v29  ;;  %v6313_v53 = vpop.f32.mrb[143].mxu1  ;;  %v4639_v3 = vmax.f32 %v4607_v1, 0.0  ;;  %v4726_v18 = vsel %vm799_vm5, %v4638_v17, -inf  ;;  %v9063_v62 = vld [vmem:[#allocation58_spill] sm:$0xff] }
 0x821   : > { %v4716_v34 = vmax.f32 %v4714_v48, %v4715_v52  ;;  %v4721_v21 = vmax.f32 %v4719_v16, %v4720_v10  ;;  %v4546_v20 = vmul.f32 %v9060_v7, %v9059_v45  ;;  %v4743_v59 = vmax.f32 %v4741_v40, %v4742_v27 }
 0x822   : > { %v4610_v36 = vadd.f32 %v8297_v24, %v4573_v38  ;;  %v4574_v63 = vadd.f32 %v4542_v44, %v4510_v14  ;;  %v4727_v39 = vsel %vm799_vm5, %v4639_v3, -inf  ;;  %v4759_v13 = vmax.f32 %v4757_v6, %v4758_v31  ;;  %v9065_v3 = vld [vmem:[#allocation31_spill] sm:$0xff] }
 0x823   : > { %v4728_v0 = vmax.f32 %v4726_v18, %v4727_v39  ;;  %v4804_v43 = vpack.c.bf16 %v4716_v34, %v4716_v34  ;;  %v4722_v33 = vrot.slane %v4721_v21, 2  ;;  %v4775_v49 = vmax.f32 %v8412_v5, %v4774_v56 }
 0x824   : > { %v4642_v60 = vmax.f32 %v4610_v36, 0.0  ;;  %v4611_v32 = vadd.f32 %v8297_v24, %v4574_v63  ;;  %v4549_v5 = vmul.f32 %v8220_v58, %v9063_v62  ;;  %v4550_v48 = vmul.f32 %v8230_v28, %v9064_v11 }
 0x825   : > { %v4359_v26 = vpop.f32.mrb[144].mxu1  ;;  %v4729_v46 = vrot.slane %v4728_v0, 4  ;;  %v4845_v57 = vunpack.c.l.b16 %v4804_v43  ;;  %v4723_v50 = vmax.f32 %v4721_v21, %v4722_v33  ;;  %v4760_v29 = vrot.slane %v4759_v13, 1 }
 0x826   : > { %v4643_v55 = vmax.f32 %v4611_v32, 0.0  ;;  %v6324_v4 = vpop.f32.mrb[145].mxu1  ;;  %v4513_v19 = vmul.f32 %v9061_v51, %v4359_v26  ;;  %v4744_v37 = vsel %vm799_vm5, %v4642_v60, -inf  ;;  %v4807_v17 = vpack.c.bf16 %v4743_v59, %v4743_v59 }
 0x827   : > { %v4362_v2 = vpop.f32.mrb[146].mxu1  ;;  %v4730_v30 = vmax.f32 %v4728_v0, %v4729_v46  ;;  %v4724_v40 = vrot.slane %v4723_v50, 1  ;;  %v4866_v8 = vsel %vm4865_vm11, %v4845_v57, %v4864_v47  ;;  %v4776_v14 = vrot.slane %v4775_v49, 2  ;;  %v9066_v0 = vld [vmem:[#allocation32_spill] sm:$0xff] }
 0x828   : > { %v4745_v54 = vsel %vm799_vm5, %v4643_v55, -inf  ;;  %v4514_v42 = vmul.f32 %v9062_v15, %v4362_v2  ;;  %v6325_v35 = vpop.f32.mrb[147].mxu1  ;;  %v4577_v25 = vadd.f32 %v4545_v23, %v4513_v19  ;;  %v4792_v52 = vrot.slane %v8441_v61, 4 }
 0x829   : > { %v4746_v6 = vmax.f32 %v4744_v37, %v4745_v54  ;;  %v4731_v16 = vrot.slane %v4730_v30, 2  ;;  %v4725_v22 = vmax.f32 %v4723_v50, %v4724_v40  ;;  %v4761_v36 = vmax.f32 %v4759_v13, %v4760_v29 }
 0x82a   : > { %v4578_v1 = vadd.f32 %v4546_v20, %v4514_v42  ;;  %v4614_v44 = vadd.f32 %v8297_v24, %v4577_v25  ;;  %v4777_v45 = vmax.f32 %v4775_v49, %v4776_v14  ;;  %v4793_v33 = vmax.f32 %v8441_v61, %v4792_v52 }
 0x82b   : > { %v4747_v9 = vrot.slane %v4746_v6, 4  ;;  %v4732_v38 = vmax.f32 %v4730_v30, %v4731_v16  ;;  %v4805_v47 = vpack.c.bf16 %v4725_v22, %v4725_v22  ;;  %v4848_v4 = vunpack.c.l.b16 %v4807_v17 }
 0x82c   : > { %v4615_v41 = vadd.f32 %v8297_v24, %v4578_v1  ;;  %v4646_v27 = vmax.f32 %v4614_v44, 0.0  ;;  %v4809_v19 = vpack.c.bf16 %v4761_v36, %v4761_v36  ;;  %v4778_v30 = vrot.slane %v4777_v45, 1 }
 0x82d   : > { %v4748_v53 = vmax.f32 %v4746_v6, %v4747_v9  ;;  %v4441_v58 = vpop.f32.mrb[148].mxu1  ;;  %v4733_v28 = vrot.slane %v4732_v38, 1  ;;  %v4846_v63 = vunpack.c.l.b16 %v4805_v47  ;;  %v4794_v37 = vrot.slane %v4793_v33, 2 }
 0x82e   : > { %v4647_v10 = vmax.f32 %v4615_v41, 0.0  ;;  %v4517_v31 = vmul.f32 %v9065_v3, %v4441_v58  ;;  %v6336_v56 = vpop.f32.mrb[149].mxu1  ;;  %v4762_v21 = vsel %vm799_vm5, %v4646_v27, -inf  ;;  %v4850_v62 = vunpack.c.l.b16 %v4809_v19  ;;  %v6480_v19 = vld [vmem:[%s8600_s3 + $0xd0] sm:$0xff]  }
 0x82f   : > { %v4749_v34 = vrot.slane %v4748_v53, 2  ;;  %v4444_v18 = vpop.f32.mrb[150].mxu1  ;;  %v4734_v39 = vmax.f32 %v4732_v38, %v4733_v28  ;;  %v4868_v43 = vsel %vm4867_vm12, %v4846_v63, %v4866_v8 }
 0x830   : > { %v4763_v12 = vsel %vm799_vm5, %v4647_v10, -inf  ;;  %v4581_v23 = vadd.f32 %v4549_v5, %v4517_v31  ;;  %v4518_v60 = vmul.f32 %v9066_v0, %v4444_v18  ;;  %v6337_v32 = vpop.f32.mrb[151].mxu1  ;;  %v4779_v5 = vmax.f32 %v4777_v45, %v4778_v30  ;;  %v6474_v18 = vld [vmem:[%s8600_s3 + $0xc0] sm:$0xff]  }
 0x831   : > { %v4750_v7 = vmax.f32 %v4748_v53, %v4749_v34  ;;  %v4764_v20 = vmax.f32 %v4762_v21, %v4763_v12  ;;  %v4806_v26 = vpack.c.bf16 %v4734_v39, %v4734_v39  ;;  %v9067_v21 = vmov 0.0   ;;  %6357 = vmatpush3.bf16.msra.mxu0 %v6474_v18  ;;  %v6475_v39 = vld [vmem:[%s8600_s3 + $0xc8] sm:$0xff]   ;;  %v6476_v12 = vld [vmem:[%s8600_s3 + $0xe0] sm:$0xff]   ;;  %v5627_v18 = vld [vmem:[%s8601_s4 + $0x50] ss:$0 sm:$0xff] }
 0x832   : > { %v4618_v59 = vadd.f32 %v8297_v24, %v4581_v23  ;;  %v4582_v13 = vadd.f32 %v4550_v48, %v4518_v60  ;;  %v4811_v9 = vpack.c.bf16 %v4779_v5, %v4779_v5  ;;  %6358 = vmatprep.subr.bf16.mxu0 %v9067_v21  ;;  %v5601_v23 = vld [vmem:[%s8601_s4 + $0x30] ss:$0 sm:$0xff] }
 0x833   : > { %v4751_v46 = vrot.slane %v4750_v7, 1  ;;  %v4765_v55 = vrot.slane %v4764_v20, 4  ;;  %v4847_v57 = vunpack.c.l.b16 %v4806_v26 }
 0x834   : > { %v4650_v50 = vmax.f32 %v4618_v59, 0.0  ;;  %v4619_v51 = vadd.f32 %v8297_v24, %v4582_v13  ;;  %v4795_v24 = vmax.f32 %v4793_v33, %v4794_v37  ;;  %v4852_v47 = vunpack.c.l.b16 %v4811_v9  ;;  %v6477_v59 = vld [vmem:[%s8600_s3 + $0xf0] sm:$0xff]   ;;  %v6478_v13 = vld [vmem:[%s8600_s3 + $0xe8] sm:$0xff]  }
 0x835   : > { %v4752_v2 = vmax.f32 %v4750_v7, %v4751_v46  ;;  %v4766_v49 = vmax.f32 %v4764_v20, %v4765_v55  ;;  %v4869_v54 = vsel %vm4855_vm6, %v4848_v4, %v4847_v57  ;;  %6359 = vmatpush3.bf16.msra.mxu0 %v6475_v39  ;;  %v6479_v46 = vld [vmem:[%s8600_s3 + $0xf8] sm:$0xff]   ;;  %v5472_v37 = vld [vmem:[%s8601_s4 + $0x10] ss:$0 sm:$0xff] }
 0x836   : > { %v4651_v15 = vmax.f32 %v4619_v51, 0.0  ;;  %v4780_v35 = vsel %vm799_vm5, %v4650_v50, -inf  ;;  %v4796_v44 = vrot.slane %v4795_v24, 1  ;;  %6380 = vmatprep.subr.bf16.mxu0 %v9067_v21  ;;  %v5605_v55 = vld [vmem:[%s8601_s4 + $0x38] ss:$0 sm:$0xff] }
 0x837   : > { %v4808_v61 = vpack.c.bf16 %v4752_v2, %v4752_v2  ;;  %v4767_v42 = vrot.slane %v4766_v49, 2 }
 0x838   : > { %v4781_v40 = vsel %vm799_vm5, %v4651_v15, -inf  ;;  %v4797_v53 = vmax.f32 %v4795_v24, %v4796_v44  ;;  %v6481_v15 = vld [vmem:[%s8600_s3 + $0xd8] sm:$0xff]  }
 0x839   : > { %v4849_v6 = vunpack.c.l.b16 %v4808_v61  ;;  %v4768_v25 = vmax.f32 %v4766_v49, %v4767_v42  ;;  %v4782_v8 = vmax.f32 %v4780_v35, %v4781_v40  ;;  %v9068_v61 = vld [vmem:[#allocation60_spill] sm:$0xff] }
 0x83a   : > { %v4813_v10 = vpack.c.bf16 %v4797_v53, %v4797_v53  ;;  %v838_v42 = vadd.f32 %v5472_v37, %v9068_v61  ;;  %v6482_v40 = vld [vmem:[%s8600_s3 + $0x100] sm:$0xff]  }
 0x83b   : > { %v4870_v11 = vsel %vm4857_vm7, %v4849_v6, %v4869_v54  ;;  %v4769_v48 = vrot.slane %v4768_v25, 1  ;;  %v4783_v16 = vrot.slane %v4782_v8, 4  ;;  %v6483_v6 = vld [vmem:[%s8600_s3 + $0x108] sm:$0xff]  }
 0x83c   : > { %v4871_v1 = vsel %vm4859_vm8, %v4850_v62, %v4870_v11  ;;  %v4854_v56 = vunpack.c.l.b16 %v4813_v10  ;;  %v5029_v35 = vpack.c.bf16 %v838_v42, %v838_v42 }
 0x83d   : > { %v4770_v29 = vmax.f32 %v4768_v25, %v4769_v48  ;;  %v4784_v22 = vmax.f32 %v4782_v8, %v4783_v16  ;;  %v6484_v25 = vld [vmem:[%s8600_s3 + $0x110] sm:$0xff]   ;;  %v6485_v8 = vld [vmem:[%s8600_s3 + $0x118] sm:$0xff]  }
 0x83f   : > { %v4810_v17 = vpack.c.bf16 %v4770_v29, %v4770_v29  ;;  %v4785_v38 = vrot.slane %v4784_v22, 2 }
 0x841   : > { %v4851_v41 = vunpack.c.l.b16 %v4810_v17  ;;  %v4786_v14 = vmax.f32 %v4784_v22, %v4785_v38  ;;  %v5620_v17 = vld [vmem:[%s8601_s4 + $0x40] ss:$0 sm:$0xff] }
 0x843   : > { %v4872_v27 = vsel %vm4861_vm9, %v4851_v41, %v4871_v1  ;;  %v4787_v58 = vrot.slane %v4786_v14, 1 }
 0x844   : > { %v4873_v52 = vsel %vm4863_vm10, %v4852_v47, %v4872_v27 }
 0x845   : > { %v4788_v28 = vmax.f32 %v4786_v14, %v4787_v58  ;;  %v6486_v58 = vld [vmem:[%s8600_s3 + $0x120] sm:$0xff]  }
 0x847   : > { %v4812_v3 = vpack.c.bf16 %v4788_v28, %v4788_v28  ;;  %v5621_v28 = vld [vmem:[%s8601_s4 + $0x48] ss:$0 sm:$0xff] }
 0x849   : > { %v4853_v31 = vunpack.c.l.b16 %v4812_v3 }
 0x84b   : > { %v4874_v36 = vsel %vm4865_vm11, %v4853_v31, %v4873_v52  ;;  %v6487_v52 = vld [vmem:[%s8600_s3 + $0x128] sm:$0xff]  }
 0x84c   : > { %v4875_v63 = vsel %vm4867_vm12, %v4854_v56, %v4874_v36 }
 0x84d   : > { %v4876_v34 = vpack.c.b16 %v4875_v63, %v4868_v43 }
 0x84f   : > { %6349 = vmatmul.mubr.msk.bf16.vlgmr.msra.gmra.mrb[152].mxu1 %vm799_vm5, %v4876_v34 }
 0x850   : > { %6368 = vmatprep.mubr.msk.bf16.mxu1 %vm6597_vm1, %v9067_v21  ;;  %6365 = vmatpush3.bf16.msra.mxu1 %v6476_v12 }
 0x851   : > { %6366 = vmatprep.subr.bf16.mxu1 %v9067_v21 }
 0x854   : > { %6367 = vmatpush3.bf16.msra.mxu1 %v6478_v13 }
 0x855   : > { %6372 = vmatprep.subr.bf16.mxu1 %v9067_v21 }
 0x922   : > { %v4926_v0 = vpop.f32.mrb[152].mxu1 }
 0x923   : > { %v4927_v60 = vadd.f32 %v5601_v23, %v4926_v0  ;;  %v6350_v32 = vpop.f32.mrb[153].mxu1 }
 0x924   : > { %v4929_v45 = vpop.f32.mrb[154].mxu1 }
 0x925   : > { %v4930_v7 = vadd.f32 %v5601_v23, %v4929_v45  ;;  %v6351_v20 = vpop.f32.mrb[155].mxu1  ;;  %v4933_v43 = vmax.f32 %v4927_v60, 0.0 }
 0x927   : > { %v4934_v33 = vmax.f32 %v4930_v7, 0.0 }
 0x929   : > { %v4935_v26 = vpack.c.bf16 %v4934_v33, %v4933_v43 }
 0x92b   : > { %6361 = vmatmul.mubr.msk.bf16.vlgmr.msra.gmra.mrb[148].mxu0 %vm599_vm0, %v4935_v26 }
 0x92c   : > { %6384 = vmatprep.mubr.msk.bf16.mxu0 %vm6597_vm1, %v9067_v21  ;;  %6381 = vmatpush3.bf16.msra.mxu0 %v6477_v59 }
 0x92d   : > { %6382 = vmatprep.subr.bf16.mxu0 %v9067_v21 }
 0x930   : > { %6383 = vmatpush3.bf16.msra.mxu0 %v6479_v46 }
 0x931   : > { %6400 = vmatprep.subr.bf16.mxu0 %v9067_v21 }
 0x9fe   : > { %v5010_v4 = vpop.f32.mrb[148].mxu0 }
 0x9ff   : > { %v5011_v57 = vadd.f32 %v5605_v55, %v5010_v4  ;;  %v6362_v50 = vpop.f32.mrb[149].mxu0 }
 0xa00   : > { %v5013_v51 = vpop.f32.mrb[150].mxu0 }
 0xa01   : > { %v5030_v2 = vpack.c.bf16 %v5011_v57, %v5011_v57  ;;  %v5014_v49 = vadd.f32 %v5605_v55, %v5013_v51  ;;  %v6363_v30 = vpop.f32.mrb[151].mxu0 }
 0xa03   : > { %v5141_v54 = vpack.c.bf16 %v5014_v49, %v5014_v49  ;;  %6369 = vmatmul.mubr.msk.bf16.vlgmr.msra.gmra.mrb[156].mxu1 %vm799_vm5, %v5030_v2 }
 0xa04   : > { %6373 = vmatpush3.bf16.msra.mxu1 %v6480_v19  ;;  %6376 = vmatprep.mubr.msk.bf16.mxu1 %vm6597_vm1, %v9067_v21 }
 0xa05   : > { %6385 = vmatmul.mubr.msk.bf16.vlgmr.msra.gmra.mrb[152].mxu0 %vm799_vm5, %v5141_v54  ;;  %6374 = vmatprep.subr.bf16.mxu1 %v9067_v21 }
 0xa06   : > { %6404 = vmatprep.mubr.msk.bf16.mxu0 %vm6597_vm1, %v9067_v21  ;;  %6401 = vmatpush3.bf16.msra.mxu0 %v6486_v58 }
 0xa07   : > { %6402 = vmatprep.subr.bf16.mxu0 %v9067_v21 }
 0xa08   : > { %6375 = vmatpush3.bf16.msra.mxu1 %v6481_v15 }
 0xa09   : > { %6388 = vmatprep.subr.bf16.mxu1 %v9067_v21 }
 0xa0a   : > { %6403 = vmatpush3.bf16.msra.mxu0 %v6487_v52 }
 0xa0b   : > { %6377 = vmatmul.mubr.msk.bf16.vlgmr.msra.gmra.mrb[160].mxu1 %vm799_vm5, %v5029_v35 }
 0xa0c   : > { %6396 = vmatprep.mubr.msk.bf16.mxu1 %vm6597_vm1, %v9067_v21  ;;  %6389 = vmatpush3.bf16.msra.mxu1 %v6482_v40 }
 0xa0d   : > { %6390 = vmatprep.subr.bf16.mxu1 %v9067_v21 }
 0xa10   : > { %6391 = vmatpush3.bf16.msra.mxu1 %v6483_v6 }
 0xa11   : > { %6392 = vmatprep.subr.bf16.mxu1 %v9067_v21 }
 0xa14   : > { %6393 = vmatpush3.bf16.msra.mxu1 %v6484_v25 }
 0xa15   : > { %6394 = vmatprep.subr.bf16.mxu1 %v9067_v21 }
 0xa18   : > { %6395 = vmatpush3.bf16.msra.mxu1 %v6485_v8 }
 0xad6   : > { %v5080_v62 = vpop.f32.mrb[156].mxu1 }
 0xad7   : > { %v6370_v5 = vpop.f32.mrb[157].mxu1 }
 0xad8   : > { %v5083_v24 = vpop.f32.mrb[158].mxu1  ;;  %v5191_v11 = vpop.f32.mrb[152].mxu0 }
 0xad9   : > { %v6371_v48 = vpop.f32.mrb[159].mxu1  ;;  %v6386_v16 = vpop.f32.mrb[153].mxu0 }
 0xada   : > { %v5194_v1 = vpop.f32.mrb[154].mxu0 }
 0xadb   : > { %v6387_v29 = vpop.f32.mrb[155].mxu0 }
 0xade   : > { %v5135_v22 = vpop.f32.mrb[160].mxu1 }
 0xadf   : > { %v5136_v9 = vadd.f32 %v5135_v22, %v5080_v62  ;;  %v6378_v44 = vpop.f32.mrb[161].mxu1 }
 0xae0   : > { %v5138_v38 = vpop.f32.mrb[162].mxu1 }
 0xae1   : > { %v5197_v41 = vadd.f32 %v5191_v11, %v5136_v9  ;;  %v6379_v14 = vpop.f32.mrb[163].mxu1 }
 0xae3   : > { %v5203_v47 = vadd.f32 %v5620_v17, %v5197_v41 }
 0xae5   : > { %v5204_v53 = vmax.f32 %v5203_v47, 0.0 }
 0xae7   : > { %v5205_v27 = vpack.c.bf16 %v5204_v53, %v5204_v53 }
 0xae9   : > { %6397 = vmatmul.mubr.msk.bf16.vlgmr.msra.gmra.mrb[164].mxu1 %vm599_vm0, %v5205_v27 }
 0xbbc   : > { %v5280_v10 = vpop.f32.mrb[164].mxu1 }
 0xbbd   : > { %v5281_v3 = vadd.f32 %v5621_v28, %v5280_v10  ;;  %v6398_v31 = vpop.f32.mrb[165].mxu1 }
 0xbbe   : > { %v5283_v56 = vpop.f32.mrb[166].mxu1 }
 0xbbf   : > { %v5286_v36 = vmax.f32 %v5281_v3, 0.0  ;;  %v6399_v63 = vpop.f32.mrb[167].mxu1 }
 0xbc1   : > { %v5287_v34 = vpack.c.bf16 %v5286_v36, %v5286_v36 }
 0xbc3   : > { %6405 = vmatmul.mubr.msk.bf16.vlgmr.msra.gmra.mrb[156].mxu0 %vm799_vm5, %v5287_v34 }
 0xc96   : > { %v5346_v21 = vpop.f32.mrb[156].mxu0 }
 0xc97   : > { %v5347_v39 = vadd.f32 %v5627_v18, %v5346_v21  ;;  %v6406_v12 = vpop.f32.mrb[157].mxu0 }
 0xc98   : > { %v5349_v23 = vpop.f32.mrb[158].mxu0 }
 0xc99   : > { %5353 = vst.msk [vmem:[%s595_s29] sm:$0xff] %vm5352_vm13, %v5347_v39  ;;  %v6407_v0 = vpop.f32.mrb[159].mxu0 }
 0xc9a PF: > { %p12_p9 = scmp.ge.s32.totalorder %s6645_s22, 4   ;;  %s9069_s18 = smov %s6590_s19 }
 0xc9b   : > { %s9070_s19 = smov %s6654_s25  ;;  %s9071_s20 = smov %s6645_s22 }
 0xc9c   :  { %14 = sbr.rel (!%p12_p9) target bundleno = 2 (0x2), region = 168 }

</bundles_post_ra>
